<compile_context>
chip_gen: v7x
topology: tpu7x:2x2x1
jax: 0.10.0
libtpu: 0.0.40
codegen_flags: <defaults>
</compile_context>

<pallas_src>
import math

import jax
import jax.numpy as jnp
from jax.experimental import pallas as pl
from jax.experimental.pallas import tpu as pltpu


# --------------------------------------------------------------------------
# helpers
# --------------------------------------------------------------------------
def _round_up(x, m):
    return ((x + m - 1) // m) * m


# --------------------------------------------------------------------------
# Pallas kernel 1: transposed conv matmul, fused bias + PReLU
#   o (Cout, TM) = prelu( W (Cout, K) @ Xt (K, TM) + b (Cout, 1) )
# Lane axis (last dim) is the patch axis M -> dense (unmasked) vector stores.
# --------------------------------------------------------------------------
def conv_mm_prelu_kernel(alpha_ref, w_ref, xt_ref, b_ref, o_ref):
    acc = jnp.dot(w_ref[...], xt_ref[...], preferred_element_type=jnp.float32)
    acc = acc + b_ref[...]                       # (Cout, TM) + (Cout, 1)
    a = alpha_ref[0]
    o_ref[...] = jnp.where(acc >= 0.0, acc, a * acc)


def conv_matmul_prelu_t(xt, w, b, alpha, *, tm=512):
    """xt: (K, M) bf16 patches^T, w: (Cout, K), b: (Cout,), alpha: (1,) f32.
    Returns (Cout, M) f32."""
    K, M = xt.shape
    Cout = w.shape[0]
    TM = min(tm, _round_up(M, 128))
    Mp = _round_up(M, TM)
    xt_p = jnp.pad(xt, ((0, 0), (0, Mp - M)))

    out = pl.pallas_call(
        conv_mm_prelu_kernel,
        out_shape=jax.ShapeDtypeStruct((Cout, Mp), jnp.float32),
        grid=(Mp // TM,),
        in_specs=[
            pl.BlockSpec(memory_space=pltpu.MemorySpace.SMEM),   # alpha
            pl.BlockSpec((Cout, K), lambda i: (0, 0)),           # full weight
            pl.BlockSpec((K, TM), lambda i: (0, i)),             # patch tile
            pl.BlockSpec((Cout, 1), lambda i: (0, 0)),           # bias
        ],
        out_specs=pl.BlockSpec((Cout, TM), lambda i: (0, i)),
        compiler_params=pltpu.CompilerParams(
            dimension_semantics=("parallel",)),
    )(alpha, w.astype(jnp.bfloat16), xt_p,
      b.reshape(Cout, 1).astype(jnp.float32))
    return out[:, :M]


# --------------------------------------------------------------------------
# Conv3d = channel-major im2col (JAX glue, no transpose) + Pallas matmul
# --------------------------------------------------------------------------
def _im2col_3d_t(x, ksize, stride, padding):
    """x: (C, N, D, H, W) -> patches^T (C*k^3, N*Do*Ho*Wo) in bf16.
    Row (feature) order is (C, kd, kh, kw) -- matches torch weight.reshape."""
    C, N, D, H, W = x.shape
    p = padding
    xp = jnp.pad(x, ((0, 0), (0, 0), (p, p), (p, p), (p, p)))
    Do = (D + 2 * p - ksize) // stride + 1
    Ho = (H + 2 * p - ksize) // stride + 1
    Wo = (W + 2 * p - ksize) // stride + 1
    cols = []
    for kd in range(ksize):
        for kh in range(ksize):
            for kw in range(ksize):
                cols.append(xp[:, :,
                               kd:kd + Do * stride:stride,
                               kh:kh + Ho * stride:stride,
                               kw:kw + Wo * stride:stride])
    patches = jnp.stack(cols, axis=1)            # (C, 27, N, Do, Ho, Wo)
    patches = patches.reshape(C * ksize ** 3, N * Do * Ho * Wo)
    return patches.astype(jnp.bfloat16), (N, Do, Ho, Wo)


def conv3d_prelu(x, w, b, alpha, *, stride, padding, ksize=3):
    """x: (C, N, D, H, W) -> (Cout, N, Do, Ho, Wo) with fused bias + PReLU.
    Output stays channel-major (no transpose needed)."""
    xt, (N, Do, Ho, Wo) = _im2col_3d_t(x, ksize, stride, padding)
    y = conv_matmul_prelu_t(xt, w, b, alpha)     # (Cout, N*Do*Ho*Wo)
    Cout = w.shape[0]
    return y.reshape(Cout, N, Do, Ho, Wo)


def maxpool3d_2x2x2(x):
    """MaxPool3d(2) on (C, N, D, H, W) via three pairwise maxima (plain JAX)."""
    C, N, D, H, W = x.shape
    x = x[:, :, : (D // 2) * 2, : (H // 2) * 2, : (W // 2) * 2]
    x = jnp.maximum(x[:, :, 0::2], x[:, :, 1::2])
    x = jnp.maximum(x[:, :, :, 0::2], x[:, :, :, 1::2])
    x = jnp.maximum(x[..., 0::2], x[..., 1::2])
    return x


# --------------------------------------------------------------------------
# Pallas kernel 2: fused fc1 + PReLU + fc2 + PReLU + fc3 over an agents grid
# --------------------------------------------------------------------------
def fused_fc_kernel(a4_ref, a5_ref, x_ref, w1_ref, b1_ref,
                    w2_ref, b2_ref, w3_ref, b3_ref, o_ref):
    i = pl.program_id(0)
    x = x_ref[0]                                                     # (Bp, 864)
    h = jnp.dot(x, w1_ref[0], preferred_element_type=jnp.float32) + b1_ref[0]
    a4 = a4_ref[i]
    h = jnp.where(h >= 0.0, h, a4 * h)
    h = jnp.dot(h, w2_ref[0], preferred_element_type=jnp.float32) + b2_ref[0]
    a5 = a5_ref[i]
    h = jnp.where(h >= 0.0, h, a5 * h)
    o_ref[0] = jnp.dot(h, w3_ref[0], preferred_element_type=jnp.float32) + b3_ref[0]


def fused_fc(x_feat, params):
    """x_feat: (agents, B, 864) f32 -> (agents, B, number_actions) f32."""
    A, B, F = x_feat.shape
    H1 = params["fc1_w"].shape[-1]
    H2 = params["fc2_w"].shape[-1]
    NA = params["fc3_w"].shape[-1]
    Bp = _round_up(max(B, 8), 8)
    xp = jnp.pad(x_feat, ((0, 0), (0, Bp - B), (0, 0)))

    out = pl.pallas_call(
        fused_fc_kernel,
        out_shape=jax.ShapeDtypeStruct((A, Bp, NA), jnp.float32),
        grid=(A,),
        in_specs=[
            pl.BlockSpec(memory_space=pltpu.MemorySpace.SMEM),       # prelu4 (A,)
            pl.BlockSpec(memory_space=pltpu.MemorySpace.SMEM),       # prelu5 (A,)
            pl.BlockSpec((1, Bp, F), lambda a: (a, 0, 0)),           # features
            pl.BlockSpec((1, F, H1), lambda a: (a, 0, 0)),           # fc1_w
            pl.BlockSpec((1, 1, H1), lambda a: (a, 0, 0)),           # fc1_b
            pl.BlockSpec((1, H1, H2), lambda a: (a, 0, 0)),          # fc2_w
            pl.BlockSpec((1, 1, H2), lambda a: (a, 0, 0)),           # fc2_b
            pl.BlockSpec((1, H2, NA), lambda a: (a, 0, 0)),          # fc3_w
            pl.BlockSpec((1, 1, NA), lambda a: (a, 0, 0)),           # fc3_b
        ],
        out_specs=pl.BlockSpec((1, Bp, NA), lambda a: (a, 0, 0)),
        compiler_params=pltpu.CompilerParams(
            dimension_semantics=("parallel",)),
    )(params["prelu4"], params["prelu5"], xp,
      params["fc1_w"], params["fc1_b"],
      params["fc2_w"], params["fc2_b"],
      params["fc3_w"], params["fc3_b"])
    return out[:, :B]


# --------------------------------------------------------------------------
# Parameter init (deterministic, mirrors shapes of the PyTorch module)
# --------------------------------------------------------------------------
def _xavier_uniform(key, shape, fan_in, fan_out):
    bound = math.sqrt(6.0 / (fan_in + fan_out))
    return jax.random.uniform(key, shape, jnp.float32, -bound, bound)


def _default_bias(key, fan_in, shape):
    bound = 1.0 / math.sqrt(fan_in)
    return jax.random.uniform(key, shape, jnp.float32, -bound, bound)


def _init_conv(key, cin, cout, k=3):
    kw, kb = jax.random.split(key)
    fan_in, fan_out = cin * k ** 3, cout * k ** 3
    w = _xavier_uniform(kw, (cout, cin, k, k, k), fan_in, fan_out)
    w_mat = w.reshape(cout, cin * k ** 3)            # (Cout, K), torch reshape order
    b = _default_bias(kb, fan_in, (cout,))
    return w_mat, b


def _init_linear(key, fin, fout):
    kw, kb = jax.random.split(key)
    w = _xavier_uniform(kw, (fout, fin), fin, fout)  # torch layout (out, in)
    return w.T, _default_bias(kb, fin, (fout,))      # matmul-ready (in, out)


def init_params(key, agents, n_sample_points, number_actions):
    keys = jax.random.split(key, 3 + 3 * agents)
    params = {}
    params["conv0_w"], params["conv0_b"] = _init_conv(keys[0], n_sample_points, 16)
    params["conv1_w"], params["conv1_b"] = _init_conv(keys[1], 16, 32)
    params["conv2_w"], params["conv2_b"] = _init_conv(keys[2], 32, 32)
    fc1, fc2, fc3 = [], [], []
    for i in range(agents):
        fc1.append(_init_linear(keys[3 + 3 * i + 0], 864, 128))
        fc2.append(_init_linear(keys[3 + 3 * i + 1], 128, 64))
        fc3.append(_init_linear(keys[3 + 3 * i + 2], 64, number_actions))
    params["fc1_w"] = jnp.stack([w for w, _ in fc1])
    params["fc1_b"] = jnp.stack([b for _, b in fc1]).reshape(agents, 1, -1)
    params["fc2_w"] = jnp.stack([w for w, _ in fc2])
    params["fc2_b"] = jnp.stack([b for _, b in fc2]).reshape(agents, 1, -1)
    params["fc3_w"] = jnp.stack([w for w, _ in fc3])
    params["fc3_b"] = jnp.stack([b for _, b in fc3]).reshape(agents, 1, -1)
    # PReLU alphas (PyTorch default = 0.25, one shared scalar each), traced.
    params["prelu0"] = jnp.full((1,), 0.25, jnp.float32)
    params["prelu1"] = jnp.full((1,), 0.25, jnp.float32)
    params["prelu2"] = jnp.full((1,), 0.25, jnp.float32)
    params["prelu4"] = jnp.full((agents,), 0.25, jnp.float32)
    params["prelu5"] = jnp.full((agents,), 0.25, jnp.float32)
    return params


# --------------------------------------------------------------------------
# Forward pass (Experiment.WORK_ALONE)
# --------------------------------------------------------------------------
def network3d_forward(params, state):
    """state: (B, agents, C, D, H, W) -> (B, agents, number_actions)."""
    B, A, C = state.shape[0], state.shape[1], state.shape[2]
    # Fold agents into the batch (conv weights are shared) and go channel-major:
    # (C, A*B, D, H, W) with sample index n = a*B + b.
    x = state.transpose(2, 1, 0, 3, 4, 5).reshape(C, A * B, *state.shape[3:])
    x = conv3d_prelu(x, params["conv0_w"], params["conv0_b"], params["prelu0"],
                     stride=2, padding=2)
    x = maxpool3d_2x2x2(x)
    x = conv3d_prelu(x, params["conv1_w"], params["conv1_b"], params["prelu1"],
                     stride=1, padding=2)
    x = maxpool3d_2x2x2(x)
    x = conv3d_prelu(x, params["conv2_w"], params["conv2_b"], params["prelu2"],
                     stride=1, padding=2)
    x = maxpool3d_2x2x2(x)                                    # (32, A*B, 3, 3, 3)
    # torch .view(-1, 864): per-sample features ordered (C, d, h, w)
    feat = x.transpose(1, 0, 2, 3, 4).reshape(A, B, -1)       # (A, B, 864)
    out = fused_fc(feat, params)                              # (A, B, nA)
    return out.transpose(1, 0, 2)                             # (B, A, nA)


# --------------------------------------------------------------------------
if __name__ == "__main__":
    key = jax.random.PRNGKey(0)

    batch = 2
    agents = 2
    n_sample_points = 4       # conv0 in_channels
    number_actions = 6
    img = 21                  # 21^3 -> final 3x3x3 feature map -> 32*27 = 864 (fc1 in_features)

    params = init_params(key, agents, n_sample_points, number_actions)
    state = jax.random.normal(
        jax.random.fold_in(key, 123),
        (batch, agents, n_sample_points, img, img, img),
        dtype=jnp.float32,
    )

    fwd = jax.jit(lambda s: network3d_forward(params, s))
    out = fwd(state)
    out = jax.block_until_ready(out)

    assert out.shape == (batch, agents, number_actions), out.shape
    assert jnp.all(jnp.isfinite(out))
    print("KERNEL_OK")
</pallas_src>

<mosaic_0001>
module attributes {stable_mosaic.version = 11 : i64} {
  func.func @conv_mm_prelu_kernel(%arg0: i32, %arg1: memref<1xf32, #tpu.memory_space<smem>>, %arg2: memref<16x108xbf16, #tpu.memory_space<vmem>>, %arg3: memref<108x512xbf16, #tpu.memory_space<vmem>>, %arg4: memref<16x1xf32, #tpu.memory_space<vmem>>, %arg5: memref<16x512xf32, #tpu.memory_space<vmem>>) attributes {dimension_semantics = [#tpu.dimension_semantics<parallel>], iteration_bounds = array<i64: 14>, scalar_prefetch = 0 : i64, scratch_operands = 0 : i64, tpu.core_type = #tpu.core_type<tc>, window_params = [{transform_indices = @transform_0, window_bounds = array<i64: 1>}, {pipeline_mode = #tpu.pipeline_mode<synchronous>, transform_indices = @transform_1, window_bounds = array<i64: 16, 108>}, {transform_indices = @transform_2, window_bounds = array<i64: 108, 512>}, {pipeline_mode = #tpu.pipeline_mode<synchronous>, transform_indices = @transform_3, window_bounds = array<i64: 16, 1>}, {transform_indices = @transform_4, window_bounds = array<i64: 16, 512>}]} {
    %c0 = arith.constant 0 : index
    %c0_0 = arith.constant 0 : index
    %0 = vector.load %arg2[%c0, %c0_0] : memref<16x108xbf16, #tpu.memory_space<vmem>>, vector<16x108xbf16>
    %c0_1 = arith.constant 0 : index
    %c0_2 = arith.constant 0 : index
    %1 = vector.load %arg3[%c0_1, %c0_2] : memref<108x512xbf16, #tpu.memory_space<vmem>>, vector<108x512xbf16>
    %cst = arith.constant dense<0.000000e+00> : vector<16x512xf32>
    %2 = tpu.matmul %0, %1, %cst {dimension_numbers = #tpu.dot_dimension_numbers<[1], [0], [0], [1], [0, 0, 1, 1], [], []>} : vector<16x108xbf16>, vector<108x512xbf16>, vector<16x512xf32> -> vector<16x512xf32>
    %c0_3 = arith.constant 0 : index
    %c0_4 = arith.constant 0 : index
    %3 = vector.load %arg4[%c0_3, %c0_4] : memref<16x1xf32, #tpu.memory_space<vmem>>, vector<16x1xf32>
    %4 = vector.broadcast %3 : vector<16x1xf32> to vector<16x512xf32>
    %5 = arith.addf %2, %4 : vector<16x512xf32>
    %c0_5 = arith.constant 0 : index
    %6 = memref.load %arg1[%c0_5] : memref<1xf32, #tpu.memory_space<smem>>
    %cst_6 = arith.constant 0.000000e+00 : f32
    %7 = vector.broadcast %cst_6 : f32 to vector<16x512xf32>
    %8 = arith.cmpf oge, %5, %7 : vector<16x512xf32>
    %9 = vector.broadcast %6 : f32 to vector<16x512xf32>
    %10 = arith.mulf %9, %5 : vector<16x512xf32>
    %11 = arith.select %8, %5, %10 : vector<16x512xi1>, vector<16x512xf32>
    %c0_7 = arith.constant 0 : index
    %c0_8 = arith.constant 0 : index
    %12 = vector.load %arg5[%c0_7, %c0_8] : memref<16x512xf32, #tpu.memory_space<vmem>>, vector<16x512xf32>
    tpu.vector_store %arg5[%c0_7, %c0_8], %11 {strides = array<i32>} : memref<16x512xf32, #tpu.memory_space<vmem>>, vector<16x512xf32>,
    return
  }
  func.func @transform_0(%arg0: i32) -> i32 {
    %c0_i32 = arith.constant 0 : i32
    %c0_i32_0 = arith.constant 0 : i32
    return %c0_i32 : i32
  }
  func.func @transform_1(%arg0: i32) -> (i32, i32) {
    %c0_i32 = arith.constant 0 : i32
    %c0_i32_0 = arith.constant 0 : i32
    %c0_i32_1 = arith.constant 0 : i32
    return %c0_i32, %c0_i32_0 : i32, i32
  }
  func.func @transform_2(%arg0: i32) -> (i32, i32) {
    %c0_i32 = arith.constant 0 : i32
    %c0_i32_0 = arith.constant 0 : i32
    return %c0_i32, %arg0 : i32, i32
  }
  func.func @transform_3(%arg0: i32) -> (i32, i32) {
    %c0_i32 = arith.constant 0 : i32
    %c0_i32_0 = arith.constant 0 : i32
    %c0_i32_1 = arith.constant 0 : i32
    return %c0_i32, %c0_i32_0 : i32, i32
  }
  func.func @transform_4(%arg0: i32) -> (i32, i32) {
    %c0_i32 = arith.constant 0 : i32
    %c0_i32_0 = arith.constant 0 : i32
    return %c0_i32, %arg0 : i32, i32
  }
}

module attributes {stable_mosaic.version = 11 : i64} {
  func.func @conv_mm_prelu_kernel(%arg0: i32, %arg1: memref<1xf32, #tpu.memory_space<smem>>, %arg2: memref<32x432xbf16, #tpu.memory_space<vmem>>, %arg3: memref<432x512xbf16, #tpu.memory_space<vmem>>, %arg4: memref<32x1xf32, #tpu.memory_space<vmem>>, %arg5: memref<32x512xf32, #tpu.memory_space<vmem>>) attributes {dimension_semantics = [#tpu.dimension_semantics<parallel>], iteration_bounds = array<i64: 4>, scalar_prefetch = 0 : i64, scratch_operands = 0 : i64, tpu.core_type = #tpu.core_type<tc>, window_params = [{transform_indices = @transform_0, window_bounds = array<i64: 1>}, {pipeline_mode = #tpu.pipeline_mode<synchronous>, transform_indices = @transform_1, window_bounds = array<i64: 32, 432>}, {transform_indices = @transform_2, window_bounds = array<i64: 432, 512>}, {pipeline_mode = #tpu.pipeline_mode<synchronous>, transform_indices = @transform_3, window_bounds = array<i64: 32, 1>}, {transform_indices = @transform_4, window_bounds = array<i64: 32, 512>}]} {
    %c0 = arith.constant 0 : index
    %c0_0 = arith.constant 0 : index
    %0 = vector.load %arg2[%c0, %c0_0] : memref<32x432xbf16, #tpu.memory_space<vmem>>, vector<32x432xbf16>
    %c0_1 = arith.constant 0 : index
    %c0_2 = arith.constant 0 : index
    %1 = vector.load %arg3[%c0_1, %c0_2] : memref<432x512xbf16, #tpu.memory_space<vmem>>, vector<432x512xbf16>
    %cst = arith.constant dense<0.000000e+00> : vector<32x512xf32>
    %2 = tpu.matmul %0, %1, %cst {dimension_numbers = #tpu.dot_dimension_numbers<[1], [0], [0], [1], [0, 0, 1, 1], [], []>} : vector<32x432xbf16>, vector<432x512xbf16>, vector<32x512xf32> -> vector<32x512xf32>
    %c0_3 = arith.constant 0 : index
    %c0_4 = arith.constant 0 : index
    %3 = vector.load %arg4[%c0_3, %c0_4] : memref<32x1xf32, #tpu.memory_space<vmem>>, vector<32x1xf32>
    %4 = vector.broadcast %3 : vector<32x1xf32> to vector<32x512xf32>
    %5 = arith.addf %2, %4 : vector<32x512xf32>
    %c0_5 = arith.constant 0 : index
    %6 = memref.load %arg1[%c0_5] : memref<1xf32, #tpu.memory_space<smem>>
    %cst_6 = arith.constant 0.000000e+00 : f32
    %7 = vector.broadcast %cst_6 : f32 to vector<32x512xf32>
    %8 = arith.cmpf oge, %5, %7 : vector<32x512xf32>
    %9 = vector.broadcast %6 : f32 to vector<32x512xf32>
    %10 = arith.mulf %9, %5 : vector<32x512xf32>
    %11 = arith.select %8, %5, %10 : vector<32x512xi1>, vector<32x512xf32>
    %c0_7 = arith.constant 0 : index
    %c0_8 = arith.constant 0 : index
    %12 = vector.load %arg5[%c0_7, %c0_8] : memref<32x512xf32, #tpu.memory_space<vmem>>, vector<32x512xf32>
    tpu.vector_store %arg5[%c0_7, %c0_8], %11 {strides = array<i32>} : memref<32x512xf32, #tpu.memory_space<vmem>>, vector<32x512xf32>,
    return
  }
  func.func @transform_0(%arg0: i32) -> i32 {
    %c0_i32 = arith.constant 0 : i32
    %c0_i32_0 = arith.constant 0 : i32
    return %c0_i32 : i32
  }
  func.func @transform_1(%arg0: i32) -> (i32, i32) {
    %c0_i32 = arith.constant 0 : i32
    %c0_i32_0 = arith.constant 0 : i32
    %c0_i32_1 = arith.constant 0 : i32
    return %c0_i32, %c0_i32_0 : i32, i32
  }
  func.func @transform_2(%arg0: i32) -> (i32, i32) {
    %c0_i32 = arith.constant 0 : i32
    %c0_i32_0 = arith.constant 0 : i32
    return %c0_i32, %arg0 : i32, i32
  }
  func.func @transform_3(%arg0: i32) -> (i32, i32) {
    %c0_i32 = arith.constant 0 : i32
    %c0_i32_0 = arith.constant 0 : i32
    %c0_i32_1 = arith.constant 0 : i32
    return %c0_i32, %c0_i32_0 : i32, i32
  }
  func.func @transform_4(%arg0: i32) -> (i32, i32) {
    %c0_i32 = arith.constant 0 : i32
    %c0_i32_0 = arith.constant 0 : i32
    return %c0_i32, %arg0 : i32, i32
  }
}

module attributes {stable_mosaic.version = 11 : i64} {
  func.func @conv_mm_prelu_kernel(%arg0: i32, %arg1: memref<1xf32, #tpu.memory_space<smem>>, %arg2: memref<32x864xbf16, #tpu.memory_space<vmem>>, %arg3: memref<864x512xbf16, #tpu.memory_space<vmem>>, %arg4: memref<32x1xf32, #tpu.memory_space<vmem>>, %arg5: memref<32x512xf32, #tpu.memory_space<vmem>>) attributes {dimension_semantics = [#tpu.dimension_semantics<parallel>], iteration_bounds = array<i64: 2>, scalar_prefetch = 0 : i64, scratch_operands = 0 : i64, tpu.core_type = #tpu.core_type<tc>, window_params = [{transform_indices = @transform_0, window_bounds = array<i64: 1>}, {pipeline_mode = #tpu.pipeline_mode<synchronous>, transform_indices = @transform_1, window_bounds = array<i64: 32, 864>}, {transform_indices = @transform_2, window_bounds = array<i64: 864, 512>}, {pipeline_mode = #tpu.pipeline_mode<synchronous>, transform_indices = @transform_3, window_bounds = array<i64: 32, 1>}, {transform_indices = @transform_4, window_bounds = array<i64: 32, 512>}]} {
    %c0 = arith.constant 0 : index
    %c0_0 = arith.constant 0 : index
    %0 = vector.load %arg2[%c0, %c0_0] : memref<32x864xbf16, #tpu.memory_space<vmem>>, vector<32x864xbf16>
    %c0_1 = arith.constant 0 : index
    %c0_2 = arith.constant 0 : index
    %1 = vector.load %arg3[%c0_1, %c0_2] : memref<864x512xbf16, #tpu.memory_space<vmem>>, vector<864x512xbf16>
    %cst = arith.constant dense<0.000000e+00> : vector<32x512xf32>
    %2 = tpu.matmul %0, %1, %cst {dimension_numbers = #tpu.dot_dimension_numbers<[1], [0], [0], [1], [0, 0, 1, 1], [], []>} : vector<32x864xbf16>, vector<864x512xbf16>, vector<32x512xf32> -> vector<32x512xf32>
    %c0_3 = arith.constant 0 : index
    %c0_4 = arith.constant 0 : index
    %3 = vector.load %arg4[%c0_3, %c0_4] : memref<32x1xf32, #tpu.memory_space<vmem>>, vector<32x1xf32>
    %4 = vector.broadcast %3 : vector<32x1xf32> to vector<32x512xf32>
    %5 = arith.addf %2, %4 : vector<32x512xf32>
    %c0_5 = arith.constant 0 : index
    %6 = memref.load %arg1[%c0_5] : memref<1xf32, #tpu.memory_space<smem>>
    %cst_6 = arith.constant 0.000000e+00 : f32
    %7 = vector.broadcast %cst_6 : f32 to vector<32x512xf32>
    %8 = arith.cmpf oge, %5, %7 : vector<32x512xf32>
    %9 = vector.broadcast %6 : f32 to vector<32x512xf32>
    %10 = arith.mulf %9, %5 : vector<32x512xf32>
    %11 = arith.select %8, %5, %10 : vector<32x512xi1>, vector<32x512xf32>
    %c0_7 = arith.constant 0 : index
    %c0_8 = arith.constant 0 : index
    %12 = vector.load %arg5[%c0_7, %c0_8] : memref<32x512xf32, #tpu.memory_space<vmem>>, vector<32x512xf32>
    tpu.vector_store %arg5[%c0_7, %c0_8], %11 {strides = array<i32>} : memref<32x512xf32, #tpu.memory_space<vmem>>, vector<32x512xf32>,
    return
  }
  func.func @transform_0(%arg0: i32) -> i32 {
    %c0_i32 = arith.constant 0 : i32
    %c0_i32_0 = arith.constant 0 : i32
    return %c0_i32 : i32
  }
  func.func @transform_1(%arg0: i32) -> (i32, i32) {
    %c0_i32 = arith.constant 0 : i32
    %c0_i32_0 = arith.constant 0 : i32
    %c0_i32_1 = arith.constant 0 : i32
    return %c0_i32, %c0_i32_0 : i32, i32
  }
  func.func @transform_2(%arg0: i32) -> (i32, i32) {
    %c0_i32 = arith.constant 0 : i32
    %c0_i32_0 = arith.constant 0 : i32
    return %c0_i32, %arg0 : i32, i32
  }
  func.func @transform_3(%arg0: i32) -> (i32, i32) {
    %c0_i32 = arith.constant 0 : i32
    %c0_i32_0 = arith.constant 0 : i32
    %c0_i32_1 = arith.constant 0 : i32
    return %c0_i32, %c0_i32_0 : i32, i32
  }
  func.func @transform_4(%arg0: i32) -> (i32, i32) {
    %c0_i32 = arith.constant 0 : i32
    %c0_i32_0 = arith.constant 0 : i32
    return %c0_i32, %arg0 : i32, i32
  }
}

module attributes {stable_mosaic.version = 11 : i64} {
  func.func @fused_fc_kernel(%arg0: i32, %arg1: memref<2xf32, #tpu.memory_space<smem>>, %arg2: memref<2xf32, #tpu.memory_space<smem>>, %arg3: memref<1x8x864xf32, #tpu.memory_space<vmem>>, %arg4: memref<1x864x128xf32, #tpu.memory_space<vmem>>, %arg5: memref<1x1x128xf32, #tpu.memory_space<vmem>>, %arg6: memref<1x128x64xf32, #tpu.memory_space<vmem>>, %arg7: memref<1x1x64xf32, #tpu.memory_space<vmem>>, %arg8: memref<1x64x6xf32, #tpu.memory_space<vmem>>, %arg9: memref<1x1x6xf32, #tpu.memory_space<vmem>>, %arg10: memref<1x8x6xf32, #tpu.memory_space<vmem>>) attributes {dimension_semantics = [#tpu.dimension_semantics<parallel>], iteration_bounds = array<i64: 2>, scalar_prefetch = 0 : i64, scratch_operands = 0 : i64, tpu.core_type = #tpu.core_type<tc>, window_params = [{transform_indices = @transform_0, window_bounds = array<i64: 2>}, {transform_indices = @transform_1, window_bounds = array<i64: 2>}, {transform_indices = @transform_2, window_bounds = array<i64: 1, 8, 864>}, {transform_indices = @transform_3, window_bounds = array<i64: 1, 864, 128>}, {transform_indices = @transform_4, window_bounds = array<i64: 1, 1, 128>}, {transform_indices = @transform_5, window_bounds = array<i64: 1, 128, 64>}, {transform_indices = @transform_6, window_bounds = array<i64: 1, 1, 64>}, {transform_indices = @transform_7, window_bounds = array<i64: 1, 64, 6>}, {transform_indices = @transform_8, window_bounds = array<i64: 1, 1, 6>}, {transform_indices = @transform_9, window_bounds = array<i64: 1, 8, 6>}]} {
    %c0 = arith.constant 0 : index
    %c0_0 = arith.constant 0 : index
    %c0_1 = arith.constant 0 : index
    %0 = vector.load %arg3[%c0, %c0_0, %c0_1] : memref<1x8x864xf32, #tpu.memory_space<vmem>>, vector<1x8x864xf32>
    %1 = vector.shape_cast %0 : vector<1x8x864xf32> to vector<8x864xf32>
    %c0_2 = arith.constant 0 : index
    %c0_3 = arith.constant 0 : index
    %c0_4 = arith.constant 0 : index
    %2 = vector.load %arg4[%c0_2, %c0_3, %c0_4] : memref<1x864x128xf32, #tpu.memory_space<vmem>>, vector<1x864x128xf32>
    %3 = vector.shape_cast %2 : vector<1x864x128xf32> to vector<864x128xf32>
    %cst = arith.constant dense<0.000000e+00> : vector<8x128xf32>
    %4 = tpu.matmul %1, %3, %cst {dimension_numbers = #tpu.dot_dimension_numbers<[1], [0], [0], [1], [0, 0, 1, 1], [], []>} : vector<8x864xf32>, vector<864x128xf32>, vector<8x128xf32> -> vector<8x128xf32>
    %c0_5 = arith.constant 0 : index
    %c0_6 = arith.constant 0 : index
    %c0_7 = arith.constant 0 : index
    %5 = vector.load %arg5[%c0_5, %c0_6, %c0_7] : memref<1x1x128xf32, #tpu.memory_space<vmem>>, vector<1x1x128xf32>
    %6 = vector.shape_cast %5 : vector<1x1x128xf32> to vector<1x128xf32>
    %7 = vector.broadcast %6 : vector<1x128xf32> to vector<8x128xf32>
    %8 = arith.addf %4, %7 : vector<8x128xf32>
    %9 = arith.index_cast %arg0 : i32 to index
    %10 = memref.load %arg1[%9] : memref<2xf32, #tpu.memory_space<smem>>
    %cst_8 = arith.constant 0.000000e+00 : f32
    %11 = vector.broadcast %cst_8 : f32 to vector<8x128xf32>
    %12 = arith.cmpf oge, %8, %11 : vector<8x128xf32>
    %13 = vector.broadcast %10 : f32 to vector<8x128xf32>
    %14 = arith.mulf %13, %8 : vector<8x128xf32>
    %15 = arith.select %12, %8, %14 : vector<8x128xi1>, vector<8x128xf32>
    %c0_9 = arith.constant 0 : index
    %c0_10 = arith.constant 0 : index
    %c0_11 = arith.constant 0 : index
    %16 = vector.load %arg6[%c0_9, %c0_10, %c0_11] : memref<1x128x64xf32, #tpu.memory_space<vmem>>, vector<1x128x64xf32>
    %17 = vector.shape_cast %16 : vector<1x128x64xf32> to vector<128x64xf32>
    %cst_12 = arith.constant dense<0.000000e+00> : vector<8x64xf32>
    %18 = tpu.matmul %15, %17, %cst_12 {dimension_numbers = #tpu.dot_dimension_numbers<[1], [0], [0], [1], [0, 0, 1, 1], [], []>} : vector<8x128xf32>, vector<128x64xf32>, vector<8x64xf32> -> vector<8x64xf32>
    %c0_13 = arith.constant 0 : index
    %c0_14 = arith.constant 0 : index
    %c0_15 = arith.constant 0 : index
    %19 = vector.load %arg7[%c0_13, %c0_14, %c0_15] : memref<1x1x64xf32, #tpu.memory_space<vmem>>, vector<1x1x64xf32>
    %20 = vector.shape_cast %19 : vector<1x1x64xf32> to vector<1x64xf32>
    %21 = vector.broadcast %20 : vector<1x64xf32> to vector<8x64xf32>
    %22 = arith.addf %18, %21 : vector<8x64xf32>
    %23 = arith.index_cast %arg0 : i32 to index
    %24 = memref.load %arg2[%23] : memref<2xf32, #tpu.memory_space<smem>>
    %cst_16 = arith.constant 0.000000e+00 : f32
    %25 = vector.broadcast %cst_16 : f32 to vector<8x64xf32>
    %26 = arith.cmpf oge, %22, %25 : vector<8x64xf32>
    %27 = vector.broadcast %24 : f32 to vector<8x64xf32>
    %28 = arith.mulf %27, %22 : vector<8x64xf32>
    %29 = arith.select %26, %22, %28 : vector<8x64xi1>, vector<8x64xf32>
    %c0_17 = arith.constant 0 : index
    %c0_18 = arith.constant 0 : index
    %c0_19 = arith.constant 0 : index
    %30 = vector.load %arg8[%c0_17, %c0_18, %c0_19] : memref<1x64x6xf32, #tpu.memory_space<vmem>>, vector<1x64x6xf32>
    %31 = vector.shape_cast %30 : vector<1x64x6xf32> to vector<64x6xf32>
    %cst_20 = arith.constant dense<0.000000e+00> : vector<8x6xf32>
    %32 = tpu.matmul %29, %31, %cst_20 {dimension_numbers = #tpu.dot_dimension_numbers<[1], [0], [0], [1], [0, 0, 1, 1], [], []>} : vector<8x64xf32>, vector<64x6xf32>, vector<8x6xf32> -> vector<8x6xf32>
    %c0_21 = arith.constant 0 : index
    %c0_22 = arith.constant 0 : index
    %c0_23 = arith.constant 0 : index
    %33 = vector.load %arg9[%c0_21, %c0_22, %c0_23] : memref<1x1x6xf32, #tpu.memory_space<vmem>>, vector<1x1x6xf32>
    %34 = vector.shape_cast %33 : vector<1x1x6xf32> to vector<1x6xf32>
    %35 = vector.broadcast %34 : vector<1x6xf32> to vector<8x6xf32>
    %36 = arith.addf %32, %35 : vector<8x6xf32>
    %c0_24 = arith.constant 0 : index
    %c0_25 = arith.constant 0 : index
    %c0_26 = arith.constant 0 : index
    %37 = vector.load %arg10[%c0_24, %c0_25, %c0_26] : memref<1x8x6xf32, #tpu.memory_space<vmem>>, vector<1x8x6xf32>
    %38 = vector.shape_cast %37 : vector<1x8x6xf32> to vector<8x6xf32>
    %39 = vector.shape_cast %36 : vector<8x6xf32> to vector<1x8x6xf32>
    tpu.vector_store %arg10[%c0_24, %c0_25, %c0_26], %39 {strides = array<i32>} : memref<1x8x6xf32, #tpu.memory_space<vmem>>, vector<1x8x6xf32>,
    return
  }
  func.func @transform_0(%arg0: i32) -> i32 {
    %c0_i32 = arith.constant 0 : i32
    %c0_i32_0 = arith.constant 0 : i32
    return %c0_i32 : i32
  }
  func.func @transform_1(%arg0: i32) -> i32 {
    %c0_i32 = arith.constant 0 : i32
    %c0_i32_0 = arith.constant 0 : i32
    return %c0_i32 : i32
  }
  func.func @transform_2(%arg0: i32) -> (i32, i32, i32) {
    %c0_i32 = arith.constant 0 : i32
    %c0_i32_0 = arith.constant 0 : i32
    %c0_i32_1 = arith.constant 0 : i32
    return %arg0, %c0_i32, %c0_i32_0 : i32, i32, i32
  }
  func.func @transform_3(%arg0: i32) -> (i32, i32, i32) {
    %c0_i32 = arith.constant 0 : i32
    %c0_i32_0 = arith.constant 0 : i32
    %c0_i32_1 = arith.constant 0 : i32
    return %arg0, %c0_i32, %c0_i32_0 : i32, i32, i32
  }
  func.func @transform_4(%arg0: i32) -> (i32, i32, i32) {
    %c0_i32 = arith.constant 0 : i32
    %c0_i32_0 = arith.constant 0 : i32
    %c0_i32_1 = arith.constant 0 : i32
    return %arg0, %c0_i32, %c0_i32_0 : i32, i32, i32
  }
  func.func @transform_5(%arg0: i32) -> (i32, i32, i32) {
    %c0_i32 = arith.constant 0 : i32
    %c0_i32_0 = arith.constant 0 : i32
    %c0_i32_1 = arith.constant 0 : i32
    return %arg0, %c0_i32, %c0_i32_0 : i32, i32, i32
  }
  func.func @transform_6(%arg0: i32) -> (i32, i32, i32) {
    %c0_i32 = arith.constant 0 : i32
    %c0_i32_0 = arith.constant 0 : i32
    %c0_i32_1 = arith.constant 0 : i32
    return %arg0, %c0_i32, %c0_i32_0 : i32, i32, i32
  }
  func.func @transform_7(%arg0: i32) -> (i32, i32, i32) {
    %c0_i32 = arith.constant 0 : i32
    %c0_i32_0 = arith.constant 0 : i32
    %c0_i32_1 = arith.constant 0 : i32
    return %arg0, %c0_i32, %c0_i32_0 : i32, i32, i32
  }
  func.func @transform_8(%arg0: i32) -> (i32, i32, i32) {
    %c0_i32 = arith.constant 0 : i32
    %c0_i32_0 = arith.constant 0 : i32
    %c0_i32_1 = arith.constant 0 : i32
    return %arg0, %c0_i32, %c0_i32_0 : i32, i32, i32
  }
  func.func @transform_9(%arg0: i32) -> (i32, i32, i32) {
    %c0_i32 = arith.constant 0 : i32
    %c0_i32_0 = arith.constant 0 : i32
    %c0_i32_1 = arith.constant 0 : i32
    return %arg0, %c0_i32, %c0_i32_0 : i32, i32, i32
  }
}

</mosaic_0001>

<bundles_post_ra>
// kernel: _lambda_.4
= control target key start
LH: loop header
LB: loop body
LE: loop exit
PB: predicated region body
PF: predicated region fallthrough
CT: control target
= control target key end

     0   :  { %s1040_s0 = inlined_call_operand.<no memory space> [shape: f32[1], index: 0, kind: input, shape index: {}]   ;;  %s1041_s1 = inlined_call_operand.vmem [shape: bf16[16,108], index: 1, kind: input, shape index: {}]   ;;  %s1042_s2 = inlined_call_operand.vmem [shape: bf16[108,7168], index: 2, kind: input, shape index: {}]   ;;  %s1043_s3 = inlined_call_operand.vmem [shape: f32[16,1], index: 3, kind: input, shape index: {}]   ;;  %s1044_s4 = inlined_call_operand.vmem [shape: f32[16,7168], index: 4, kind: output, shape index: {}]  }
   0x1   :  { %9 = sst [smem:[#allocation2]] %s1040_s0 }
   0x2   :  { %s859_s17 = smov 0   ;;  %s861_s18 = smov 0  }
   0x3   :  { %s863_s19 = smov 0  }
   0x4 LB: > { %s687_s0 = sadd.s32 4294967295, %s828_s19   ;;  %s876_s20 = sadd.s32 1, %s828_s19   ;;  %s828_s19 = sphi %s863_s19, %s1048_s19   ;;  %s824_s18 = sphi %s861_s18, %s1047_s18   ;;  %s820_s17 = sphi %s859_s17, %s1046_s17  }
   0x5   : > { %s61_s21 = ssub.s32 %s828_s19, %s876_s20  ;;  %s64_s22 = sadd.s32 1, %s824_s18 }
   0x6   : > { %p62_p0 = scmp.eq.s32.totalorder %s61_s21, 0  ;;  %p71_p1 = scmp.ne.s32.totalorder %s824_s18, %s820_s17 }
   0x7   : > { %p72_p2 = scmp.eq.s32.totalorder %s828_s19, 0  ;;  %p122_p3 = scmp.eq.s32.totalorder %s687_s0, 13 }
   0x8   : > { %s887_s23 = scalar_select %p62_p0, %s824_s18, %s64_s22  }
   0x9   : > { %p73_p4 = por %p72_p2, %p71_p1  ;;  %p889_p5 = por %p122_p3, %p71_p1 }
   0xa   : > { %p690_p6 = scmp.ge.s32.totalorder %s828_s19, 14 }
   0xc   : > { %153 = sbr.rel (%p690_p6) target bundleno = 37 (0x25), region = 28 }
  0x13   : > { %156 = sbr.rel (!%p73_p4) target bundleno = 37 (0x25), region = 32  ;;  %s158_s25 = sand.u32 (%p73_p4), 1, %s824_s18  }
  0x14   : > { %s733_s26 = sshll.u32 (%p73_p4), %s828_s19, 4  ;;  %s735_s27 = smul.u32 (%p73_p4), 224, %s158_s25 }
  0x15   : > { %s899_s30 = scalar_lea.vmem (%p73_p4), %s1042_s2, %s733_s26 }
  0x16   : > { %v176_v0 = vld [vmem:[%s899_s30] sm:$0xff] (%p73_p4)  ;;  %v178_v1 = vld [vmem:[%s899_s30 + $0x8] sm:$0xff] (%p73_p4)  ;;  %s907_s5 = scalar_lea.vmem (%p73_p4), [#allocation3], %s735_s27 }
  0x17   : > { %v180_v2 = vld [vmem:[%s899_s30 + $0xe0] sm:$0xff] (%p73_p4)  ;;  %v182_v3 = vld [vmem:[%s899_s30 + $0xe8] sm:$0xff] (%p73_p4)  ;;  %177 = vst [vmem:[%s907_s5] sm:$0xff] (%p73_p4), %v176_v0  ;;  %179 = vst [vmem:[%s907_s5 + $0x8] sm:$0xff] (%p73_p4), %v178_v1 }
  0x18   : > { %v184_v4 = vld [vmem:[%s899_s30 + $0x1c0] sm:$0xff] (%p73_p4)  ;;  %v186_v5 = vld [vmem:[%s899_s30 + $0x1c8] sm:$0xff] (%p73_p4)  ;;  %181 = vst [vmem:[%s907_s5 + $0x10] sm:$0xff] (%p73_p4), %v180_v2  ;;  %183 = vst [vmem:[%s907_s5 + $0x18] sm:$0xff] (%p73_p4), %v182_v3 }
  0x19   : > { %185 = vst [vmem:[%s907_s5 + $0x20] sm:$0xff] (%p73_p4), %v184_v4  ;;  %187 = vst [vmem:[%s907_s5 + $0x28] sm:$0xff] (%p73_p4), %v186_v5  ;;  %v188_v6 = vld [vmem:[%s899_s30 + $0x2a0] sm:$0xff] (%p73_p4)  ;;  %v190_v7 = vld [vmem:[%s899_s30 + $0x2a8] sm:$0xff] (%p73_p4) }
  0x1a   : > { %v192_v8 = vld [vmem:[%s899_s30 + $0x380] sm:$0xff]  ;;  %189 = vst [vmem:[%s907_s5 + $0x30] sm:$0xff] %v188_v6  ;;  %191 = vst [vmem:[%s907_s5 + $0x38] sm:$0xff] %v190_v7  ;;  %v194_v9 = vld [vmem:[%s899_s30 + $0x388] sm:$0xff] }
  0x1b   : > { %193 = vst [vmem:[%s907_s5 + $0x40] sm:$0xff] %v192_v8  ;;  %v196_v10 = vld [vmem:[%s899_s30 + $0x460] sm:$0xff]  ;;  %v198_v11 = vld [vmem:[%s899_s30 + $0x468] sm:$0xff]  ;;  %195 = vst [vmem:[%s907_s5 + $0x48] sm:$0xff] %v194_v9 }
  0x1c   : > { %197 = vst [vmem:[%s907_s5 + $0x50] sm:$0xff] %v196_v10  ;;  %199 = vst [vmem:[%s907_s5 + $0x58] sm:$0xff] %v198_v11  ;;  %v200_v12 = vld [vmem:[%s899_s30 + $0x540] sm:$0xff]  ;;  %v202_v13 = vld [vmem:[%s899_s30 + $0x548] sm:$0xff] }
  0x1d   : > { %v204_v14 = vld [vmem:[%s899_s30 + $0x620] sm:$0xff]  ;;  %201 = vst [vmem:[%s907_s5 + $0x60] sm:$0xff] %v200_v12  ;;  %203 = vst [vmem:[%s907_s5 + $0x68] sm:$0xff] %v202_v13  ;;  %v206_v15 = vld [vmem:[%s899_s30 + $0x628] sm:$0xff] }
  0x1e   : > { %205 = vst [vmem:[%s907_s5 + $0x70] sm:$0xff] %v204_v14  ;;  %v208_v16 = vld [vmem:[%s899_s30 + $0x700] sm:$0xff]  ;;  %v210_v17 = vld [vmem:[%s899_s30 + $0x708] sm:$0xff]  ;;  %207 = vst [vmem:[%s907_s5 + $0x78] sm:$0xff] %v206_v15 }
  0x1f   : > { %209 = vst [vmem:[%s907_s5 + $0x80] sm:$0xff] %v208_v16  ;;  %211 = vst [vmem:[%s907_s5 + $0x88] sm:$0xff] %v210_v17  ;;  %v212_v18 = vld [vmem:[%s899_s30 + $0x7e0] sm:$0xff]  ;;  %v214_v19 = vld [vmem:[%s899_s30 + $0x7e8] sm:$0xff] }
  0x20   : > { %v216_v20 = vld [vmem:[%s899_s30 + $0x8c0] sm:$0xff]  ;;  %213 = vst [vmem:[%s907_s5 + $0x90] sm:$0xff] %v212_v18  ;;  %215 = vst [vmem:[%s907_s5 + $0x98] sm:$0xff] %v214_v19  ;;  %v218_v21 = vld [vmem:[%s899_s30 + $0x8c8] sm:$0xff] }
  0x21   : > { %217 = vst [vmem:[%s907_s5 + $0xa0] sm:$0xff] %v216_v20  ;;  %v220_v22 = vld [vmem:[%s899_s30 + $0x9a0] sm:$0xff]  ;;  %v222_v23 = vld [vmem:[%s899_s30 + $0x9a8] sm:$0xff]  ;;  %219 = vst [vmem:[%s907_s5 + $0xa8] sm:$0xff] %v218_v21 }
  0x22   : > { %221 = vst [vmem:[%s907_s5 + $0xb0] sm:$0xff] %v220_v22  ;;  %223 = vst [vmem:[%s907_s5 + $0xb8] sm:$0xff] %v222_v23  ;;  %v224_v24 = vld [vmem:[%s899_s30 + $0xa80] sm:$0xff]  ;;  %v226_v25 = vld [vmem:[%s899_s30 + $0xa88] sm:$0xff] }
  0x23   : > { %v228_v26 = vld [vmem:[%s899_s30 + $0xb60] sm:$0xff]  ;;  %225 = vst [vmem:[%s907_s5 + $0xc0] sm:$0xff] %v224_v24  ;;  %227 = vst [vmem:[%s907_s5 + $0xc8] sm:$0xff] %v226_v25  ;;  %v230_v27 = vld [vmem:[%s899_s30 + $0xb68] sm:$0xff] }
  0x24   : > { %229 = vst [vmem:[%s907_s5 + $0xd0] sm:$0xff] %v228_v26  ;;  %231 = vst [vmem:[%s907_s5 + $0xd8] sm:$0xff] %v230_v27 }
  0x25 PF: > { %p693_p7 = scmp.ge.s32.totalorder %s828_s19, 1  ;;  %p236_p8 = scmp.lt.s32.totalorder %s828_s19, 15 }
  0x27   : > { %p237_p9 = pnand %p693_p7, %p236_p8 }
  0x28   : > { %s243_s6 = sand.u32 (!%p237_p9), 1, %s820_s17   ;;  %v830_v28 = vmov (!%p237_p9), 0   ;;  %v300_v29 = vld [vmem:[%s1043_s3] sm:$0xff] (!%p237_p9)  ;;  %v301_v30 = vld [vmem:[%s1043_s3 + $0x8] sm:$0xff] (!%p237_p9)  ;;  %vm457_vm0 = vcmask (!%p237_p9), 1045504   ;;  %vm453_vm1 = vcmask (!%p237_p9), 883712  }
  0x29   : > { %240 = sbr.rel (%p237_p9) target bundleno = 306 (0x132), region = 55  ;;  %502 = vmatprep.mubr.bf16.mxu0 (!%p237_p9), %v830_v28  ;;  %545 = vmatprep.mubr.bf16.mxu1 (!%p237_p9), %v830_v28  ;;  %v805_v61 = vld [vmem:[%s1041_s1] sm:$0xff] (!%p237_p9)   ;;  %s556_s15 = sld [smem:[#allocation2]] (!%p237_p9) }
  0x2a   : > { %s736_s7 = smul.u32 (!%p237_p9), 224, %s243_s6  ;;  %762 = vset.pattern.permute.xlu0 (!%p237_p9), %v830_v28  ;;  %s694_s16 = sshll.u32 (!%p237_p9), %s243_s6, 6 }
  0x2b   : > { %304 = vperm.xlu0 (!%p237_p9), %762, %v300_v29   ;;  %s1005_s17 = scalar_lea.vmem (!%p237_p9), [#allocation4], %s694_s16 }
  0x2c   : > { %s970_s12 = scalar_lea.vmem (!%p237_p9), [#allocation3], %s736_s7 }
  0x2d   : > { %v763_v31 = vld [vmem:[%s970_s12 + $0x4] ss:$16 sps:$4 sm:$0xff] (!%p237_p9)   ;;  %v765_v32 = vld [vmem:[%s970_s12 + $0xc] ss:$16 sps:$4 sm:$0xff] (!%p237_p9)   ;;  %v767_v33 = vld [vmem:[%s970_s12] ss:$16 sps:$4 sm:$0xff] (!%p237_p9)  }
  0x2e   : > { %470 = vmatprep.subr.bf16.mxu0 (!%p237_p9), %v763_v31  ;;  %v768_v34 = vld [vmem:[%s970_s12 + $0x8] ss:$16 sps:$4 sm:$0xff] (!%p237_p9)   ;;  %513 = vmatprep.subr.bf16.mxu1 (!%p237_p9), %v765_v32  ;;  %v769_v35 = vld [vmem:[%s970_s12 + $0x24] ss:$16 sps:$4 sm:$0xff] (!%p237_p9)   ;;  %v771_v36 = vld [vmem:[%s970_s12 + $0x2c] ss:$16 sps:$4 sm:$0xff] (!%p237_p9)  }
  0x2f   : > { %309 = vperm.xlu0 (!%p237_p9), %762, %v301_v30   ;;  %471 = vmatpush1.bf16.msra.mxu0 (!%p237_p9), %v767_v33  ;;  %v773_v37 = vld [vmem:[%s970_s12 + $0x20] ss:$16 sps:$4 sm:$0xff] (!%p237_p9)   ;;  %v774_v38 = vld [vmem:[%s970_s12 + $0x28] ss:$16 sps:$4 sm:$0xff] (!%p237_p9)   ;;  %v775_v39 = vld [vmem:[%s970_s12 + $0x44] ss:$16 sps:$4 sm:$0xff] (!%p237_p9)   ;;  %v565_v0 = vstv (!%p237_p9), %s556_s15 }
  0x30   : > { %514 = vmatpush1.bf16.msra.mxu1 %v768_v34  ;;  %472 = vmatprep.subr.bf16.mxu0 %v769_v35  ;;  %v777_v40 = vld [vmem:[%s970_s12 + $0x4c] ss:$16 sps:$4 sm:$0xff]   ;;  %v779_v41 = vld [vmem:[%s970_s12 + $0x40] ss:$16 sps:$4 sm:$0xff]   ;;  %v780_v42 = vld [vmem:[%s970_s12 + $0x48] ss:$16 sps:$4 sm:$0xff]  }
  0x31   : > { %515 = vmatprep.subr.bf16.mxu1 %v771_v36  ;;  %v781_v43 = vld [vmem:[%s970_s12 + $0x64] ss:$16 sps:$4 sm:$0xff]   ;;  %v783_v44 = vld [vmem:[%s970_s12 + $0x6c] ss:$16 sps:$4 sm:$0xff]   ;;  %v785_v45 = vld [vmem:[%s970_s12 + $0x60] ss:$16 sps:$4 sm:$0xff]  }
  0x32   : > { %v786_v46 = vld [vmem:[%s970_s12 + $0x68] ss:$16 sps:$4 sm:$0xff]   ;;  %v787_v47 = vld [vmem:[%s970_s12 + $0x84] ss:$16 sps:$4 sm:$0xff]   ;;  %v789_v48 = vld [vmem:[%s970_s12 + $0x8c] ss:$16 sps:$4 sm:$0xff]  }
  0x33   : > { %473 = vmatpush1.bf16.msra.mxu0 %v773_v37  ;;  %v791_v49 = vld [vmem:[%s970_s12 + $0x80] ss:$16 sps:$4 sm:$0xff]   ;;  %v792_v50 = vld [vmem:[%s970_s12 + $0x88] ss:$16 sps:$4 sm:$0xff]   ;;  %v793_v51 = vld [vmem:[%s970_s12 + $0xa4] ss:$16 sps:$4 sm:$0xff]  }
  0x34   : > { %516 = vmatpush1.bf16.msra.mxu1 %v774_v38  ;;  %474 = vmatprep.subr.bf16.mxu0 %v775_v39  ;;  %v795_v52 = vld [vmem:[%s970_s12 + $0xac] ss:$16 sps:$4 sm:$0xff]   ;;  %v797_v53 = vld [vmem:[%s970_s12 + $0xa0] ss:$16 sps:$4 sm:$0xff]   ;;  %v798_v54 = vld [vmem:[%s970_s12 + $0xa8] ss:$16 sps:$4 sm:$0xff]  }
  0x35   : > { %517 = vmatprep.subr.bf16.mxu1 %v777_v40  ;;  %v799_v55 = vld [vmem:[%s970_s12 + $0xc4] ss:$16 sps:$4 sm:$0x3f]   ;;  %v801_v56 = vld [vmem:[%s970_s12 + $0xcc] ss:$16 sps:$4 sm:$0x3f]  }
  0x36   : > { %v803_v57 = vld [vmem:[%s970_s12 + $0xc0] ss:$16 sps:$4 sm:$0x3f]   ;;  %v804_v58 = vld [vmem:[%s970_s12 + $0xc8] ss:$16 sps:$4 sm:$0x3f]  }
  0x37   : > { %475 = vmatpush1.bf16.msra.mxu0 %v779_v41  ;;  %v459_v59 = vsel %vm457_vm0, %v803_v57, 0  ;;  %v465_v60 = vsel %vm457_vm0, %v804_v58, 0  ;;  %s734_s21 = sshll.u32 (%p889_p5), %s687_s0, 5 }
  0x38   : > { %518 = vmatpush1.bf16.msra.mxu1 %v780_v42  ;;  %476 = vmatprep.subr.bf16.mxu0 %v781_v43  ;;  %s599_s26 = scalar_lea.vmem (%p889_p5), %s1044_s4, %s734_s21 }
  0x39   : > { %519 = vmatprep.subr.bf16.mxu1 %v783_v44 }
  0x3b   : > { %477 = vmatpush1.bf16.msra.mxu0 %v785_v45 }
  0x3c   : > { %520 = vmatpush1.bf16.msra.mxu1 %v786_v46  ;;  %478 = vmatprep.subr.bf16.mxu0 %v787_v47 }
  0x3d   : > { %521 = vmatprep.subr.bf16.mxu1 %v789_v48 }
  0x3f   : > { %479 = vmatpush1.bf16.msra.mxu0 %v791_v49 }
  0x40   : > { %522 = vmatpush1.bf16.msra.mxu1 %v792_v50  ;;  %480 = vmatprep.subr.bf16.mxu0 %v793_v51 }
  0x41   : > { %523 = vmatprep.subr.bf16.mxu1 %v795_v52 }
  0x43   : > { %481 = vmatpush1.bf16.msra.mxu0 %v797_v53 }
  0x44   : > { %524 = vmatpush1.bf16.msra.mxu1 %v798_v54  ;;  %724 = vmatprep.subr.msk.bf16.mxu0 %vm457_vm0, %v799_v55 }
  0x45   : > { %726 = vmatprep.subr.msk.bf16.mxu1 %vm457_vm0, %v801_v56 }
  0x47   : > { %483 = vmatpush1.bf16.msra.mxu0 %v459_v59 }
  0x48   : > { %526 = vmatpush1.bf16.msra.mxu1 %v465_v60 }
  0x4a   : > { %725 = vmatmul.mubr.msk.bf16.vlgmr.msra.gmra.mrb[0].mxu0 %vm453_vm1, %v805_v61 }
  0x4b   : > { %727 = vmatmul.mubr.msk.bf16.vlgmr.msra.gmra.mrb[0].mxu1 %vm453_vm1, %v805_v61 }
  0xaa   : > { %v305_v62 = vpop.permute.xlu0 %304 }
  0xae   : > { %v310_v14 = vpop.permute.xlu0 %309 }
 0x11d   : > { %v504_v63 = vpop.f32.mrb[0].mxu0 }
 0x11e   : > { %v547_v1 = vpop.f32.mrb[0].mxu1  ;;  %v505_v2 = vadd.f32 %v504_v63, %v305_v62  ;;  %v506_v4 = vpop.f32.mrb[1].mxu0 }
 0x11f   : > { %v548_v3 = vadd.f32 %v547_v1, %v305_v62  ;;  %v549_v5 = vpop.f32.mrb[1].mxu1  ;;  %v507_v6 = vadd.f32 %v506_v4, %v305_v62  ;;  %v508_v8 = vpop.f32.mrb[2].mxu0 }
 0x120   : > { %v550_v7 = vadd.f32 %v549_v5, %v305_v62  ;;  %v551_v9 = vpop.f32.mrb[2].mxu1  ;;  %vm557_vm2 = vcmp.ge.f32.partialorder %v505_v2, 0.0  ;;  %v566_v10 = vmul.f32 %v565_v0, %v505_v2  ;;  %v510_v12 = vpop.f32.mrb[3].mxu0  ;;  %v509_v19 = vadd.f32 %v508_v8, %v310_v14 }
 0x121   : > { %vm559_vm3 = vcmp.ge.f32.partialorder %v548_v3, 0.0  ;;  %v568_v11 = vmul.f32 %v565_v0, %v548_v3  ;;  %v553_v13 = vpop.f32.mrb[3].mxu1  ;;  %vm558_vm4 = vcmp.ge.f32.partialorder %v507_v6, 0.0  ;;  %v567_v15 = vmul.f32 %v565_v0, %v507_v6 }
 0x122   : > { %vm560_vm5 = vcmp.ge.f32.partialorder %v550_v7, 0.0  ;;  %v569_v16 = vmul.f32 %v565_v0, %v550_v7  ;;  %v574_v17 = vsel %vm557_vm2, %v505_v2, %v566_v10  ;;  %v552_v20 = vadd.f32 %v551_v9, %v310_v14 }
 0x123   : > { %v576_v18 = vsel %vm559_vm3, %v548_v3, %v568_v11  ;;  %582 = vst [vmem:[%s1005_s17] sm:$0xff] %v574_v17  ;;  %v575_v21 = vsel %vm558_vm4, %v507_v6, %v567_v15  ;;  %v511_v23 = vadd.f32 %v510_v12, %v310_v14  ;;  %v554_v24 = vadd.f32 %v553_v13, %v310_v14  ;;  %596 = sbr.rel (!%p889_p5) target bundleno = 306 (0x132), region = 63 }
 0x124   : > { %584 = vst [vmem:[%s1005_s17 + $0x10] sm:$0xff] %v576_v18  ;;  %v577_v22 = vsel %vm560_vm5, %v550_v7, %v569_v16  ;;  %583 = vst [vmem:[%s1005_s17 + $0x8] sm:$0xff] %v575_v21  ;;  %vm561_vm6 = vcmp.ge.f32.partialorder %v509_v19, 0.0  ;;  %v570_v25 = vmul.f32 %v565_v0, %v509_v19  ;;  %vm563_vm7 = vcmp.ge.f32.partialorder %v552_v20, 0.0 }
 0x125   : > { %585 = vst [vmem:[%s1005_s17 + $0x18] sm:$0xff] %v577_v22  ;;  %v572_v26 = vmul.f32 %v565_v0, %v552_v20  ;;  %vm562_vm8 = vcmp.ge.f32.partialorder %v511_v23, 0.0  ;;  %v571_v27 = vmul.f32 %v565_v0, %v511_v23  ;;  %vm564_vm9 = vcmp.ge.f32.partialorder %v554_v24, 0.0 }
 0x126   : > { %v573_v28 = vmul.f32 %v565_v0, %v554_v24  ;;  %v578_v29 = vsel %vm561_vm6, %v509_v19, %v570_v25 }
 0x127   : > { %v580_v30 = vsel %vm563_vm7, %v552_v20, %v572_v26  ;;  %586 = vst [vmem:[%s1005_s17 + $0x20] sm:$0xff] %v578_v29  ;;  %v579_v31 = vsel %vm562_vm8, %v511_v23, %v571_v27 }
 0x128   : > { %588 = vst [vmem:[%s1005_s17 + $0x30] sm:$0xff] %v580_v30  ;;  %v581_v32 = vsel %vm564_vm9, %v554_v24, %v573_v28  ;;  %587 = vst [vmem:[%s1005_s17 + $0x28] sm:$0xff] %v579_v31 }
 0x129   : > { %589 = vst [vmem:[%s1005_s17 + $0x38] sm:$0xff] %v581_v32 }
 0x12a   : > { %v612_v33 = vld [vmem:[%s1005_s17] sm:$0xff] }
 0x12b   : > { %v614_v34 = vld [vmem:[%s1005_s17 + $0x8] sm:$0xff]  ;;  %v616_v35 = vld [vmem:[%s1005_s17 + $0x10] sm:$0xff]  ;;  %613 = vst [vmem:[%s599_s26] sm:$0xff] %v612_v33 }
 0x12c   : > { %v618_v36 = vld [vmem:[%s1005_s17 + $0x18] sm:$0xff]  ;;  %615 = vst [vmem:[%s599_s26 + $0x8] sm:$0xff] %v614_v34  ;;  %617 = vst [vmem:[%s599_s26 + $0x10] sm:$0xff] %v616_v35 }
 0x12d   : > { %619 = vst [vmem:[%s599_s26 + $0x18] sm:$0xff] %v618_v36 }
 0x12e   : > { %v620_v37 = vld [vmem:[%s1005_s17 + $0x20] sm:$0xff] }
 0x12f   : > { %v622_v38 = vld [vmem:[%s1005_s17 + $0x28] sm:$0xff]  ;;  %621 = vst [vmem:[%s599_s26 + $0x1c0] sm:$0xff] %v620_v37  ;;  %v624_v39 = vld [vmem:[%s1005_s17 + $0x30] sm:$0xff] }
 0x130   : > { %623 = vst [vmem:[%s599_s26 + $0x1c8] sm:$0xff] %v622_v38  ;;  %v626_v40 = vld [vmem:[%s1005_s17 + $0x38] sm:$0xff]  ;;  %625 = vst [vmem:[%s599_s26 + $0x1d0] sm:$0xff] %v624_v39 }
 0x131   : > { %627 = vst [vmem:[%s599_s26 + $0x1d8] sm:$0xff] %v626_v40 }
 0x132 PF: > { %p12_p10 = scmp.ge.s32.totalorder %s876_s20, 16   ;;  %s1046_s17 = smov %s824_s18 }
 0x133   : > { %s1047_s18 = smov %s887_s23  ;;  %s1048_s19 = smov %s876_s20 }
 0x134   :  { %14 = sbr.rel (!%p12_p10) target bundleno = 4 (0x4), region = 117 }

// kernel: _lambda_.5
= control target key start
LH: loop header
LB: loop body
LE: loop exit
PB: predicated region body
PF: predicated region fallthrough
CT: control target
= control target key end

     0   :  { %s2455_s0 = inlined_call_operand.<no memory space> [shape: f32[1], index: 0, kind: input, shape index: {}]   ;;  %s2456_s1 = inlined_call_operand.vmem [shape: bf16[32,432], index: 1, kind: input, shape index: {}]   ;;  %s2457_s2 = inlined_call_operand.vmem [shape: bf16[432,2048], index: 2, kind: input, shape index: {}]   ;;  %s2458_s3 = inlined_call_operand.vmem [shape: f32[32,1], index: 3, kind: input, shape index: {}]   ;;  %s2459_s4 = inlined_call_operand.vmem [shape: f32[32,2048], index: 4, kind: output, shape index: {}]  }
   0x1   :  { %9 = sst [smem:[#allocation2]] %s2455_s0 }
   0x2   :  { %s1969_s17 = smov 0   ;;  %s1971_s18 = smov 0  }
   0x3   :  { %s1973_s19 = smov 0  }
   0x4 LB: > { %s1546_s0 = sadd.s32 4294967295, %s1938_s19   ;;  %s1986_s20 = sadd.s32 1, %s1938_s19   ;;  %s1938_s19 = sphi %s1973_s19, %s2463_s19   ;;  %s1934_s18 = sphi %s1971_s18, %s2462_s18   ;;  %s1930_s17 = sphi %s1969_s17, %s2461_s17  }
   0x5   : > { %s61_s21 = ssub.s32 %s1938_s19, %s1986_s20  ;;  %s64_s22 = sadd.s32 1, %s1934_s18 }
   0x6   : > { %p62_p0 = scmp.eq.s32.totalorder %s61_s21, 0  ;;  %p71_p1 = scmp.ne.s32.totalorder %s1934_s18, %s1930_s17 }
   0x7   : > { %p72_p2 = scmp.eq.s32.totalorder %s1938_s19, 0  ;;  %p122_p3 = scmp.eq.s32.totalorder %s1546_s0, 3 }
   0x8   : > { %s1997_s23 = scalar_select %p62_p0, %s1934_s18, %s64_s22  }
   0x9   : > { %p73_p4 = por %p72_p2, %p71_p1  ;;  %p1999_p5 = por %p122_p3, %p71_p1 }
   0xa   : > { %p1549_p6 = scmp.ge.s32.totalorder %s1938_s19, 4 }
   0xc   : > { %153 = sbr.rel (%p1549_p6) target bundleno = 77 (0x4d), region = 28 }
  0x13   : > { %156 = sbr.rel (!%p73_p4) target bundleno = 77 (0x4d), region = 32  ;;  %s158_s25 = sand.u32 (%p73_p4), 1, %s1934_s18  }
  0x14   : > { %s1679_s26 = sshll.u32 (%p73_p4), %s1938_s19, 4  ;;  %s1713_s27 = smul.u32 (%p73_p4), 864, %s158_s25 }
  0x15   : > { %s2009_s30 = scalar_lea.vmem (%p73_p4), %s2457_s2, %s1679_s26 }
  0x16   : > { %v176_v0 = vld [vmem:[%s2009_s30] sm:$0xff] (%p73_p4)  ;;  %v178_v1 = vld [vmem:[%s2009_s30 + $0x8] sm:$0xff] (%p73_p4)  ;;  %s2017_s5 = scalar_lea.vmem (%p73_p4), [#allocation3], %s1713_s27 }
  0x17   : > { %v180_v2 = vld [vmem:[%s2009_s30 + $0x40] sm:$0xff] (%p73_p4)  ;;  %v182_v3 = vld [vmem:[%s2009_s30 + $0x48] sm:$0xff] (%p73_p4)  ;;  %177 = vst [vmem:[%s2017_s5] sm:$0xff] (%p73_p4), %v176_v0  ;;  %179 = vst [vmem:[%s2017_s5 + $0x8] sm:$0xff] (%p73_p4), %v178_v1 }
  0x18   : > { %v184_v4 = vld [vmem:[%s2009_s30 + $0x80] sm:$0xff] (%p73_p4)  ;;  %v186_v5 = vld [vmem:[%s2009_s30 + $0x88] sm:$0xff] (%p73_p4)  ;;  %181 = vst [vmem:[%s2017_s5 + $0x10] sm:$0xff] (%p73_p4), %v180_v2  ;;  %183 = vst [vmem:[%s2017_s5 + $0x18] sm:$0xff] (%p73_p4), %v182_v3 }
  0x19   : > { %185 = vst [vmem:[%s2017_s5 + $0x20] sm:$0xff] (%p73_p4), %v184_v4  ;;  %187 = vst [vmem:[%s2017_s5 + $0x28] sm:$0xff] (%p73_p4), %v186_v5  ;;  %v188_v6 = vld [vmem:[%s2009_s30 + $0xc0] sm:$0xff] (%p73_p4)  ;;  %v190_v7 = vld [vmem:[%s2009_s30 + $0xc8] sm:$0xff] (%p73_p4) }
  0x1a   : > { %v192_v8 = vld [vmem:[%s2009_s30 + $0x100] sm:$0xff]  ;;  %189 = vst [vmem:[%s2017_s5 + $0x30] sm:$0xff] %v188_v6  ;;  %191 = vst [vmem:[%s2017_s5 + $0x38] sm:$0xff] %v190_v7  ;;  %v194_v9 = vld [vmem:[%s2009_s30 + $0x108] sm:$0xff] }
  0x1b   : > { %193 = vst [vmem:[%s2017_s5 + $0x40] sm:$0xff] %v192_v8  ;;  %v196_v10 = vld [vmem:[%s2009_s30 + $0x140] sm:$0xff]  ;;  %v198_v11 = vld [vmem:[%s2009_s30 + $0x148] sm:$0xff]  ;;  %195 = vst [vmem:[%s2017_s5 + $0x48] sm:$0xff] %v194_v9 }
  0x1c   : > { %197 = vst [vmem:[%s2017_s5 + $0x50] sm:$0xff] %v196_v10  ;;  %199 = vst [vmem:[%s2017_s5 + $0x58] sm:$0xff] %v198_v11  ;;  %v200_v12 = vld [vmem:[%s2009_s30 + $0x180] sm:$0xff]  ;;  %v202_v13 = vld [vmem:[%s2009_s30 + $0x188] sm:$0xff] }
  0x1d   : > { %v204_v14 = vld [vmem:[%s2009_s30 + $0x1c0] sm:$0xff]  ;;  %201 = vst [vmem:[%s2017_s5 + $0x60] sm:$0xff] %v200_v12  ;;  %203 = vst [vmem:[%s2017_s5 + $0x68] sm:$0xff] %v202_v13  ;;  %v206_v15 = vld [vmem:[%s2009_s30 + $0x1c8] sm:$0xff] }
  0x1e   : > { %205 = vst [vmem:[%s2017_s5 + $0x70] sm:$0xff] %v204_v14  ;;  %v208_v16 = vld [vmem:[%s2009_s30 + $0x200] sm:$0xff]  ;;  %v210_v17 = vld [vmem:[%s2009_s30 + $0x208] sm:$0xff]  ;;  %207 = vst [vmem:[%s2017_s5 + $0x78] sm:$0xff] %v206_v15 }
  0x1f   : > { %209 = vst [vmem:[%s2017_s5 + $0x80] sm:$0xff] %v208_v16  ;;  %211 = vst [vmem:[%s2017_s5 + $0x88] sm:$0xff] %v210_v17  ;;  %v212_v18 = vld [vmem:[%s2009_s30 + $0x240] sm:$0xff]  ;;  %v214_v19 = vld [vmem:[%s2009_s30 + $0x248] sm:$0xff] }
  0x20   : > { %v216_v20 = vld [vmem:[%s2009_s30 + $0x280] sm:$0xff]  ;;  %213 = vst [vmem:[%s2017_s5 + $0x90] sm:$0xff] %v212_v18  ;;  %215 = vst [vmem:[%s2017_s5 + $0x98] sm:$0xff] %v214_v19  ;;  %v218_v21 = vld [vmem:[%s2009_s30 + $0x288] sm:$0xff] }
  0x21   : > { %217 = vst [vmem:[%s2017_s5 + $0xa0] sm:$0xff] %v216_v20  ;;  %v220_v22 = vld [vmem:[%s2009_s30 + $0x2c0] sm:$0xff]  ;;  %v222_v23 = vld [vmem:[%s2009_s30 + $0x2c8] sm:$0xff]  ;;  %219 = vst [vmem:[%s2017_s5 + $0xa8] sm:$0xff] %v218_v21 }
  0x22   : > { %221 = vst [vmem:[%s2017_s5 + $0xb0] sm:$0xff] %v220_v22  ;;  %223 = vst [vmem:[%s2017_s5 + $0xb8] sm:$0xff] %v222_v23  ;;  %v224_v24 = vld [vmem:[%s2009_s30 + $0x300] sm:$0xff]  ;;  %v226_v25 = vld [vmem:[%s2009_s30 + $0x308] sm:$0xff] }
  0x23   : > { %v228_v26 = vld [vmem:[%s2009_s30 + $0x340] sm:$0xff]  ;;  %225 = vst [vmem:[%s2017_s5 + $0xc0] sm:$0xff] %v224_v24  ;;  %227 = vst [vmem:[%s2017_s5 + $0xc8] sm:$0xff] %v226_v25  ;;  %v230_v27 = vld [vmem:[%s2009_s30 + $0x348] sm:$0xff] }
  0x24   : > { %229 = vst [vmem:[%s2017_s5 + $0xd0] sm:$0xff] %v228_v26  ;;  %v232_v28 = vld [vmem:[%s2009_s30 + $0x380] sm:$0xff]  ;;  %v234_v29 = vld [vmem:[%s2009_s30 + $0x388] sm:$0xff]  ;;  %231 = vst [vmem:[%s2017_s5 + $0xd8] sm:$0xff] %v230_v27 }
  0x25   : > { %233 = vst [vmem:[%s2017_s5 + $0xe0] sm:$0xff] %v232_v28  ;;  %235 = vst [vmem:[%s2017_s5 + $0xe8] sm:$0xff] %v234_v29  ;;  %v236_v30 = vld [vmem:[%s2009_s30 + $0x3c0] sm:$0xff]  ;;  %v238_v31 = vld [vmem:[%s2009_s30 + $0x3c8] sm:$0xff] }
  0x26   : > { %v240_v32 = vld [vmem:[%s2009_s30 + $0x400] sm:$0xff]  ;;  %237 = vst [vmem:[%s2017_s5 + $0xf0] sm:$0xff] %v236_v30  ;;  %239 = vst [vmem:[%s2017_s5 + $0xf8] sm:$0xff] %v238_v31  ;;  %v242_v33 = vld [vmem:[%s2009_s30 + $0x408] sm:$0xff] }
  0x27   : > { %241 = vst [vmem:[%s2017_s5 + $0x100] sm:$0xff] %v240_v32  ;;  %v244_v34 = vld [vmem:[%s2009_s30 + $0x440] sm:$0xff]  ;;  %v246_v35 = vld [vmem:[%s2009_s30 + $0x448] sm:$0xff]  ;;  %243 = vst [vmem:[%s2017_s5 + $0x108] sm:$0xff] %v242_v33 }
  0x28   : > { %245 = vst [vmem:[%s2017_s5 + $0x110] sm:$0xff] %v244_v34  ;;  %247 = vst [vmem:[%s2017_s5 + $0x118] sm:$0xff] %v246_v35  ;;  %v248_v36 = vld [vmem:[%s2009_s30 + $0x480] sm:$0xff]  ;;  %v250_v37 = vld [vmem:[%s2009_s30 + $0x488] sm:$0xff] }
  0x29   : > { %v252_v38 = vld [vmem:[%s2009_s30 + $0x4c0] sm:$0xff]  ;;  %249 = vst [vmem:[%s2017_s5 + $0x120] sm:$0xff] %v248_v36  ;;  %251 = vst [vmem:[%s2017_s5 + $0x128] sm:$0xff] %v250_v37  ;;  %v254_v39 = vld [vmem:[%s2009_s30 + $0x4c8] sm:$0xff] }
  0x2a   : > { %253 = vst [vmem:[%s2017_s5 + $0x130] sm:$0xff] %v252_v38  ;;  %v256_v40 = vld [vmem:[%s2009_s30 + $0x500] sm:$0xff]  ;;  %v258_v41 = vld [vmem:[%s2009_s30 + $0x508] sm:$0xff]  ;;  %255 = vst [vmem:[%s2017_s5 + $0x138] sm:$0xff] %v254_v39 }
  0x2b   : > { %257 = vst [vmem:[%s2017_s5 + $0x140] sm:$0xff] %v256_v40  ;;  %259 = vst [vmem:[%s2017_s5 + $0x148] sm:$0xff] %v258_v41  ;;  %v260_v42 = vld [vmem:[%s2009_s30 + $0x540] sm:$0xff]  ;;  %v262_v43 = vld [vmem:[%s2009_s30 + $0x548] sm:$0xff] }
  0x2c   : > { %v264_v44 = vld [vmem:[%s2009_s30 + $0x580] sm:$0xff]  ;;  %261 = vst [vmem:[%s2017_s5 + $0x150] sm:$0xff] %v260_v42  ;;  %263 = vst [vmem:[%s2017_s5 + $0x158] sm:$0xff] %v262_v43  ;;  %v266_v45 = vld [vmem:[%s2009_s30 + $0x588] sm:$0xff] }
  0x2d   : > { %265 = vst [vmem:[%s2017_s5 + $0x160] sm:$0xff] %v264_v44  ;;  %v268_v46 = vld [vmem:[%s2009_s30 + $0x5c0] sm:$0xff]  ;;  %v270_v47 = vld [vmem:[%s2009_s30 + $0x5c8] sm:$0xff]  ;;  %267 = vst [vmem:[%s2017_s5 + $0x168] sm:$0xff] %v266_v45 }
  0x2e   : > { %269 = vst [vmem:[%s2017_s5 + $0x170] sm:$0xff] %v268_v46  ;;  %271 = vst [vmem:[%s2017_s5 + $0x178] sm:$0xff] %v270_v47  ;;  %v272_v48 = vld [vmem:[%s2009_s30 + $0x600] sm:$0xff]  ;;  %v274_v49 = vld [vmem:[%s2009_s30 + $0x608] sm:$0xff] }
  0x2f   : > { %v276_v50 = vld [vmem:[%s2009_s30 + $0x640] sm:$0xff]  ;;  %273 = vst [vmem:[%s2017_s5 + $0x180] sm:$0xff] %v272_v48  ;;  %275 = vst [vmem:[%s2017_s5 + $0x188] sm:$0xff] %v274_v49  ;;  %v278_v51 = vld [vmem:[%s2009_s30 + $0x648] sm:$0xff] }
  0x30   : > { %277 = vst [vmem:[%s2017_s5 + $0x190] sm:$0xff] %v276_v50  ;;  %v280_v52 = vld [vmem:[%s2009_s30 + $0x680] sm:$0xff]  ;;  %v282_v53 = vld [vmem:[%s2009_s30 + $0x688] sm:$0xff]  ;;  %279 = vst [vmem:[%s2017_s5 + $0x198] sm:$0xff] %v278_v51 }
  0x31   : > { %281 = vst [vmem:[%s2017_s5 + $0x1a0] sm:$0xff] %v280_v52  ;;  %283 = vst [vmem:[%s2017_s5 + $0x1a8] sm:$0xff] %v282_v53  ;;  %v284_v54 = vld [vmem:[%s2009_s30 + $0x6c0] sm:$0xff]  ;;  %v286_v55 = vld [vmem:[%s2009_s30 + $0x6c8] sm:$0xff] }
  0x32   : > { %v288_v56 = vld [vmem:[%s2009_s30 + $0x700] sm:$0xff]  ;;  %285 = vst [vmem:[%s2017_s5 + $0x1b0] sm:$0xff] %v284_v54  ;;  %287 = vst [vmem:[%s2017_s5 + $0x1b8] sm:$0xff] %v286_v55  ;;  %v290_v57 = vld [vmem:[%s2009_s30 + $0x708] sm:$0xff] }
  0x33   : > { %289 = vst [vmem:[%s2017_s5 + $0x1c0] sm:$0xff] %v288_v56  ;;  %v292_v58 = vld [vmem:[%s2009_s30 + $0x740] sm:$0xff]  ;;  %v294_v59 = vld [vmem:[%s2009_s30 + $0x748] sm:$0xff]  ;;  %291 = vst [vmem:[%s2017_s5 + $0x1c8] sm:$0xff] %v290_v57 }
  0x34   : > { %293 = vst [vmem:[%s2017_s5 + $0x1d0] sm:$0xff] %v292_v58  ;;  %295 = vst [vmem:[%s2017_s5 + $0x1d8] sm:$0xff] %v294_v59  ;;  %v296_v60 = vld [vmem:[%s2009_s30 + $0x780] sm:$0xff]  ;;  %v298_v61 = vld [vmem:[%s2009_s30 + $0x788] sm:$0xff] }
  0x35   : > { %v300_v62 = vld [vmem:[%s2009_s30 + $0x7c0] sm:$0xff]  ;;  %297 = vst [vmem:[%s2017_s5 + $0x1e0] sm:$0xff] %v296_v60  ;;  %299 = vst [vmem:[%s2017_s5 + $0x1e8] sm:$0xff] %v298_v61  ;;  %v302_v63 = vld [vmem:[%s2009_s30 + $0x7c8] sm:$0xff] }
  0x36   : > { %301 = vst [vmem:[%s2017_s5 + $0x1f0] sm:$0xff] %v300_v62  ;;  %v304_v0 = vld [vmem:[%s2009_s30 + $0x800] sm:$0xff]  ;;  %v306_v1 = vld [vmem:[%s2009_s30 + $0x808] sm:$0xff]  ;;  %303 = vst [vmem:[%s2017_s5 + $0x1f8] sm:$0xff] %v302_v63 }
  0x37   : > { %305 = vst [vmem:[%s2017_s5 + $0x200] sm:$0xff] %v304_v0  ;;  %307 = vst [vmem:[%s2017_s5 + $0x208] sm:$0xff] %v306_v1  ;;  %v308_v2 = vld [vmem:[%s2009_s30 + $0x840] sm:$0xff]  ;;  %v310_v3 = vld [vmem:[%s2009_s30 + $0x848] sm:$0xff] }
  0x38   : > { %v312_v4 = vld [vmem:[%s2009_s30 + $0x880] sm:$0xff]  ;;  %309 = vst [vmem:[%s2017_s5 + $0x210] sm:$0xff] %v308_v2  ;;  %311 = vst [vmem:[%s2017_s5 + $0x218] sm:$0xff] %v310_v3  ;;  %v314_v5 = vld [vmem:[%s2009_s30 + $0x888] sm:$0xff] }
  0x39   : > { %313 = vst [vmem:[%s2017_s5 + $0x220] sm:$0xff] %v312_v4  ;;  %v316_v6 = vld [vmem:[%s2009_s30 + $0x8c0] sm:$0xff]  ;;  %v318_v7 = vld [vmem:[%s2009_s30 + $0x8c8] sm:$0xff]  ;;  %315 = vst [vmem:[%s2017_s5 + $0x228] sm:$0xff] %v314_v5 }
  0x3a   : > { %317 = vst [vmem:[%s2017_s5 + $0x230] sm:$0xff] %v316_v6  ;;  %319 = vst [vmem:[%s2017_s5 + $0x238] sm:$0xff] %v318_v7  ;;  %v320_v8 = vld [vmem:[%s2009_s30 + $0x900] sm:$0xff]  ;;  %v322_v9 = vld [vmem:[%s2009_s30 + $0x908] sm:$0xff] }
  0x3b   : > { %v324_v10 = vld [vmem:[%s2009_s30 + $0x940] sm:$0xff]  ;;  %321 = vst [vmem:[%s2017_s5 + $0x240] sm:$0xff] %v320_v8  ;;  %323 = vst [vmem:[%s2017_s5 + $0x248] sm:$0xff] %v322_v9  ;;  %v326_v11 = vld [vmem:[%s2009_s30 + $0x948] sm:$0xff] }
  0x3c   : > { %325 = vst [vmem:[%s2017_s5 + $0x250] sm:$0xff] %v324_v10  ;;  %v328_v12 = vld [vmem:[%s2009_s30 + $0x980] sm:$0xff]  ;;  %v330_v13 = vld [vmem:[%s2009_s30 + $0x988] sm:$0xff]  ;;  %327 = vst [vmem:[%s2017_s5 + $0x258] sm:$0xff] %v326_v11 }
  0x3d   : > { %329 = vst [vmem:[%s2017_s5 + $0x260] sm:$0xff] %v328_v12  ;;  %331 = vst [vmem:[%s2017_s5 + $0x268] sm:$0xff] %v330_v13  ;;  %v332_v14 = vld [vmem:[%s2009_s30 + $0x9c0] sm:$0xff]  ;;  %v334_v15 = vld [vmem:[%s2009_s30 + $0x9c8] sm:$0xff] }
  0x3e   : > { %v336_v16 = vld [vmem:[%s2009_s30 + $0xa00] sm:$0xff]  ;;  %333 = vst [vmem:[%s2017_s5 + $0x270] sm:$0xff] %v332_v14  ;;  %335 = vst [vmem:[%s2017_s5 + $0x278] sm:$0xff] %v334_v15  ;;  %v338_v17 = vld [vmem:[%s2009_s30 + $0xa08] sm:$0xff] }
  0x3f   : > { %337 = vst [vmem:[%s2017_s5 + $0x280] sm:$0xff] %v336_v16  ;;  %v340_v18 = vld [vmem:[%s2009_s30 + $0xa40] sm:$0xff]  ;;  %v342_v19 = vld [vmem:[%s2009_s30 + $0xa48] sm:$0xff]  ;;  %339 = vst [vmem:[%s2017_s5 + $0x288] sm:$0xff] %v338_v17 }
  0x40   : > { %341 = vst [vmem:[%s2017_s5 + $0x290] sm:$0xff] %v340_v18  ;;  %343 = vst [vmem:[%s2017_s5 + $0x298] sm:$0xff] %v342_v19  ;;  %v344_v20 = vld [vmem:[%s2009_s30 + $0xa80] sm:$0xff]  ;;  %v346_v21 = vld [vmem:[%s2009_s30 + $0xa88] sm:$0xff] }
  0x41   : > { %v348_v22 = vld [vmem:[%s2009_s30 + $0xac0] sm:$0xff]  ;;  %345 = vst [vmem:[%s2017_s5 + $0x2a0] sm:$0xff] %v344_v20  ;;  %347 = vst [vmem:[%s2017_s5 + $0x2a8] sm:$0xff] %v346_v21  ;;  %v350_v23 = vld [vmem:[%s2009_s30 + $0xac8] sm:$0xff] }
  0x42   : > { %349 = vst [vmem:[%s2017_s5 + $0x2b0] sm:$0xff] %v348_v22  ;;  %v352_v24 = vld [vmem:[%s2009_s30 + $0xb00] sm:$0xff]  ;;  %v354_v25 = vld [vmem:[%s2009_s30 + $0xb08] sm:$0xff]  ;;  %351 = vst [vmem:[%s2017_s5 + $0x2b8] sm:$0xff] %v350_v23 }
  0x43   : > { %353 = vst [vmem:[%s2017_s5 + $0x2c0] sm:$0xff] %v352_v24  ;;  %355 = vst [vmem:[%s2017_s5 + $0x2c8] sm:$0xff] %v354_v25  ;;  %v356_v26 = vld [vmem:[%s2009_s30 + $0xb40] sm:$0xff]  ;;  %v358_v27 = vld [vmem:[%s2009_s30 + $0xb48] sm:$0xff] }
  0x44   : > { %v360_v28 = vld [vmem:[%s2009_s30 + $0xb80] sm:$0xff]  ;;  %357 = vst [vmem:[%s2017_s5 + $0x2d0] sm:$0xff] %v356_v26  ;;  %359 = vst [vmem:[%s2017_s5 + $0x2d8] sm:$0xff] %v358_v27  ;;  %v362_v29 = vld [vmem:[%s2009_s30 + $0xb88] sm:$0xff] }
  0x45   : > { %361 = vst [vmem:[%s2017_s5 + $0x2e0] sm:$0xff] %v360_v28  ;;  %v364_v30 = vld [vmem:[%s2009_s30 + $0xbc0] sm:$0xff]  ;;  %v366_v31 = vld [vmem:[%s2009_s30 + $0xbc8] sm:$0xff]  ;;  %363 = vst [vmem:[%s2017_s5 + $0x2e8] sm:$0xff] %v362_v29 }
  0x46   : > { %365 = vst [vmem:[%s2017_s5 + $0x2f0] sm:$0xff] %v364_v30  ;;  %367 = vst [vmem:[%s2017_s5 + $0x2f8] sm:$0xff] %v366_v31  ;;  %v368_v32 = vld [vmem:[%s2009_s30 + $0xc00] sm:$0xff]  ;;  %v370_v33 = vld [vmem:[%s2009_s30 + $0xc08] sm:$0xff] }
  0x47   : > { %v372_v34 = vld [vmem:[%s2009_s30 + $0xc40] sm:$0xff]  ;;  %369 = vst [vmem:[%s2017_s5 + $0x300] sm:$0xff] %v368_v32  ;;  %371 = vst [vmem:[%s2017_s5 + $0x308] sm:$0xff] %v370_v33  ;;  %v374_v35 = vld [vmem:[%s2009_s30 + $0xc48] sm:$0xff] }
  0x48   : > { %373 = vst [vmem:[%s2017_s5 + $0x310] sm:$0xff] %v372_v34  ;;  %v376_v36 = vld [vmem:[%s2009_s30 + $0xc80] sm:$0xff]  ;;  %v378_v37 = vld [vmem:[%s2009_s30 + $0xc88] sm:$0xff]  ;;  %375 = vst [vmem:[%s2017_s5 + $0x318] sm:$0xff] %v374_v35 }
  0x49   : > { %377 = vst [vmem:[%s2017_s5 + $0x320] sm:$0xff] %v376_v36  ;;  %379 = vst [vmem:[%s2017_s5 + $0x328] sm:$0xff] %v378_v37  ;;  %v380_v38 = vld [vmem:[%s2009_s30 + $0xcc0] sm:$0xff]  ;;  %v382_v39 = vld [vmem:[%s2009_s30 + $0xcc8] sm:$0xff] }
  0x4a   : > { %v384_v40 = vld [vmem:[%s2009_s30 + $0xd00] sm:$0xff]  ;;  %381 = vst [vmem:[%s2017_s5 + $0x330] sm:$0xff] %v380_v38  ;;  %383 = vst [vmem:[%s2017_s5 + $0x338] sm:$0xff] %v382_v39  ;;  %v386_v41 = vld [vmem:[%s2009_s30 + $0xd08] sm:$0xff] }
  0x4b   : > { %385 = vst [vmem:[%s2017_s5 + $0x340] sm:$0xff] %v384_v40  ;;  %v388_v42 = vld [vmem:[%s2009_s30 + $0xd40] sm:$0xff]  ;;  %v390_v43 = vld [vmem:[%s2009_s30 + $0xd48] sm:$0xff]  ;;  %387 = vst [vmem:[%s2017_s5 + $0x348] sm:$0xff] %v386_v41 }
  0x4c   : > { %389 = vst [vmem:[%s2017_s5 + $0x350] sm:$0xff] %v388_v42  ;;  %391 = vst [vmem:[%s2017_s5 + $0x358] sm:$0xff] %v390_v43 }
  0x4d PF: > { %p1552_p7 = scmp.ge.s32.totalorder %s1938_s19, 1  ;;  %p396_p8 = scmp.lt.s32.totalorder %s1938_s19, 5 }
  0x4f   : > { %p397_p9 = pnand %p1552_p7, %p396_p8 }
  0x50   : > { %s403_s6 = sand.u32 (!%p397_p9), 1, %s1930_s17   ;;  %v1840_v44 = vld [vmem:[%s2456_s1 + $0x4] ss:$16 sps:$4 sm:$0xff] (!%p397_p9)   ;;  %v1940_v45 = vmov (!%p397_p9), 0   ;;  %vm1148_vm0 = vcmask (!%p397_p9), 392192   ;;  %s1367_s14 = sld [smem:[#allocation2]] (!%p397_p9) }
  0x51   : > { %400 = sbr.rel (%p397_p9) target bundleno = 434 (0x1b2), region = 55  ;;  %1740 = vset.pattern.permute.xlu0 (!%p397_p9), %v1940_v45  ;;  %1741 = vset.pattern.permute.xlu1 (!%p397_p9), %v1940_v45  ;;  %s1553_s15 = sshll.u32 (!%p397_p9), %s403_s6, 7 }
  0x52   : > { %s1714_s7 = smul.u32 (!%p397_p9), 864, %s403_s6  ;;  %1187 = vmatprep.mubr.bf16.mxu0 (!%p397_p9), %v1840_v44  ;;  %1293 = vmatprep.mubr.bf16.mxu1 (!%p397_p9), %v1840_v44  ;;  %s2392_s17 = scalar_lea.vmem (!%p397_p9), [#allocation4], %s1553_s15 }
  0x54   : > { %s2237_s10 = scalar_lea.vmem (!%p397_p9), [#allocation3], %s1714_s7 }
  0x55   : > { %v1742_v46 = vld [vmem:[%s2237_s10 + $0x4] ss:$16 sps:$4 sm:$0xff] (!%p397_p9)   ;;  %v1744_v47 = vld [vmem:[%s2237_s10 + $0xc] ss:$16 sps:$4 sm:$0xff] (!%p397_p9)   ;;  %v1746_v48 = vld [vmem:[%s2237_s10] ss:$16 sps:$4 sm:$0xff] (!%p397_p9)  }
  0x56   : > { %1155 = vmatprep.subr.bf16.mxu0 (!%p397_p9), %v1742_v46  ;;  %v1747_v49 = vld [vmem:[%s2237_s10 + $0x8] ss:$16 sps:$4 sm:$0xff] (!%p397_p9)   ;;  %1261 = vmatprep.subr.bf16.mxu1 (!%p397_p9), %v1744_v47  ;;  %v1748_v50 = vld [vmem:[%s2237_s10 + $0x24] ss:$16 sps:$4 sm:$0xff] (!%p397_p9)   ;;  %v1750_v51 = vld [vmem:[%s2237_s10 + $0x2c] ss:$16 sps:$4 sm:$0xff] (!%p397_p9)  }
  0x57   : > { %1156 = vmatpush1.bf16.msra.mxu0 (!%p397_p9), %v1746_v48  ;;  %1262 = vmatpush1.bf16.msra.mxu1 (!%p397_p9), %v1747_v49  ;;  %v1752_v52 = vld [vmem:[%s2237_s10 + $0x20] ss:$16 sps:$4 sm:$0xff] (!%p397_p9)   ;;  %v1753_v53 = vld [vmem:[%s2237_s10 + $0x28] ss:$16 sps:$4 sm:$0xff] (!%p397_p9)   ;;  %v1754_v54 = vld [vmem:[%s2237_s10 + $0x44] ss:$16 sps:$4 sm:$0xff] (!%p397_p9)  }
  0x58   : > { %1157 = vmatprep.subr.bf16.mxu0 %v1748_v50  ;;  %1263 = vmatprep.subr.bf16.mxu1 %v1750_v51  ;;  %v1756_v55 = vld [vmem:[%s2237_s10 + $0x4c] ss:$16 sps:$4 sm:$0xff]   ;;  %v1758_v56 = vld [vmem:[%s2237_s10 + $0x40] ss:$16 sps:$4 sm:$0xff]   ;;  %v1759_v57 = vld [vmem:[%s2237_s10 + $0x48] ss:$16 sps:$4 sm:$0xff]  }
  0x59   : > { %v1760_v58 = vld [vmem:[%s2237_s10 + $0x64] ss:$16 sps:$4 sm:$0xff]   ;;  %v1762_v59 = vld [vmem:[%s2237_s10 + $0x6c] ss:$16 sps:$4 sm:$0xff]   ;;  %v1764_v60 = vld [vmem:[%s2237_s10 + $0x60] ss:$16 sps:$4 sm:$0xff]  }
  0x5a   : > { %v1765_v61 = vld [vmem:[%s2237_s10 + $0x68] ss:$16 sps:$4 sm:$0xff]   ;;  %v1766_v62 = vld [vmem:[%s2237_s10 + $0x84] ss:$16 sps:$4 sm:$0xff]   ;;  %v1768_v63 = vld [vmem:[%s2237_s10 + $0x8c] ss:$16 sps:$4 sm:$0xff]  }
  0x5b   : > { %1158 = vmatpush1.bf16.msra.mxu0 %v1752_v52  ;;  %1264 = vmatpush1.bf16.msra.mxu1 %v1753_v53  ;;  %v1770_v0 = vld [vmem:[%s2237_s10 + $0x80] ss:$16 sps:$4 sm:$0xff]   ;;  %v1771_v1 = vld [vmem:[%s2237_s10 + $0x88] ss:$16 sps:$4 sm:$0xff]   ;;  %v1772_v2 = vld [vmem:[%s2237_s10 + $0xa4] ss:$16 sps:$4 sm:$0xff]  }
  0x5c   : > { %1159 = vmatprep.subr.bf16.mxu0 %v1754_v54  ;;  %1265 = vmatprep.subr.bf16.mxu1 %v1756_v55  ;;  %v1774_v3 = vld [vmem:[%s2237_s10 + $0xac] ss:$16 sps:$4 sm:$0xff]   ;;  %v1776_v4 = vld [vmem:[%s2237_s10 + $0xa0] ss:$16 sps:$4 sm:$0xff]   ;;  %v1777_v5 = vld [vmem:[%s2237_s10 + $0xa8] ss:$16 sps:$4 sm:$0xff]  }
  0x5d   : > { %v1778_v6 = vld [vmem:[%s2237_s10 + $0xc4] ss:$16 sps:$4 sm:$0xff]   ;;  %v1780_v7 = vld [vmem:[%s2237_s10 + $0xcc] ss:$16 sps:$4 sm:$0xff]   ;;  %v1782_v8 = vld [vmem:[%s2237_s10 + $0xc0] ss:$16 sps:$4 sm:$0xff]  }
  0x5e   : > { %v1783_v9 = vld [vmem:[%s2237_s10 + $0xc8] ss:$16 sps:$4 sm:$0xff]   ;;  %v1784_v10 = vld [vmem:[%s2237_s10 + $0xe4] ss:$16 sps:$4 sm:$0xff]   ;;  %v1786_v11 = vld [vmem:[%s2237_s10 + $0xec] ss:$16 sps:$4 sm:$0xff]  }
  0x5f   : > { %1160 = vmatpush1.bf16.msra.mxu0 %v1758_v56  ;;  %1266 = vmatpush1.bf16.msra.mxu1 %v1759_v57  ;;  %v1788_v12 = vld [vmem:[%s2237_s10 + $0xe0] ss:$16 sps:$4 sm:$0xff]   ;;  %v1789_v13 = vld [vmem:[%s2237_s10 + $0xe8] ss:$16 sps:$4 sm:$0xff]   ;;  %v1790_v14 = vld [vmem:[%s2237_s10 + $0x104] ss:$16 sps:$4 sm:$0xff]  }
  0x60   : > { %1161 = vmatprep.subr.bf16.mxu0 %v1760_v58  ;;  %1267 = vmatprep.subr.bf16.mxu1 %v1762_v59  ;;  %v1792_v15 = vld [vmem:[%s2237_s10 + $0x10c] ss:$16 sps:$4 sm:$0xff]   ;;  %v1794_v16 = vld [vmem:[%s2237_s10 + $0x100] ss:$16 sps:$4 sm:$0xff]   ;;  %v1795_v17 = vld [vmem:[%s2237_s10 + $0x108] ss:$16 sps:$4 sm:$0xff]  }
  0x61   : > { %v1796_v18 = vld [vmem:[%s2237_s10 + $0x124] ss:$16 sps:$4 sm:$0xff]   ;;  %v1798_v19 = vld [vmem:[%s2237_s10 + $0x12c] ss:$16 sps:$4 sm:$0xff]   ;;  %v1800_v20 = vld [vmem:[%s2237_s10 + $0x120] ss:$16 sps:$4 sm:$0xff]  }
  0x62   : > { %v1801_v21 = vld [vmem:[%s2237_s10 + $0x128] ss:$16 sps:$4 sm:$0xff]   ;;  %v1802_v22 = vld [vmem:[%s2237_s10 + $0x144] ss:$16 sps:$4 sm:$0xff]   ;;  %v1804_v23 = vld [vmem:[%s2237_s10 + $0x14c] ss:$16 sps:$4 sm:$0xff]  }
  0x63   : > { %1162 = vmatpush1.bf16.msra.mxu0 %v1764_v60  ;;  %1268 = vmatpush1.bf16.msra.mxu1 %v1765_v61  ;;  %v1806_v24 = vld [vmem:[%s2237_s10 + $0x140] ss:$16 sps:$4 sm:$0xff]   ;;  %v1807_v25 = vld [vmem:[%s2237_s10 + $0x148] ss:$16 sps:$4 sm:$0xff]   ;;  %v1808_v26 = vld [vmem:[%s2237_s10 + $0x164] ss:$16 sps:$4 sm:$0xff]  }
  0x64   : > { %1163 = vmatprep.subr.bf16.mxu0 %v1766_v62  ;;  %1269 = vmatprep.subr.bf16.mxu1 %v1768_v63  ;;  %v1810_v27 = vld [vmem:[%s2237_s10 + $0x16c] ss:$16 sps:$4 sm:$0xff]   ;;  %v1812_v28 = vld [vmem:[%s2237_s10 + $0x160] ss:$16 sps:$4 sm:$0xff]   ;;  %v1813_v29 = vld [vmem:[%s2237_s10 + $0x168] ss:$16 sps:$4 sm:$0xff]  }
  0x65   : > { %v1814_v30 = vld [vmem:[%s2237_s10 + $0x184] ss:$16 sps:$4 sm:$0xff]   ;;  %v1816_v31 = vld [vmem:[%s2237_s10 + $0x18c] ss:$16 sps:$4 sm:$0xff]   ;;  %v1818_v32 = vld [vmem:[%s2237_s10 + $0x180] ss:$16 sps:$4 sm:$0xff]  }
  0x66   : > { %v1819_v33 = vld [vmem:[%s2237_s10 + $0x188] ss:$16 sps:$4 sm:$0xff]   ;;  %v1820_v34 = vld [vmem:[%s2237_s10 + $0x1a4] ss:$16 sps:$4 sm:$0xff]   ;;  %v1822_v35 = vld [vmem:[%s2237_s10 + $0x1ac] ss:$16 sps:$4 sm:$0xff]  }
  0x67   : > { %1164 = vmatpush1.bf16.msra.mxu0 %v1770_v0  ;;  %1270 = vmatpush1.bf16.msra.mxu1 %v1771_v1  ;;  %v1824_v36 = vld [vmem:[%s2237_s10 + $0x1a0] ss:$16 sps:$4 sm:$0xff]   ;;  %v1825_v37 = vld [vmem:[%s2237_s10 + $0x1a8] ss:$16 sps:$4 sm:$0xff]   ;;  %v1826_v38 = vld [vmem:[%s2237_s10 + $0x1c4] ss:$16 sps:$4 sm:$0xff]  }
  0x68   : > { %1165 = vmatprep.subr.bf16.mxu0 %v1772_v2  ;;  %1271 = vmatprep.subr.bf16.mxu1 %v1774_v3  ;;  %v1828_v39 = vld [vmem:[%s2237_s10 + $0x1cc] ss:$16 sps:$4 sm:$0xff]   ;;  %v1830_v40 = vld [vmem:[%s2237_s10 + $0x1c0] ss:$16 sps:$4 sm:$0xff]   ;;  %v1831_v41 = vld [vmem:[%s2237_s10 + $0x1c8] ss:$16 sps:$4 sm:$0xff]  }
  0x69   : > { %v1832_v42 = vld [vmem:[%s2237_s10 + $0x1e4] ss:$16 sps:$4 sm:$0xff]   ;;  %v1834_v43 = vld [vmem:[%s2237_s10 + $0x1ec] ss:$16 sps:$4 sm:$0xff]   ;;  %v1836_v44 = vld [vmem:[%s2237_s10 + $0x1e0] ss:$16 sps:$4 sm:$0xff]  }
  0x6a   : > { %v1837_v45 = vld [vmem:[%s2237_s10 + $0x1e8] ss:$16 sps:$4 sm:$0xff]   ;;  %v1843_v46 = vld [vmem:[%s2237_s10 + $0x204] ss:$16 sps:$4 sm:$0xff]   ;;  %v1846_v47 = vld [vmem:[%s2237_s10 + $0x20c] ss:$16 sps:$4 sm:$0xff]  }
  0x6b   : > { %1166 = vmatpush1.bf16.msra.mxu0 %v1776_v4  ;;  %1272 = vmatpush1.bf16.msra.mxu1 %v1777_v5  ;;  %v1838_v48 = vld [vmem:[%s2456_s1] ss:$16 sps:$4 sm:$0xff]   ;;  %v1844_v50 = vld [vmem:[%s2237_s10 + $0x208] ss:$16 sps:$4 sm:$0xff]   ;;  %v1849_v51 = vld [vmem:[%s2237_s10 + $0x224] ss:$16 sps:$4 sm:$0xff]  }
  0x6c   : > { %1167 = vmatprep.subr.bf16.mxu0 %v1778_v6  ;;  %1273 = vmatprep.subr.bf16.mxu1 %v1780_v7  ;;  %v1841_v49 = vld [vmem:[%s2237_s10 + $0x200] ss:$16 sps:$4 sm:$0xff]   ;;  %v1852_v52 = vld [vmem:[%s2237_s10 + $0x22c] ss:$16 sps:$4 sm:$0xff]   ;;  %v1895_v53 = vld [vmem:[%s2456_s1 + $0x24] ss:$16 sps:$4 sm:$0xff]  }
  0x6d   : > { %v1847_v54 = vld [vmem:[%s2237_s10 + $0x220] ss:$16 sps:$4 sm:$0xff]   ;;  %v1850_v55 = vld [vmem:[%s2237_s10 + $0x228] ss:$16 sps:$4 sm:$0xff]   ;;  %v1855_v56 = vld [vmem:[%s2237_s10 + $0x244] ss:$16 sps:$4 sm:$0xff]  }
  0x6e   : > { %v1858_v57 = vld [vmem:[%s2237_s10 + $0x24c] ss:$16 sps:$4 sm:$0xff]   ;;  %v1853_v58 = vld [vmem:[%s2237_s10 + $0x240] ss:$16 sps:$4 sm:$0xff]   ;;  %v1856_v60 = vld [vmem:[%s2237_s10 + $0x248] ss:$16 sps:$4 sm:$0xff]  }
  0x6f   : > { %1168 = vmatpush1.bf16.msra.mxu0 %v1782_v8  ;;  %1274 = vmatpush1.bf16.msra.mxu1 %v1783_v9  ;;  %v1897_v59 = vld [vmem:[%s2456_s1 + $0x20] ss:$16 sps:$4 sm:$0xff]   ;;  %v1861_v61 = vld [vmem:[%s2237_s10 + $0x264] ss:$16 sps:$4 sm:$0xff]   ;;  %v1864_v62 = vld [vmem:[%s2237_s10 + $0x26c] ss:$16 sps:$4 sm:$0xff]  }
  0x70   : > { %1169 = vmatprep.subr.bf16.mxu0 %v1784_v10  ;;  %1275 = vmatprep.subr.bf16.mxu1 %v1786_v11  ;;  %v546_v63 = vld [vmem:[%s2458_s3] sm:$0xff]  ;;  %v1912_v0 = vld [vmem:[%s2456_s1 + $0xc] ss:$16 sps:$4 sm:$0xff]   ;;  %v1862_v2 = vld [vmem:[%s2237_s10 + $0x268] ss:$16 sps:$4 sm:$0xff]   ;;  %s1680_s6 = sshll.u32 (%p1999_p5), %s1546_s0, 5 }
  0x71   : > { %552 = vperm.xlu0 %1740, %v546_v63   ;;  %v1859_v1 = vld [vmem:[%s2237_s10 + $0x260] ss:$16 sps:$4 sm:$0xff]   ;;  %v547_v3 = vld [vmem:[%s2458_s3 + $0x8] sm:$0xff]  ;;  %v1867_v5 = vld [vmem:[%s2237_s10 + $0x284] ss:$16 sps:$4 sm:$0xff]   ;;  %s1442_s24 = scalar_lea.vmem (%p1999_p5), %s2459_s4, %s1680_s6 }
  0x72   : > { %v548_v4 = vld [vmem:[%s2458_s3 + $0x10] sm:$0xff]  ;;  %v1870_v6 = vld [vmem:[%s2237_s10 + $0x28c] ss:$16 sps:$4 sm:$0xff]   ;;  %v1868_v8 = vld [vmem:[%s2237_s10 + $0x288] ss:$16 sps:$4 sm:$0xff]  }
  0x73   : > { %1170 = vmatpush1.bf16.msra.mxu0 %v1788_v12  ;;  %1276 = vmatpush1.bf16.msra.mxu1 %v1789_v13  ;;  %v1865_v7 = vld [vmem:[%s2237_s10 + $0x280] ss:$16 sps:$4 sm:$0xff]   ;;  %v549_v9 = vld [vmem:[%s2458_s3 + $0x18] sm:$0xff]  ;;  %v1873_v10 = vld [vmem:[%s2237_s10 + $0x2a4] ss:$16 sps:$4 sm:$0xff]  }
  0x74   : > { %1171 = vmatprep.subr.bf16.mxu0 %v1790_v14  ;;  %1277 = vmatprep.subr.bf16.mxu1 %v1792_v15  ;;  %v1876_v11 = vld [vmem:[%s2237_s10 + $0x2ac] ss:$16 sps:$4 sm:$0xff]   ;;  %v1871_v12 = vld [vmem:[%s2237_s10 + $0x2a0] ss:$16 sps:$4 sm:$0xff]   ;;  %v1874_v13 = vld [vmem:[%s2237_s10 + $0x2a8] ss:$16 sps:$4 sm:$0xff]  }
  0x75   : > { %557 = vperm.xlu0 %1740, %v547_v3   ;;  %562 = vperm.xlu1 %1741, %v548_v4   ;;  %v1879_v14 = vld [vmem:[%s2237_s10 + $0x2c4] ss:$16 sps:$4 sm:$0xff]   ;;  %v1882_v15 = vld [vmem:[%s2237_s10 + $0x2cc] ss:$16 sps:$4 sm:$0xff]  }
  0x77   : > { %1172 = vmatpush1.bf16.msra.mxu0 %v1794_v16  ;;  %1278 = vmatpush1.bf16.msra.mxu1 %v1795_v17  ;;  %v1877_v16 = vld [vmem:[%s2237_s10 + $0x2c0] ss:$16 sps:$4 sm:$0xff]   ;;  %v1880_v17 = vld [vmem:[%s2237_s10 + $0x2c8] ss:$16 sps:$4 sm:$0xff]  }
  0x78   : > { %1173 = vmatprep.subr.bf16.mxu0 %v1796_v18  ;;  %1279 = vmatprep.subr.bf16.mxu1 %v1798_v19  ;;  %v1885_v18 = vld [vmem:[%s2237_s10 + $0x2e4] ss:$16 sps:$4 sm:$0xff]   ;;  %v1888_v19 = vld [vmem:[%s2237_s10 + $0x2ec] ss:$16 sps:$4 sm:$0xff]  }
  0x79   : > { %567 = vperm.xlu1 %1741, %v549_v9  }
  0x7b   : > { %1174 = vmatpush1.bf16.msra.mxu0 %v1800_v20  ;;  %1280 = vmatpush1.bf16.msra.mxu1 %v1801_v21  ;;  %v1883_v20 = vld [vmem:[%s2237_s10 + $0x2e0] ss:$16 sps:$4 sm:$0xff]   ;;  %v1886_v21 = vld [vmem:[%s2237_s10 + $0x2e8] ss:$16 sps:$4 sm:$0xff]  }
  0x7c   : > { %1175 = vmatprep.subr.bf16.mxu0 %v1802_v22  ;;  %1281 = vmatprep.subr.bf16.mxu1 %v1804_v23  ;;  %v1891_v22 = vld [vmem:[%s2237_s10 + $0x304] ss:$16 sps:$4 sm:$0xff]   ;;  %v1894_v23 = vld [vmem:[%s2237_s10 + $0x30c] ss:$16 sps:$4 sm:$0xff]  }
  0x7f   : > { %1176 = vmatpush1.bf16.msra.mxu0 %v1806_v24  ;;  %1282 = vmatpush1.bf16.msra.mxu1 %v1807_v25  ;;  %v1889_v24 = vld [vmem:[%s2237_s10 + $0x300] ss:$16 sps:$4 sm:$0xff]   ;;  %v1892_v25 = vld [vmem:[%s2237_s10 + $0x308] ss:$16 sps:$4 sm:$0xff]  }
  0x80   : > { %1177 = vmatprep.subr.bf16.mxu0 %v1808_v26  ;;  %1283 = vmatprep.subr.bf16.mxu1 %v1810_v27  ;;  %v1900_v26 = vld [vmem:[%s2237_s10 + $0x324] ss:$16 sps:$4 sm:$0xff]   ;;  %v1903_v27 = vld [vmem:[%s2237_s10 + $0x32c] ss:$16 sps:$4 sm:$0xff]  }
  0x83   : > { %1178 = vmatpush1.bf16.msra.mxu0 %v1812_v28  ;;  %1284 = vmatpush1.bf16.msra.mxu1 %v1813_v29  ;;  %v1898_v28 = vld [vmem:[%s2237_s10 + $0x320] ss:$16 sps:$4 sm:$0xff]   ;;  %v1901_v29 = vld [vmem:[%s2237_s10 + $0x328] ss:$16 sps:$4 sm:$0xff]  }
  0x84   : > { %1179 = vmatprep.subr.bf16.mxu0 %v1814_v30  ;;  %1285 = vmatprep.subr.bf16.mxu1 %v1816_v31  ;;  %v1906_v30 = vld [vmem:[%s2237_s10 + $0x344] ss:$16 sps:$4 sm:$0xff]   ;;  %v1909_v31 = vld [vmem:[%s2237_s10 + $0x34c] ss:$16 sps:$4 sm:$0xff]  }
  0x87   : > { %1180 = vmatpush1.bf16.msra.mxu0 %v1818_v32  ;;  %1286 = vmatpush1.bf16.msra.mxu1 %v1819_v33  ;;  %v1904_v32 = vld [vmem:[%s2237_s10 + $0x340] ss:$16 sps:$4 sm:$0xff]   ;;  %v1907_v33 = vld [vmem:[%s2237_s10 + $0x348] ss:$16 sps:$4 sm:$0xff]  }
  0x88   : > { %1181 = vmatprep.subr.bf16.mxu0 %v1820_v34  ;;  %1287 = vmatprep.subr.bf16.mxu1 %v1822_v35  ;;  %v1910_v34 = vld [vmem:[%s2456_s1 + $0x8] ss:$16 sps:$4 sm:$0xff]   ;;  %v1913_v35 = vld [vmem:[%s2456_s1 + $0x2c] ss:$16 sps:$4 sm:$0xff]  }
  0x8b   : > { %1182 = vmatpush1.bf16.msra.mxu0 %v1824_v36  ;;  %1288 = vmatpush1.bf16.msra.mxu1 %v1825_v37  ;;  %v1915_v36 = vld [vmem:[%s2456_s1 + $0x28] ss:$16 sps:$4 sm:$0xff]  }
  0x8c   : > { %1183 = vmatprep.subr.bf16.mxu0 %v1826_v38  ;;  %1289 = vmatprep.subr.bf16.mxu1 %v1828_v39 }
  0x8f   : > { %1184 = vmatpush1.bf16.msra.mxu0 %v1830_v40  ;;  %1290 = vmatpush1.bf16.msra.mxu1 %v1831_v41  ;;  %v2386_v40 = vstv %s1367_s14 }
  0x90   : > { %1185 = vmatprep.subr.bf16.mxu0 %v1832_v42  ;;  %1291 = vmatprep.subr.bf16.mxu1 %v1834_v43 }
  0x93   : > { %1186 = vmatpush1.bf16.msra.mxu0 %v1836_v44  ;;  %1292 = vmatpush1.bf16.msra.mxu1 %v1837_v45 }
  0x94   : > { %1208 = vmatprep.subr.bf16.mxu0 %v1843_v46  ;;  %1314 = vmatprep.subr.bf16.mxu1 %v1846_v47 }
  0x96   : > { %1188 = vmatmul.mubr.bf16.vlgmr.msra.gmra.mrb[0].mxu0 %v1838_v48  ;;  %1294 = vmatmul.mubr.bf16.vlgmr.msra.gmra.mrb[0].mxu1 %v1838_v48 }
  0x97   : > { %1209 = vmatpush1.bf16.msra.mxu0 %v1841_v49  ;;  %1315 = vmatpush1.bf16.msra.mxu1 %v1844_v50 }
  0x98   : > { %1210 = vmatprep.subr.bf16.mxu0 %v1849_v51  ;;  %1316 = vmatprep.subr.bf16.mxu1 %v1852_v52 }
  0x99   : > { %1197 = vmatprep.mubr.bf16.mxu0 %v1895_v53  ;;  %1303 = vmatprep.mubr.bf16.mxu1 %v1895_v53 }
  0x9b   : > { %1211 = vmatpush1.bf16.msra.mxu0 %v1847_v54  ;;  %1317 = vmatpush1.bf16.msra.mxu1 %v1850_v55 }
  0x9c   : > { %1212 = vmatprep.subr.bf16.mxu0 %v1855_v56  ;;  %1318 = vmatprep.subr.bf16.mxu1 %v1858_v57 }
  0x9e   : > { %1198 = vmatmul.mubr.bf16.gmra.mrb[4].mxu0 %v1897_v59  ;;  %1304 = vmatmul.mubr.bf16.gmra.mrb[4].mxu1 %v1897_v59 }
  0x9f   : > { %1213 = vmatpush1.bf16.msra.mxu0 %v1853_v58  ;;  %1319 = vmatpush1.bf16.msra.mxu1 %v1856_v60 }
  0xa0   : > { %1214 = vmatprep.subr.bf16.mxu0 %v1861_v61  ;;  %1320 = vmatprep.subr.bf16.mxu1 %v1864_v62 }
  0xa1   : > { %1670 = vmatprep.mubr.msk.bf16.mxu0 %vm1148_vm0, %v1912_v0  ;;  %1672 = vmatprep.mubr.msk.bf16.mxu1 %vm1148_vm0, %v1912_v0 }
  0xa3   : > { %1215 = vmatpush1.bf16.msra.mxu0 %v1859_v1  ;;  %1321 = vmatpush1.bf16.msra.mxu1 %v1862_v2 }
  0xa4   : > { %1216 = vmatprep.subr.bf16.mxu0 %v1867_v5  ;;  %1322 = vmatprep.subr.bf16.mxu1 %v1870_v6 }
  0xa7   : > { %1217 = vmatpush1.bf16.msra.mxu0 %v1865_v7  ;;  %1323 = vmatpush1.bf16.msra.mxu1 %v1868_v8 }
  0xa8   : > { %1218 = vmatprep.subr.bf16.mxu0 %v1873_v10  ;;  %1324 = vmatprep.subr.bf16.mxu1 %v1876_v11 }
  0xab   : > { %1219 = vmatpush1.bf16.msra.mxu0 %v1871_v12  ;;  %1325 = vmatpush1.bf16.msra.mxu1 %v1874_v13 }
  0xac   : > { %1220 = vmatprep.subr.bf16.mxu0 %v1879_v14  ;;  %1326 = vmatprep.subr.bf16.mxu1 %v1882_v15 }
  0xaf   : > { %1221 = vmatpush1.bf16.msra.mxu0 %v1877_v16  ;;  %1327 = vmatpush1.bf16.msra.mxu1 %v1880_v17 }
  0xb0   : > { %1222 = vmatprep.subr.bf16.mxu0 %v1885_v18  ;;  %1328 = vmatprep.subr.bf16.mxu1 %v1888_v19 }
  0xb3   : > { %1223 = vmatpush1.bf16.msra.mxu0 %v1883_v20  ;;  %1329 = vmatpush1.bf16.msra.mxu1 %v1886_v21 }
  0xb4   : > { %1224 = vmatprep.subr.bf16.mxu0 %v1891_v22  ;;  %1330 = vmatprep.subr.bf16.mxu1 %v1894_v23 }
  0xb7   : > { %1225 = vmatpush1.bf16.msra.mxu0 %v1889_v24  ;;  %1331 = vmatpush1.bf16.msra.mxu1 %v1892_v25 }
  0xb8   : > { %1226 = vmatprep.subr.bf16.mxu0 %v1900_v26  ;;  %1332 = vmatprep.subr.bf16.mxu1 %v1903_v27 }
  0xbb   : > { %1227 = vmatpush1.bf16.msra.mxu0 %v1898_v28  ;;  %1333 = vmatpush1.bf16.msra.mxu1 %v1901_v29 }
  0xbc   : > { %1228 = vmatprep.subr.bf16.mxu0 %v1906_v30  ;;  %1334 = vmatprep.subr.bf16.mxu1 %v1909_v31 }
  0xbf   : > { %1229 = vmatpush1.bf16.msra.mxu0 %v1904_v32  ;;  %1335 = vmatpush1.bf16.msra.mxu1 %v1907_v33 }
  0xc2   : > { %1241 = vmatmul.mubr.bf16.vlgmr.msra.gmra.mrb[0].mxu0 %v1910_v34  ;;  %1347 = vmatmul.mubr.bf16.vlgmr.msra.gmra.mrb[0].mxu1 %v1910_v34 }
  0xc3   : > { %1671 = vmatprep.mubr.msk.bf16.mxu0 %vm1148_vm0, %v1913_v35  ;;  %1673 = vmatprep.mubr.msk.bf16.mxu1 %vm1148_vm0, %v1913_v35 }
  0xca   : > { %1251 = vmatmul.mubr.bf16.gmra.mrb[4].mxu0 %v1915_v36  ;;  %1357 = vmatmul.mubr.bf16.gmra.mrb[4].mxu1 %v1915_v36 }
  0xf0   : > { %v553_v37 = vpop.permute.xlu0 %552 }
  0xf4   : > { %v558_v38 = vpop.permute.xlu0 %557  ;;  %v563_v62 = vpop.permute.xlu1 %562 }
  0xf8   : > { %v568_v23 = vpop.permute.xlu1 %567 }
 0x195   : > { %v1242_v39 = vpop.f32.mrb[0].mxu0  ;;  %v1348_v41 = vpop.f32.mrb[0].mxu1 }
 0x196   : > { %v1681_v42 = vadd.f32 %v1242_v39, %v553_v37  ;;  %v1689_v43 = vadd.f32 %v1348_v41, %v553_v37  ;;  %v1244_v44 = vpop.f32.mrb[1].mxu0  ;;  %v1350_v45 = vpop.f32.mrb[1].mxu1 }
 0x197   : > { %v1682_v46 = vadd.f32 %v1244_v44, %v553_v37  ;;  %v1690_v47 = vadd.f32 %v1350_v45, %v553_v37  ;;  %v1246_v48 = vpop.f32.mrb[2].mxu0  ;;  %v1352_v49 = vpop.f32.mrb[2].mxu1 }
 0x198   : > { %vm1368_vm1 = vcmp.ge.f32.partialorder %v1681_v42, 0.0  ;;  %v1385_v50 = vmul.f32 %v1681_v42, %v2386_v40  ;;  %vm1370_vm2 = vcmp.ge.f32.partialorder %v1689_v43, 0.0  ;;  %v1387_v51 = vmul.f32 %v1689_v43, %v2386_v40  ;;  %v1248_v52 = vpop.f32.mrb[3].mxu0  ;;  %v1354_v53 = vpop.f32.mrb[3].mxu1 }
 0x199   : > { %vm1369_vm3 = vcmp.ge.f32.partialorder %v1682_v46, 0.0  ;;  %v1386_v54 = vmul.f32 %v1682_v46, %v2386_v40  ;;  %vm1371_vm4 = vcmp.ge.f32.partialorder %v1690_v47, 0.0  ;;  %v1388_v55 = vmul.f32 %v1690_v47, %v2386_v40 }
 0x19a   : > { %v1401_v56 = vsel %vm1368_vm1, %v1681_v42, %v1385_v50  ;;  %v1403_v57 = vsel %vm1370_vm2, %v1689_v43, %v1387_v51  ;;  %v1683_v58 = vadd.f32 %v1246_v48, %v558_v38  ;;  %v1691_v59 = vadd.f32 %v1352_v49, %v558_v38 }
 0x19b   : > { %1417 = vst [vmem:[%s2392_s17] sm:$0xff] %v1401_v56  ;;  %1419 = vst [vmem:[%s2392_s17 + $0x10] sm:$0xff] %v1403_v57  ;;  %v1402_v60 = vsel %vm1369_vm3, %v1682_v46, %v1386_v54  ;;  %v1404_v61 = vsel %vm1371_vm4, %v1690_v47, %v1388_v55  ;;  %v1684_v63 = vadd.f32 %v1248_v52, %v558_v38 }
 0x19c   : > { %v1692_v0 = vadd.f32 %v1354_v53, %v558_v38  ;;  %1418 = vst [vmem:[%s2392_s17 + $0x8] sm:$0xff] %v1402_v60  ;;  %1420 = vst [vmem:[%s2392_s17 + $0x18] sm:$0xff] %v1404_v61  ;;  %vm1372_vm5 = vcmp.ge.f32.partialorder %v1683_v58, 0.0  ;;  %v1389_v1 = vmul.f32 %v1683_v58, %v2386_v40  ;;  %vm1374_vm6 = vcmp.ge.f32.partialorder %v1691_v59, 0.0 }
 0x19d   : > { %v1391_v2 = vmul.f32 %v1691_v59, %v2386_v40  ;;  %vm1373_vm7 = vcmp.ge.f32.partialorder %v1684_v63, 0.0  ;;  %v1390_v3 = vmul.f32 %v1684_v63, %v2386_v40  ;;  %v1252_v5 = vpop.f32.mrb[4].mxu0  ;;  %v1358_v6 = vpop.f32.mrb[4].mxu1 }
 0x19e   : > { %vm1375_vm8 = vcmp.ge.f32.partialorder %v1692_v0, 0.0  ;;  %v1392_v4 = vmul.f32 %v1692_v0, %v2386_v40  ;;  %v1405_v7 = vsel %vm1372_vm5, %v1683_v58, %v1389_v1  ;;  %v1685_v9 = vadd.f32 %v1252_v5, %v563_v62  ;;  %v1254_v11 = vpop.f32.mrb[5].mxu0  ;;  %v1360_v12 = vpop.f32.mrb[5].mxu1 }
 0x19f   : > { %v1407_v8 = vsel %vm1374_vm6, %v1691_v59, %v1391_v2  ;;  %v1693_v10 = vadd.f32 %v1358_v6, %v563_v62  ;;  %1421 = vst [vmem:[%s2392_s17 + $0x20] sm:$0xff] %v1405_v7  ;;  %v1406_v13 = vsel %vm1373_vm7, %v1684_v63, %v1390_v3  ;;  %v1686_v15 = vadd.f32 %v1254_v11, %v563_v62  ;;  %v1256_v17 = vpop.f32.mrb[6].mxu0  ;;  %v1362_v18 = vpop.f32.mrb[6].mxu1 }
 0x1a0   : > { %1423 = vst [vmem:[%s2392_s17 + $0x30] sm:$0xff] %v1407_v8  ;;  %v1408_v14 = vsel %vm1375_vm8, %v1692_v0, %v1392_v4  ;;  %v1694_v16 = vadd.f32 %v1360_v12, %v563_v62  ;;  %1422 = vst [vmem:[%s2392_s17 + $0x28] sm:$0xff] %v1406_v13  ;;  %vm1376_vm9 = vcmp.ge.f32.partialorder %v1685_v9, 0.0  ;;  %v1393_v19 = vmul.f32 %v1685_v9, %v2386_v40  ;;  %v1258_v21 = vpop.f32.mrb[7].mxu0  ;;  %v1364_v22 = vpop.f32.mrb[7].mxu1 }
 0x1a1   : > { %1424 = vst [vmem:[%s2392_s17 + $0x38] sm:$0xff] %v1408_v14  ;;  %vm1378_vm10 = vcmp.ge.f32.partialorder %v1693_v10, 0.0  ;;  %v1395_v20 = vmul.f32 %v1693_v10, %v2386_v40  ;;  %vm1377_vm11 = vcmp.ge.f32.partialorder %v1686_v15, 0.0  ;;  %v1394_v24 = vmul.f32 %v1686_v15, %v2386_v40 }
 0x1a2   : > { %vm1379_vm12 = vcmp.ge.f32.partialorder %v1694_v16, 0.0  ;;  %v1396_v25 = vmul.f32 %v1694_v16, %v2386_v40  ;;  %v1409_v26 = vsel %vm1376_vm9, %v1685_v9, %v1393_v19  ;;  %v1687_v28 = vadd.f32 %v1256_v17, %v568_v23  ;;  %v1459_v44 = vld [vmem:[%s2392_s17 + $0x10] sm:$0xff] (%p1999_p5) }
 0x1a3   : > { %v1411_v27 = vsel %vm1378_vm10, %v1693_v10, %v1395_v20  ;;  %v1695_v29 = vadd.f32 %v1362_v18, %v568_v23  ;;  %1425 = vst [vmem:[%s2392_s17 + $0x40] sm:$0xff] %v1409_v26  ;;  %v1410_v30 = vsel %vm1377_vm11, %v1686_v15, %v1394_v24  ;;  %v1688_v32 = vadd.f32 %v1258_v21, %v568_v23  ;;  %1439 = sbr.rel (!%p1999_p5) target bundleno = 434 (0x1b2), region = 63  ;;  %v1457_v43 = vld [vmem:[%s2392_s17 + $0x8] sm:$0xff] (%p1999_p5)  ;;  %v1461_v45 = vld [vmem:[%s2392_s17 + $0x18] sm:$0xff] (%p1999_p5) }
 0x1a4   : > { %1427 = vst [vmem:[%s2392_s17 + $0x50] sm:$0xff] %v1411_v27  ;;  %v1412_v31 = vsel %vm1379_vm12, %v1694_v16, %v1396_v25  ;;  %v1696_v33 = vadd.f32 %v1364_v22, %v568_v23  ;;  %1426 = vst [vmem:[%s2392_s17 + $0x48] sm:$0xff] %v1410_v30  ;;  %vm1380_vm13 = vcmp.ge.f32.partialorder %v1687_v28, 0.0  ;;  %v1397_v34 = vmul.f32 %v1687_v28, %v2386_v40 }
 0x1a5   : > { %1428 = vst [vmem:[%s2392_s17 + $0x58] sm:$0xff] %v1412_v31  ;;  %vm1382_vm14 = vcmp.ge.f32.partialorder %v1695_v29, 0.0  ;;  %v1399_v35 = vmul.f32 %v1695_v29, %v2386_v40  ;;  %vm1381_vm15 = vcmp.ge.f32.partialorder %v1688_v32, 0.0  ;;  %v1398_v36 = vmul.f32 %v1688_v32, %v2386_v40  ;;  %1458 = vst [vmem:[%s1442_s24 + $0x8] sm:$0xff] (%p1999_p5), %v1457_v43 }
 0x1a6   : > { %vm1383_vm0 = vcmp.ge.f32.partialorder %v1696_v33, 0.0  ;;  %v1400_v37 = vmul.f32 %v1696_v33, %v2386_v40  ;;  %v1413_v38 = vsel %vm1380_vm13, %v1687_v28, %v1397_v34  ;;  %v1455_v40 = vld [vmem:[%s2392_s17] sm:$0xff] (%p1999_p5)  ;;  %1460 = vst [vmem:[%s1442_s24 + $0x10] sm:$0xff] (%p1999_p5), %v1459_v44  ;;  %1462 = vst [vmem:[%s1442_s24 + $0x18] sm:$0xff] (%p1999_p5), %v1461_v45 }
 0x1a7   : > { %v1415_v39 = vsel %vm1382_vm14, %v1695_v29, %v1399_v35  ;;  %1429 = vst [vmem:[%s2392_s17 + $0x60] sm:$0xff] %v1413_v38  ;;  %v1414_v41 = vsel %vm1381_vm15, %v1688_v32, %v1398_v36  ;;  %v1463_v46 = vld [vmem:[%s2392_s17 + $0x20] sm:$0xff] (%p1999_p5)  ;;  %v1465_v47 = vld [vmem:[%s2392_s17 + $0x28] sm:$0xff] (%p1999_p5)  ;;  %1456 = vst [vmem:[%s1442_s24] sm:$0xff] (%p1999_p5), %v1455_v40 }
 0x1a8   : > { %1431 = vst [vmem:[%s2392_s17 + $0x70] sm:$0xff] %v1415_v39  ;;  %v1416_v42 = vsel %vm1383_vm0, %v1696_v33, %v1400_v37  ;;  %1430 = vst [vmem:[%s2392_s17 + $0x68] sm:$0xff] %v1414_v41  ;;  %v1467_v48 = vld [vmem:[%s2392_s17 + $0x30] sm:$0xff] (%p1999_p5)  ;;  %v1469_v49 = vld [vmem:[%s2392_s17 + $0x38] sm:$0xff] (%p1999_p5) }
 0x1a9   : > { %1432 = vst [vmem:[%s2392_s17 + $0x78] sm:$0xff] %v1416_v42  ;;  %1464 = vst [vmem:[%s1442_s24 + $0x80] sm:$0xff] (%p1999_p5), %v1463_v46 }
 0x1aa   : > { %1466 = vst [vmem:[%s1442_s24 + $0x88] sm:$0xff] %v1465_v47  ;;  %v1471_v50 = vld [vmem:[%s2392_s17 + $0x40] sm:$0xff]  ;;  %1468 = vst [vmem:[%s1442_s24 + $0x90] sm:$0xff] %v1467_v48 }
 0x1ab   : > { %1470 = vst [vmem:[%s1442_s24 + $0x98] sm:$0xff] %v1469_v49  ;;  %1472 = vst [vmem:[%s1442_s24 + $0x100] sm:$0xff] %v1471_v50  ;;  %v1473_v51 = vld [vmem:[%s2392_s17 + $0x48] sm:$0xff]  ;;  %v1475_v52 = vld [vmem:[%s2392_s17 + $0x50] sm:$0xff] }
 0x1ac   : > { %v1477_v53 = vld [vmem:[%s2392_s17 + $0x58] sm:$0xff]  ;;  %1474 = vst [vmem:[%s1442_s24 + $0x108] sm:$0xff] %v1473_v51  ;;  %1476 = vst [vmem:[%s1442_s24 + $0x110] sm:$0xff] %v1475_v52 }
 0x1ad   : > { %1478 = vst [vmem:[%s1442_s24 + $0x118] sm:$0xff] %v1477_v53 }
 0x1ae   : > { %v1479_v54 = vld [vmem:[%s2392_s17 + $0x60] sm:$0xff] }
 0x1af   : > { %v1481_v55 = vld [vmem:[%s2392_s17 + $0x68] sm:$0xff]  ;;  %v1483_v56 = vld [vmem:[%s2392_s17 + $0x70] sm:$0xff]  ;;  %1480 = vst [vmem:[%s1442_s24 + $0x180] sm:$0xff] %v1479_v54 }
 0x1b0   : > { %1482 = vst [vmem:[%s1442_s24 + $0x188] sm:$0xff] %v1481_v55  ;;  %1484 = vst [vmem:[%s1442_s24 + $0x190] sm:$0xff] %v1483_v56  ;;  %v1485_v57 = vld [vmem:[%s2392_s17 + $0x78] sm:$0xff] }
 0x1b1   : > { %1486 = vst [vmem:[%s1442_s24 + $0x198] sm:$0xff] %v1485_v57 }
 0x1b2 PF: > { %p12_p10 = scmp.ge.s32.totalorder %s1986_s20, 6   ;;  %s2461_s17 = smov %s1934_s18 }
 0x1b3   : > { %s2462_s18 = smov %s1997_s23  ;;  %s2463_s19 = smov %s1986_s20 }
 0x1b4   :  { %14 = sbr.rel (!%p12_p10) target bundleno = 4 (0x4), region = 117 }

// kernel: _lambda_.6
= control target key start
LH: loop header
LB: loop body
LE: loop exit
PB: predicated region body
PF: predicated region fallthrough
CT: control target
= control target key end

     0   :  { %s4231_s0 = inlined_call_operand.<no memory space> [shape: f32[1], index: 0, kind: input, shape index: {}]   ;;  %s4232_s1 = inlined_call_operand.vmem [shape: bf16[32,864], index: 1, kind: input, shape index: {}]   ;;  %s4233_s2 = inlined_call_operand.vmem [shape: bf16[864,1024], index: 2, kind: input, shape index: {}]   ;;  %s4234_s3 = inlined_call_operand.vmem [shape: f32[32,1], index: 3, kind: input, shape index: {}]   ;;  %s4235_s4 = inlined_call_operand.vmem [shape: f32[32,1024], index: 4, kind: output, shape index: {}]  }
   0x1   :  { %9 = sst [smem:[#allocation2]] %s4231_s0 }
   0x2   :  { %s3401_s17 = smov 0   ;;  %s3403_s18 = smov 0  }
   0x3   :  { %s3405_s19 = smov 0  }
   0x4 LB: > { %s2662_s0 = sadd.s32 4294967295, %s3370_s19   ;;  %s3418_s20 = sadd.s32 1, %s3370_s19   ;;  %s3370_s19 = sphi %s3405_s19, %s4239_s19   ;;  %s3366_s18 = sphi %s3403_s18, %s4238_s18   ;;  %s3362_s17 = sphi %s3401_s17, %s4237_s17  }
   0x5   : > { %s61_s21 = ssub.s32 %s3370_s19, %s3418_s20  ;;  %s64_s22 = sadd.s32 1, %s3366_s18 }
   0x6   : > { %p62_p0 = scmp.eq.s32.totalorder %s61_s21, 0  ;;  %p71_p1 = scmp.ne.s32.totalorder %s3366_s18, %s3362_s17 }
   0x7   : > { %p72_p2 = scmp.eq.s32.totalorder %s3370_s19, 0  ;;  %p122_p3 = scmp.eq.s32.totalorder %s2662_s0, 1 }
   0x8   : > { %s3429_s23 = scalar_select %p62_p0, %s3366_s18, %s64_s22  }
   0x9   : > { %p73_p4 = por %p72_p2, %p71_p1  ;;  %p3431_p5 = por %p122_p3, %p71_p1 }
   0xa   : > { %p2665_p6 = scmp.ge.s32.totalorder %s3370_s19, 2 }
   0xc   : > { %153 = sbr.rel (%p2665_p6) target bundleno = 131 (0x83), region = 28 }
  0x13   : > { %156 = sbr.rel (!%p73_p4) target bundleno = 131 (0x83), region = 32  ;;  %s158_s25 = sand.u32 (%p73_p4), 1, %s3366_s18  }
  0x14   : > { %s2909_s26 = sshll.u32 (%p73_p4), %s3370_s19, 4  ;;  %s2975_s27 = smul.u32 (%p73_p4), 1728, %s158_s25 }
  0x15   : > { %s3441_s30 = scalar_lea.vmem (%p73_p4), %s4233_s2, %s2909_s26 }
  0x16   : > { %v176_v0 = vld [vmem:[%s3441_s30] sm:$0xff] (%p73_p4)  ;;  %v178_v1 = vld [vmem:[%s3441_s30 + $0x8] sm:$0xff] (%p73_p4)  ;;  %s3449_s5 = scalar_lea.vmem (%p73_p4), [#allocation3], %s2975_s27 }
  0x17   : > { %v180_v2 = vld [vmem:[%s3441_s30 + $0x20] sm:$0xff] (%p73_p4)  ;;  %v182_v3 = vld [vmem:[%s3441_s30 + $0x28] sm:$0xff] (%p73_p4)  ;;  %177 = vst [vmem:[%s3449_s5] sm:$0xff] (%p73_p4), %v176_v0  ;;  %179 = vst [vmem:[%s3449_s5 + $0x8] sm:$0xff] (%p73_p4), %v178_v1 }
  0x18   : > { %v184_v4 = vld [vmem:[%s3441_s30 + $0x40] sm:$0xff] (%p73_p4)  ;;  %v186_v5 = vld [vmem:[%s3441_s30 + $0x48] sm:$0xff] (%p73_p4)  ;;  %181 = vst [vmem:[%s3449_s5 + $0x10] sm:$0xff] (%p73_p4), %v180_v2  ;;  %183 = vst [vmem:[%s3449_s5 + $0x18] sm:$0xff] (%p73_p4), %v182_v3 }
  0x19   : > { %185 = vst [vmem:[%s3449_s5 + $0x20] sm:$0xff] (%p73_p4), %v184_v4  ;;  %187 = vst [vmem:[%s3449_s5 + $0x28] sm:$0xff] (%p73_p4), %v186_v5  ;;  %v188_v6 = vld [vmem:[%s3441_s30 + $0x60] sm:$0xff] (%p73_p4)  ;;  %v190_v7 = vld [vmem:[%s3441_s30 + $0x68] sm:$0xff] (%p73_p4) }
  0x1a   : > { %v192_v8 = vld [vmem:[%s3441_s30 + $0x80] sm:$0xff]  ;;  %189 = vst [vmem:[%s3449_s5 + $0x30] sm:$0xff] %v188_v6  ;;  %191 = vst [vmem:[%s3449_s5 + $0x38] sm:$0xff] %v190_v7  ;;  %v194_v9 = vld [vmem:[%s3441_s30 + $0x88] sm:$0xff] }
  0x1b   : > { %193 = vst [vmem:[%s3449_s5 + $0x40] sm:$0xff] %v192_v8  ;;  %v196_v10 = vld [vmem:[%s3441_s30 + $0xa0] sm:$0xff]  ;;  %v198_v11 = vld [vmem:[%s3441_s30 + $0xa8] sm:$0xff]  ;;  %195 = vst [vmem:[%s3449_s5 + $0x48] sm:$0xff] %v194_v9 }
  0x1c   : > { %197 = vst [vmem:[%s3449_s5 + $0x50] sm:$0xff] %v196_v10  ;;  %199 = vst [vmem:[%s3449_s5 + $0x58] sm:$0xff] %v198_v11  ;;  %v200_v12 = vld [vmem:[%s3441_s30 + $0xc0] sm:$0xff]  ;;  %v202_v13 = vld [vmem:[%s3441_s30 + $0xc8] sm:$0xff] }
  0x1d   : > { %v204_v14 = vld [vmem:[%s3441_s30 + $0xe0] sm:$0xff]  ;;  %201 = vst [vmem:[%s3449_s5 + $0x60] sm:$0xff] %v200_v12  ;;  %203 = vst [vmem:[%s3449_s5 + $0x68] sm:$0xff] %v202_v13  ;;  %v206_v15 = vld [vmem:[%s3441_s30 + $0xe8] sm:$0xff] }
  0x1e   : > { %205 = vst [vmem:[%s3449_s5 + $0x70] sm:$0xff] %v204_v14  ;;  %v208_v16 = vld [vmem:[%s3441_s30 + $0x100] sm:$0xff]  ;;  %v210_v17 = vld [vmem:[%s3441_s30 + $0x108] sm:$0xff]  ;;  %207 = vst [vmem:[%s3449_s5 + $0x78] sm:$0xff] %v206_v15 }
  0x1f   : > { %209 = vst [vmem:[%s3449_s5 + $0x80] sm:$0xff] %v208_v16  ;;  %211 = vst [vmem:[%s3449_s5 + $0x88] sm:$0xff] %v210_v17  ;;  %v212_v18 = vld [vmem:[%s3441_s30 + $0x120] sm:$0xff]  ;;  %v214_v19 = vld [vmem:[%s3441_s30 + $0x128] sm:$0xff] }
  0x20   : > { %v216_v20 = vld [vmem:[%s3441_s30 + $0x140] sm:$0xff]  ;;  %213 = vst [vmem:[%s3449_s5 + $0x90] sm:$0xff] %v212_v18  ;;  %215 = vst [vmem:[%s3449_s5 + $0x98] sm:$0xff] %v214_v19  ;;  %v218_v21 = vld [vmem:[%s3441_s30 + $0x148] sm:$0xff] }
  0x21   : > { %217 = vst [vmem:[%s3449_s5 + $0xa0] sm:$0xff] %v216_v20  ;;  %v220_v22 = vld [vmem:[%s3441_s30 + $0x160] sm:$0xff]  ;;  %v222_v23 = vld [vmem:[%s3441_s30 + $0x168] sm:$0xff]  ;;  %219 = vst [vmem:[%s3449_s5 + $0xa8] sm:$0xff] %v218_v21 }
  0x22   : > { %221 = vst [vmem:[%s3449_s5 + $0xb0] sm:$0xff] %v220_v22  ;;  %223 = vst [vmem:[%s3449_s5 + $0xb8] sm:$0xff] %v222_v23  ;;  %v224_v24 = vld [vmem:[%s3441_s30 + $0x180] sm:$0xff]  ;;  %v226_v25 = vld [vmem:[%s3441_s30 + $0x188] sm:$0xff] }
  0x23   : > { %v228_v26 = vld [vmem:[%s3441_s30 + $0x1a0] sm:$0xff]  ;;  %225 = vst [vmem:[%s3449_s5 + $0xc0] sm:$0xff] %v224_v24  ;;  %227 = vst [vmem:[%s3449_s5 + $0xc8] sm:$0xff] %v226_v25  ;;  %v230_v27 = vld [vmem:[%s3441_s30 + $0x1a8] sm:$0xff] }
  0x24   : > { %229 = vst [vmem:[%s3449_s5 + $0xd0] sm:$0xff] %v228_v26  ;;  %v232_v28 = vld [vmem:[%s3441_s30 + $0x1c0] sm:$0xff]  ;;  %v234_v29 = vld [vmem:[%s3441_s30 + $0x1c8] sm:$0xff]  ;;  %231 = vst [vmem:[%s3449_s5 + $0xd8] sm:$0xff] %v230_v27 }
  0x25   : > { %233 = vst [vmem:[%s3449_s5 + $0xe0] sm:$0xff] %v232_v28  ;;  %235 = vst [vmem:[%s3449_s5 + $0xe8] sm:$0xff] %v234_v29  ;;  %v236_v30 = vld [vmem:[%s3441_s30 + $0x1e0] sm:$0xff]  ;;  %v238_v31 = vld [vmem:[%s3441_s30 + $0x1e8] sm:$0xff] }
  0x26   : > { %v240_v32 = vld [vmem:[%s3441_s30 + $0x200] sm:$0xff]  ;;  %237 = vst [vmem:[%s3449_s5 + $0xf0] sm:$0xff] %v236_v30  ;;  %239 = vst [vmem:[%s3449_s5 + $0xf8] sm:$0xff] %v238_v31  ;;  %v242_v33 = vld [vmem:[%s3441_s30 + $0x208] sm:$0xff] }
  0x27   : > { %241 = vst [vmem:[%s3449_s5 + $0x100] sm:$0xff] %v240_v32  ;;  %v244_v34 = vld [vmem:[%s3441_s30 + $0x220] sm:$0xff]  ;;  %v246_v35 = vld [vmem:[%s3441_s30 + $0x228] sm:$0xff]  ;;  %243 = vst [vmem:[%s3449_s5 + $0x108] sm:$0xff] %v242_v33 }
  0x28   : > { %245 = vst [vmem:[%s3449_s5 + $0x110] sm:$0xff] %v244_v34  ;;  %247 = vst [vmem:[%s3449_s5 + $0x118] sm:$0xff] %v246_v35  ;;  %v248_v36 = vld [vmem:[%s3441_s30 + $0x240] sm:$0xff]  ;;  %v250_v37 = vld [vmem:[%s3441_s30 + $0x248] sm:$0xff] }
  0x29   : > { %v252_v38 = vld [vmem:[%s3441_s30 + $0x260] sm:$0xff]  ;;  %249 = vst [vmem:[%s3449_s5 + $0x120] sm:$0xff] %v248_v36  ;;  %251 = vst [vmem:[%s3449_s5 + $0x128] sm:$0xff] %v250_v37  ;;  %v254_v39 = vld [vmem:[%s3441_s30 + $0x268] sm:$0xff] }
  0x2a   : > { %253 = vst [vmem:[%s3449_s5 + $0x130] sm:$0xff] %v252_v38  ;;  %v256_v40 = vld [vmem:[%s3441_s30 + $0x280] sm:$0xff]  ;;  %v258_v41 = vld [vmem:[%s3441_s30 + $0x288] sm:$0xff]  ;;  %255 = vst [vmem:[%s3449_s5 + $0x138] sm:$0xff] %v254_v39 }
  0x2b   : > { %257 = vst [vmem:[%s3449_s5 + $0x140] sm:$0xff] %v256_v40  ;;  %259 = vst [vmem:[%s3449_s5 + $0x148] sm:$0xff] %v258_v41  ;;  %v260_v42 = vld [vmem:[%s3441_s30 + $0x2a0] sm:$0xff]  ;;  %v262_v43 = vld [vmem:[%s3441_s30 + $0x2a8] sm:$0xff] }
  0x2c   : > { %v264_v44 = vld [vmem:[%s3441_s30 + $0x2c0] sm:$0xff]  ;;  %261 = vst [vmem:[%s3449_s5 + $0x150] sm:$0xff] %v260_v42  ;;  %263 = vst [vmem:[%s3449_s5 + $0x158] sm:$0xff] %v262_v43  ;;  %v266_v45 = vld [vmem:[%s3441_s30 + $0x2c8] sm:$0xff] }
  0x2d   : > { %265 = vst [vmem:[%s3449_s5 + $0x160] sm:$0xff] %v264_v44  ;;  %v268_v46 = vld [vmem:[%s3441_s30 + $0x2e0] sm:$0xff]  ;;  %v270_v47 = vld [vmem:[%s3441_s30 + $0x2e8] sm:$0xff]  ;;  %267 = vst [vmem:[%s3449_s5 + $0x168] sm:$0xff] %v266_v45 }
  0x2e   : > { %269 = vst [vmem:[%s3449_s5 + $0x170] sm:$0xff] %v268_v46  ;;  %271 = vst [vmem:[%s3449_s5 + $0x178] sm:$0xff] %v270_v47  ;;  %v272_v48 = vld [vmem:[%s3441_s30 + $0x300] sm:$0xff]  ;;  %v274_v49 = vld [vmem:[%s3441_s30 + $0x308] sm:$0xff] }
  0x2f   : > { %v276_v50 = vld [vmem:[%s3441_s30 + $0x320] sm:$0xff]  ;;  %273 = vst [vmem:[%s3449_s5 + $0x180] sm:$0xff] %v272_v48  ;;  %275 = vst [vmem:[%s3449_s5 + $0x188] sm:$0xff] %v274_v49  ;;  %v278_v51 = vld [vmem:[%s3441_s30 + $0x328] sm:$0xff] }
  0x30   : > { %277 = vst [vmem:[%s3449_s5 + $0x190] sm:$0xff] %v276_v50  ;;  %v280_v52 = vld [vmem:[%s3441_s30 + $0x340] sm:$0xff]  ;;  %v282_v53 = vld [vmem:[%s3441_s30 + $0x348] sm:$0xff]  ;;  %279 = vst [vmem:[%s3449_s5 + $0x198] sm:$0xff] %v278_v51 }
  0x31   : > { %281 = vst [vmem:[%s3449_s5 + $0x1a0] sm:$0xff] %v280_v52  ;;  %283 = vst [vmem:[%s3449_s5 + $0x1a8] sm:$0xff] %v282_v53  ;;  %v284_v54 = vld [vmem:[%s3441_s30 + $0x360] sm:$0xff]  ;;  %v286_v55 = vld [vmem:[%s3441_s30 + $0x368] sm:$0xff] }
  0x32   : > { %v288_v56 = vld [vmem:[%s3441_s30 + $0x380] sm:$0xff]  ;;  %285 = vst [vmem:[%s3449_s5 + $0x1b0] sm:$0xff] %v284_v54  ;;  %287 = vst [vmem:[%s3449_s5 + $0x1b8] sm:$0xff] %v286_v55  ;;  %v290_v57 = vld [vmem:[%s3441_s30 + $0x388] sm:$0xff] }
  0x33   : > { %289 = vst [vmem:[%s3449_s5 + $0x1c0] sm:$0xff] %v288_v56  ;;  %v292_v58 = vld [vmem:[%s3441_s30 + $0x3a0] sm:$0xff]  ;;  %v294_v59 = vld [vmem:[%s3441_s30 + $0x3a8] sm:$0xff]  ;;  %291 = vst [vmem:[%s3449_s5 + $0x1c8] sm:$0xff] %v290_v57 }
  0x34   : > { %293 = vst [vmem:[%s3449_s5 + $0x1d0] sm:$0xff] %v292_v58  ;;  %295 = vst [vmem:[%s3449_s5 + $0x1d8] sm:$0xff] %v294_v59  ;;  %v296_v60 = vld [vmem:[%s3441_s30 + $0x3c0] sm:$0xff]  ;;  %v298_v61 = vld [vmem:[%s3441_s30 + $0x3c8] sm:$0xff] }
  0x35   : > { %v300_v62 = vld [vmem:[%s3441_s30 + $0x3e0] sm:$0xff]  ;;  %297 = vst [vmem:[%s3449_s5 + $0x1e0] sm:$0xff] %v296_v60  ;;  %299 = vst [vmem:[%s3449_s5 + $0x1e8] sm:$0xff] %v298_v61  ;;  %v302_v63 = vld [vmem:[%s3441_s30 + $0x3e8] sm:$0xff] }
  0x36   : > { %301 = vst [vmem:[%s3449_s5 + $0x1f0] sm:$0xff] %v300_v62  ;;  %v304_v0 = vld [vmem:[%s3441_s30 + $0x400] sm:$0xff]  ;;  %v306_v1 = vld [vmem:[%s3441_s30 + $0x408] sm:$0xff]  ;;  %303 = vst [vmem:[%s3449_s5 + $0x1f8] sm:$0xff] %v302_v63 }
  0x37   : > { %305 = vst [vmem:[%s3449_s5 + $0x200] sm:$0xff] %v304_v0  ;;  %307 = vst [vmem:[%s3449_s5 + $0x208] sm:$0xff] %v306_v1  ;;  %v308_v2 = vld [vmem:[%s3441_s30 + $0x420] sm:$0xff]  ;;  %v310_v3 = vld [vmem:[%s3441_s30 + $0x428] sm:$0xff] }
  0x38   : > { %v312_v4 = vld [vmem:[%s3441_s30 + $0x440] sm:$0xff]  ;;  %309 = vst [vmem:[%s3449_s5 + $0x210] sm:$0xff] %v308_v2  ;;  %311 = vst [vmem:[%s3449_s5 + $0x218] sm:$0xff] %v310_v3  ;;  %v314_v5 = vld [vmem:[%s3441_s30 + $0x448] sm:$0xff] }
  0x39   : > { %313 = vst [vmem:[%s3449_s5 + $0x220] sm:$0xff] %v312_v4  ;;  %v316_v6 = vld [vmem:[%s3441_s30 + $0x460] sm:$0xff]  ;;  %v318_v7 = vld [vmem:[%s3441_s30 + $0x468] sm:$0xff]  ;;  %315 = vst [vmem:[%s3449_s5 + $0x228] sm:$0xff] %v314_v5 }
  0x3a   : > { %317 = vst [vmem:[%s3449_s5 + $0x230] sm:$0xff] %v316_v6  ;;  %319 = vst [vmem:[%s3449_s5 + $0x238] sm:$0xff] %v318_v7  ;;  %v320_v8 = vld [vmem:[%s3441_s30 + $0x480] sm:$0xff]  ;;  %v322_v9 = vld [vmem:[%s3441_s30 + $0x488] sm:$0xff] }
  0x3b   : > { %v324_v10 = vld [vmem:[%s3441_s30 + $0x4a0] sm:$0xff]  ;;  %321 = vst [vmem:[%s3449_s5 + $0x240] sm:$0xff] %v320_v8  ;;  %323 = vst [vmem:[%s3449_s5 + $0x248] sm:$0xff] %v322_v9  ;;  %v326_v11 = vld [vmem:[%s3441_s30 + $0x4a8] sm:$0xff] }
  0x3c   : > { %325 = vst [vmem:[%s3449_s5 + $0x250] sm:$0xff] %v324_v10  ;;  %v328_v12 = vld [vmem:[%s3441_s30 + $0x4c0] sm:$0xff]  ;;  %v330_v13 = vld [vmem:[%s3441_s30 + $0x4c8] sm:$0xff]  ;;  %327 = vst [vmem:[%s3449_s5 + $0x258] sm:$0xff] %v326_v11 }
  0x3d   : > { %329 = vst [vmem:[%s3449_s5 + $0x260] sm:$0xff] %v328_v12  ;;  %331 = vst [vmem:[%s3449_s5 + $0x268] sm:$0xff] %v330_v13  ;;  %v332_v14 = vld [vmem:[%s3441_s30 + $0x4e0] sm:$0xff]  ;;  %v334_v15 = vld [vmem:[%s3441_s30 + $0x4e8] sm:$0xff] }
  0x3e   : > { %v336_v16 = vld [vmem:[%s3441_s30 + $0x500] sm:$0xff]  ;;  %333 = vst [vmem:[%s3449_s5 + $0x270] sm:$0xff] %v332_v14  ;;  %335 = vst [vmem:[%s3449_s5 + $0x278] sm:$0xff] %v334_v15  ;;  %v338_v17 = vld [vmem:[%s3441_s30 + $0x508] sm:$0xff] }
  0x3f   : > { %337 = vst [vmem:[%s3449_s5 + $0x280] sm:$0xff] %v336_v16  ;;  %v340_v18 = vld [vmem:[%s3441_s30 + $0x520] sm:$0xff]  ;;  %v342_v19 = vld [vmem:[%s3441_s30 + $0x528] sm:$0xff]  ;;  %339 = vst [vmem:[%s3449_s5 + $0x288] sm:$0xff] %v338_v17 }
  0x40   : > { %341 = vst [vmem:[%s3449_s5 + $0x290] sm:$0xff] %v340_v18  ;;  %343 = vst [vmem:[%s3449_s5 + $0x298] sm:$0xff] %v342_v19  ;;  %v344_v20 = vld [vmem:[%s3441_s30 + $0x540] sm:$0xff]  ;;  %v346_v21 = vld [vmem:[%s3441_s30 + $0x548] sm:$0xff] }
  0x41   : > { %v348_v22 = vld [vmem:[%s3441_s30 + $0x560] sm:$0xff]  ;;  %345 = vst [vmem:[%s3449_s5 + $0x2a0] sm:$0xff] %v344_v20  ;;  %347 = vst [vmem:[%s3449_s5 + $0x2a8] sm:$0xff] %v346_v21  ;;  %v350_v23 = vld [vmem:[%s3441_s30 + $0x568] sm:$0xff] }
  0x42   : > { %349 = vst [vmem:[%s3449_s5 + $0x2b0] sm:$0xff] %v348_v22  ;;  %v352_v24 = vld [vmem:[%s3441_s30 + $0x580] sm:$0xff]  ;;  %v354_v25 = vld [vmem:[%s3441_s30 + $0x588] sm:$0xff]  ;;  %351 = vst [vmem:[%s3449_s5 + $0x2b8] sm:$0xff] %v350_v23 }
  0x43   : > { %353 = vst [vmem:[%s3449_s5 + $0x2c0] sm:$0xff] %v352_v24  ;;  %355 = vst [vmem:[%s3449_s5 + $0x2c8] sm:$0xff] %v354_v25  ;;  %v356_v26 = vld [vmem:[%s3441_s30 + $0x5a0] sm:$0xff]  ;;  %v358_v27 = vld [vmem:[%s3441_s30 + $0x5a8] sm:$0xff] }
  0x44   : > { %v360_v28 = vld [vmem:[%s3441_s30 + $0x5c0] sm:$0xff]  ;;  %357 = vst [vmem:[%s3449_s5 + $0x2d0] sm:$0xff] %v356_v26  ;;  %359 = vst [vmem:[%s3449_s5 + $0x2d8] sm:$0xff] %v358_v27  ;;  %v362_v29 = vld [vmem:[%s3441_s30 + $0x5c8] sm:$0xff] }
  0x45   : > { %361 = vst [vmem:[%s3449_s5 + $0x2e0] sm:$0xff] %v360_v28  ;;  %v364_v30 = vld [vmem:[%s3441_s30 + $0x5e0] sm:$0xff]  ;;  %v366_v31 = vld [vmem:[%s3441_s30 + $0x5e8] sm:$0xff]  ;;  %363 = vst [vmem:[%s3449_s5 + $0x2e8] sm:$0xff] %v362_v29 }
  0x46   : > { %365 = vst [vmem:[%s3449_s5 + $0x2f0] sm:$0xff] %v364_v30  ;;  %367 = vst [vmem:[%s3449_s5 + $0x2f8] sm:$0xff] %v366_v31  ;;  %v368_v32 = vld [vmem:[%s3441_s30 + $0x600] sm:$0xff]  ;;  %v370_v33 = vld [vmem:[%s3441_s30 + $0x608] sm:$0xff] }
  0x47   : > { %v372_v34 = vld [vmem:[%s3441_s30 + $0x620] sm:$0xff]  ;;  %369 = vst [vmem:[%s3449_s5 + $0x300] sm:$0xff] %v368_v32  ;;  %371 = vst [vmem:[%s3449_s5 + $0x308] sm:$0xff] %v370_v33  ;;  %v374_v35 = vld [vmem:[%s3441_s30 + $0x628] sm:$0xff] }
  0x48   : > { %373 = vst [vmem:[%s3449_s5 + $0x310] sm:$0xff] %v372_v34  ;;  %v376_v36 = vld [vmem:[%s3441_s30 + $0x640] sm:$0xff]  ;;  %v378_v37 = vld [vmem:[%s3441_s30 + $0x648] sm:$0xff]  ;;  %375 = vst [vmem:[%s3449_s5 + $0x318] sm:$0xff] %v374_v35 }
  0x49   : > { %377 = vst [vmem:[%s3449_s5 + $0x320] sm:$0xff] %v376_v36  ;;  %379 = vst [vmem:[%s3449_s5 + $0x328] sm:$0xff] %v378_v37  ;;  %v380_v38 = vld [vmem:[%s3441_s30 + $0x660] sm:$0xff]  ;;  %v382_v39 = vld [vmem:[%s3441_s30 + $0x668] sm:$0xff] }
  0x4a   : > { %v384_v40 = vld [vmem:[%s3441_s30 + $0x680] sm:$0xff]  ;;  %381 = vst [vmem:[%s3449_s5 + $0x330] sm:$0xff] %v380_v38  ;;  %383 = vst [vmem:[%s3449_s5 + $0x338] sm:$0xff] %v382_v39  ;;  %v386_v41 = vld [vmem:[%s3441_s30 + $0x688] sm:$0xff] }
  0x4b   : > { %385 = vst [vmem:[%s3449_s5 + $0x340] sm:$0xff] %v384_v40  ;;  %v388_v42 = vld [vmem:[%s3441_s30 + $0x6a0] sm:$0xff]  ;;  %v390_v43 = vld [vmem:[%s3441_s30 + $0x6a8] sm:$0xff]  ;;  %387 = vst [vmem:[%s3449_s5 + $0x348] sm:$0xff] %v386_v41 }
  0x4c   : > { %389 = vst [vmem:[%s3449_s5 + $0x350] sm:$0xff] %v388_v42  ;;  %391 = vst [vmem:[%s3449_s5 + $0x358] sm:$0xff] %v390_v43  ;;  %v392_v44 = vld [vmem:[%s3441_s30 + $0x6c0] sm:$0xff]  ;;  %v394_v45 = vld [vmem:[%s3441_s30 + $0x6c8] sm:$0xff] }
  0x4d   : > { %v396_v46 = vld [vmem:[%s3441_s30 + $0x6e0] sm:$0xff]  ;;  %393 = vst [vmem:[%s3449_s5 + $0x360] sm:$0xff] %v392_v44  ;;  %395 = vst [vmem:[%s3449_s5 + $0x368] sm:$0xff] %v394_v45  ;;  %v398_v47 = vld [vmem:[%s3441_s30 + $0x6e8] sm:$0xff] }
  0x4e   : > { %397 = vst [vmem:[%s3449_s5 + $0x370] sm:$0xff] %v396_v46  ;;  %v400_v48 = vld [vmem:[%s3441_s30 + $0x700] sm:$0xff]  ;;  %v402_v49 = vld [vmem:[%s3441_s30 + $0x708] sm:$0xff]  ;;  %399 = vst [vmem:[%s3449_s5 + $0x378] sm:$0xff] %v398_v47 }
  0x4f   : > { %401 = vst [vmem:[%s3449_s5 + $0x380] sm:$0xff] %v400_v48  ;;  %403 = vst [vmem:[%s3449_s5 + $0x388] sm:$0xff] %v402_v49  ;;  %v404_v50 = vld [vmem:[%s3441_s30 + $0x720] sm:$0xff]  ;;  %v406_v51 = vld [vmem:[%s3441_s30 + $0x728] sm:$0xff] }
  0x50   : > { %v408_v52 = vld [vmem:[%s3441_s30 + $0x740] sm:$0xff]  ;;  %405 = vst [vmem:[%s3449_s5 + $0x390] sm:$0xff] %v404_v50  ;;  %407 = vst [vmem:[%s3449_s5 + $0x398] sm:$0xff] %v406_v51  ;;  %v410_v53 = vld [vmem:[%s3441_s30 + $0x748] sm:$0xff] }
  0x51   : > { %409 = vst [vmem:[%s3449_s5 + $0x3a0] sm:$0xff] %v408_v52  ;;  %v412_v54 = vld [vmem:[%s3441_s30 + $0x760] sm:$0xff]  ;;  %v414_v55 = vld [vmem:[%s3441_s30 + $0x768] sm:$0xff]  ;;  %411 = vst [vmem:[%s3449_s5 + $0x3a8] sm:$0xff] %v410_v53 }
  0x52   : > { %413 = vst [vmem:[%s3449_s5 + $0x3b0] sm:$0xff] %v412_v54  ;;  %415 = vst [vmem:[%s3449_s5 + $0x3b8] sm:$0xff] %v414_v55  ;;  %v416_v56 = vld [vmem:[%s3441_s30 + $0x780] sm:$0xff]  ;;  %v418_v57 = vld [vmem:[%s3441_s30 + $0x788] sm:$0xff] }
  0x53   : > { %v420_v58 = vld [vmem:[%s3441_s30 + $0x7a0] sm:$0xff]  ;;  %417 = vst [vmem:[%s3449_s5 + $0x3c0] sm:$0xff] %v416_v56  ;;  %419 = vst [vmem:[%s3449_s5 + $0x3c8] sm:$0xff] %v418_v57  ;;  %v422_v59 = vld [vmem:[%s3441_s30 + $0x7a8] sm:$0xff] }
  0x54   : > { %421 = vst [vmem:[%s3449_s5 + $0x3d0] sm:$0xff] %v420_v58  ;;  %v424_v60 = vld [vmem:[%s3441_s30 + $0x7c0] sm:$0xff]  ;;  %v426_v61 = vld [vmem:[%s3441_s30 + $0x7c8] sm:$0xff]  ;;  %423 = vst [vmem:[%s3449_s5 + $0x3d8] sm:$0xff] %v422_v59 }
  0x55   : > { %425 = vst [vmem:[%s3449_s5 + $0x3e0] sm:$0xff] %v424_v60  ;;  %427 = vst [vmem:[%s3449_s5 + $0x3e8] sm:$0xff] %v426_v61  ;;  %v428_v62 = vld [vmem:[%s3441_s30 + $0x7e0] sm:$0xff]  ;;  %v430_v63 = vld [vmem:[%s3441_s30 + $0x7e8] sm:$0xff] }
  0x56   : > { %v432_v0 = vld [vmem:[%s3441_s30 + $0x800] sm:$0xff]  ;;  %429 = vst [vmem:[%s3449_s5 + $0x3f0] sm:$0xff] %v428_v62  ;;  %431 = vst [vmem:[%s3449_s5 + $0x3f8] sm:$0xff] %v430_v63  ;;  %v434_v1 = vld [vmem:[%s3441_s30 + $0x808] sm:$0xff] }
  0x57   : > { %433 = vst [vmem:[%s3449_s5 + $0x400] sm:$0xff] %v432_v0  ;;  %v436_v2 = vld [vmem:[%s3441_s30 + $0x820] sm:$0xff]  ;;  %v438_v3 = vld [vmem:[%s3441_s30 + $0x828] sm:$0xff]  ;;  %435 = vst [vmem:[%s3449_s5 + $0x408] sm:$0xff] %v434_v1 }
  0x58   : > { %437 = vst [vmem:[%s3449_s5 + $0x410] sm:$0xff] %v436_v2  ;;  %439 = vst [vmem:[%s3449_s5 + $0x418] sm:$0xff] %v438_v3  ;;  %v440_v4 = vld [vmem:[%s3441_s30 + $0x840] sm:$0xff]  ;;  %v442_v5 = vld [vmem:[%s3441_s30 + $0x848] sm:$0xff] }
  0x59   : > { %v444_v6 = vld [vmem:[%s3441_s30 + $0x860] sm:$0xff]  ;;  %441 = vst [vmem:[%s3449_s5 + $0x420] sm:$0xff] %v440_v4  ;;  %443 = vst [vmem:[%s3449_s5 + $0x428] sm:$0xff] %v442_v5  ;;  %v446_v7 = vld [vmem:[%s3441_s30 + $0x868] sm:$0xff] }
  0x5a   : > { %445 = vst [vmem:[%s3449_s5 + $0x430] sm:$0xff] %v444_v6  ;;  %v448_v8 = vld [vmem:[%s3441_s30 + $0x880] sm:$0xff]  ;;  %v450_v9 = vld [vmem:[%s3441_s30 + $0x888] sm:$0xff]  ;;  %447 = vst [vmem:[%s3449_s5 + $0x438] sm:$0xff] %v446_v7 }
  0x5b   : > { %449 = vst [vmem:[%s3449_s5 + $0x440] sm:$0xff] %v448_v8  ;;  %451 = vst [vmem:[%s3449_s5 + $0x448] sm:$0xff] %v450_v9  ;;  %v452_v10 = vld [vmem:[%s3441_s30 + $0x8a0] sm:$0xff]  ;;  %v454_v11 = vld [vmem:[%s3441_s30 + $0x8a8] sm:$0xff] }
  0x5c   : > { %v456_v12 = vld [vmem:[%s3441_s30 + $0x8c0] sm:$0xff]  ;;  %453 = vst [vmem:[%s3449_s5 + $0x450] sm:$0xff] %v452_v10  ;;  %455 = vst [vmem:[%s3449_s5 + $0x458] sm:$0xff] %v454_v11  ;;  %v458_v13 = vld [vmem:[%s3441_s30 + $0x8c8] sm:$0xff] }
  0x5d   : > { %457 = vst [vmem:[%s3449_s5 + $0x460] sm:$0xff] %v456_v12  ;;  %v460_v14 = vld [vmem:[%s3441_s30 + $0x8e0] sm:$0xff]  ;;  %v462_v15 = vld [vmem:[%s3441_s30 + $0x8e8] sm:$0xff]  ;;  %459 = vst [vmem:[%s3449_s5 + $0x468] sm:$0xff] %v458_v13 }
  0x5e   : > { %461 = vst [vmem:[%s3449_s5 + $0x470] sm:$0xff] %v460_v14  ;;  %463 = vst [vmem:[%s3449_s5 + $0x478] sm:$0xff] %v462_v15  ;;  %v464_v16 = vld [vmem:[%s3441_s30 + $0x900] sm:$0xff]  ;;  %v466_v17 = vld [vmem:[%s3441_s30 + $0x908] sm:$0xff] }
  0x5f   : > { %v468_v18 = vld [vmem:[%s3441_s30 + $0x920] sm:$0xff]  ;;  %465 = vst [vmem:[%s3449_s5 + $0x480] sm:$0xff] %v464_v16  ;;  %467 = vst [vmem:[%s3449_s5 + $0x488] sm:$0xff] %v466_v17  ;;  %v470_v19 = vld [vmem:[%s3441_s30 + $0x928] sm:$0xff] }
  0x60   : > { %469 = vst [vmem:[%s3449_s5 + $0x490] sm:$0xff] %v468_v18  ;;  %v472_v20 = vld [vmem:[%s3441_s30 + $0x940] sm:$0xff]  ;;  %v474_v21 = vld [vmem:[%s3441_s30 + $0x948] sm:$0xff]  ;;  %471 = vst [vmem:[%s3449_s5 + $0x498] sm:$0xff] %v470_v19 }
  0x61   : > { %473 = vst [vmem:[%s3449_s5 + $0x4a0] sm:$0xff] %v472_v20  ;;  %475 = vst [vmem:[%s3449_s5 + $0x4a8] sm:$0xff] %v474_v21  ;;  %v476_v22 = vld [vmem:[%s3441_s30 + $0x960] sm:$0xff]  ;;  %v478_v23 = vld [vmem:[%s3441_s30 + $0x968] sm:$0xff] }
  0x62   : > { %v480_v24 = vld [vmem:[%s3441_s30 + $0x980] sm:$0xff]  ;;  %477 = vst [vmem:[%s3449_s5 + $0x4b0] sm:$0xff] %v476_v22  ;;  %479 = vst [vmem:[%s3449_s5 + $0x4b8] sm:$0xff] %v478_v23  ;;  %v482_v25 = vld [vmem:[%s3441_s30 + $0x988] sm:$0xff] }
  0x63   : > { %481 = vst [vmem:[%s3449_s5 + $0x4c0] sm:$0xff] %v480_v24  ;;  %v484_v26 = vld [vmem:[%s3441_s30 + $0x9a0] sm:$0xff]  ;;  %v486_v27 = vld [vmem:[%s3441_s30 + $0x9a8] sm:$0xff]  ;;  %483 = vst [vmem:[%s3449_s5 + $0x4c8] sm:$0xff] %v482_v25 }
  0x64   : > { %485 = vst [vmem:[%s3449_s5 + $0x4d0] sm:$0xff] %v484_v26  ;;  %487 = vst [vmem:[%s3449_s5 + $0x4d8] sm:$0xff] %v486_v27  ;;  %v488_v28 = vld [vmem:[%s3441_s30 + $0x9c0] sm:$0xff]  ;;  %v490_v29 = vld [vmem:[%s3441_s30 + $0x9c8] sm:$0xff] }
  0x65   : > { %v492_v30 = vld [vmem:[%s3441_s30 + $0x9e0] sm:$0xff]  ;;  %489 = vst [vmem:[%s3449_s5 + $0x4e0] sm:$0xff] %v488_v28  ;;  %491 = vst [vmem:[%s3449_s5 + $0x4e8] sm:$0xff] %v490_v29  ;;  %v494_v31 = vld [vmem:[%s3441_s30 + $0x9e8] sm:$0xff] }
  0x66   : > { %493 = vst [vmem:[%s3449_s5 + $0x4f0] sm:$0xff] %v492_v30  ;;  %v496_v32 = vld [vmem:[%s3441_s30 + $0xa00] sm:$0xff]  ;;  %v498_v33 = vld [vmem:[%s3441_s30 + $0xa08] sm:$0xff]  ;;  %495 = vst [vmem:[%s3449_s5 + $0x4f8] sm:$0xff] %v494_v31 }
  0x67   : > { %497 = vst [vmem:[%s3449_s5 + $0x500] sm:$0xff] %v496_v32  ;;  %499 = vst [vmem:[%s3449_s5 + $0x508] sm:$0xff] %v498_v33  ;;  %v500_v34 = vld [vmem:[%s3441_s30 + $0xa20] sm:$0xff]  ;;  %v502_v35 = vld [vmem:[%s3441_s30 + $0xa28] sm:$0xff] }
  0x68   : > { %v504_v36 = vld [vmem:[%s3441_s30 + $0xa40] sm:$0xff]  ;;  %501 = vst [vmem:[%s3449_s5 + $0x510] sm:$0xff] %v500_v34  ;;  %503 = vst [vmem:[%s3449_s5 + $0x518] sm:$0xff] %v502_v35  ;;  %v506_v37 = vld [vmem:[%s3441_s30 + $0xa48] sm:$0xff] }
  0x69   : > { %505 = vst [vmem:[%s3449_s5 + $0x520] sm:$0xff] %v504_v36  ;;  %v508_v38 = vld [vmem:[%s3441_s30 + $0xa60] sm:$0xff]  ;;  %v510_v39 = vld [vmem:[%s3441_s30 + $0xa68] sm:$0xff]  ;;  %507 = vst [vmem:[%s3449_s5 + $0x528] sm:$0xff] %v506_v37 }
  0x6a   : > { %509 = vst [vmem:[%s3449_s5 + $0x530] sm:$0xff] %v508_v38  ;;  %511 = vst [vmem:[%s3449_s5 + $0x538] sm:$0xff] %v510_v39  ;;  %v512_v40 = vld [vmem:[%s3441_s30 + $0xa80] sm:$0xff]  ;;  %v514_v41 = vld [vmem:[%s3441_s30 + $0xa88] sm:$0xff] }
  0x6b   : > { %v516_v42 = vld [vmem:[%s3441_s30 + $0xaa0] sm:$0xff]  ;;  %513 = vst [vmem:[%s3449_s5 + $0x540] sm:$0xff] %v512_v40  ;;  %515 = vst [vmem:[%s3449_s5 + $0x548] sm:$0xff] %v514_v41  ;;  %v518_v43 = vld [vmem:[%s3441_s30 + $0xaa8] sm:$0xff] }
  0x6c   : > { %517 = vst [vmem:[%s3449_s5 + $0x550] sm:$0xff] %v516_v42  ;;  %v520_v44 = vld [vmem:[%s3441_s30 + $0xac0] sm:$0xff]  ;;  %v522_v45 = vld [vmem:[%s3441_s30 + $0xac8] sm:$0xff]  ;;  %519 = vst [vmem:[%s3449_s5 + $0x558] sm:$0xff] %v518_v43 }
  0x6d   : > { %521 = vst [vmem:[%s3449_s5 + $0x560] sm:$0xff] %v520_v44  ;;  %523 = vst [vmem:[%s3449_s5 + $0x568] sm:$0xff] %v522_v45  ;;  %v524_v46 = vld [vmem:[%s3441_s30 + $0xae0] sm:$0xff]  ;;  %v526_v47 = vld [vmem:[%s3441_s30 + $0xae8] sm:$0xff] }
  0x6e   : > { %v528_v48 = vld [vmem:[%s3441_s30 + $0xb00] sm:$0xff]  ;;  %525 = vst [vmem:[%s3449_s5 + $0x570] sm:$0xff] %v524_v46  ;;  %527 = vst [vmem:[%s3449_s5 + $0x578] sm:$0xff] %v526_v47  ;;  %v530_v49 = vld [vmem:[%s3441_s30 + $0xb08] sm:$0xff] }
  0x6f   : > { %529 = vst [vmem:[%s3449_s5 + $0x580] sm:$0xff] %v528_v48  ;;  %v532_v50 = vld [vmem:[%s3441_s30 + $0xb20] sm:$0xff]  ;;  %v534_v51 = vld [vmem:[%s3441_s30 + $0xb28] sm:$0xff]  ;;  %531 = vst [vmem:[%s3449_s5 + $0x588] sm:$0xff] %v530_v49 }
  0x70   : > { %533 = vst [vmem:[%s3449_s5 + $0x590] sm:$0xff] %v532_v50  ;;  %535 = vst [vmem:[%s3449_s5 + $0x598] sm:$0xff] %v534_v51  ;;  %v536_v52 = vld [vmem:[%s3441_s30 + $0xb40] sm:$0xff]  ;;  %v538_v53 = vld [vmem:[%s3441_s30 + $0xb48] sm:$0xff] }
  0x71   : > { %v540_v54 = vld [vmem:[%s3441_s30 + $0xb60] sm:$0xff]  ;;  %537 = vst [vmem:[%s3449_s5 + $0x5a0] sm:$0xff] %v536_v52  ;;  %539 = vst [vmem:[%s3449_s5 + $0x5a8] sm:$0xff] %v538_v53  ;;  %v542_v55 = vld [vmem:[%s3441_s30 + $0xb68] sm:$0xff] }
  0x72   : > { %541 = vst [vmem:[%s3449_s5 + $0x5b0] sm:$0xff] %v540_v54  ;;  %v544_v56 = vld [vmem:[%s3441_s30 + $0xb80] sm:$0xff]  ;;  %v546_v57 = vld [vmem:[%s3441_s30 + $0xb88] sm:$0xff]  ;;  %543 = vst [vmem:[%s3449_s5 + $0x5b8] sm:$0xff] %v542_v55 }
  0x73   : > { %545 = vst [vmem:[%s3449_s5 + $0x5c0] sm:$0xff] %v544_v56  ;;  %547 = vst [vmem:[%s3449_s5 + $0x5c8] sm:$0xff] %v546_v57  ;;  %v548_v58 = vld [vmem:[%s3441_s30 + $0xba0] sm:$0xff]  ;;  %v550_v59 = vld [vmem:[%s3441_s30 + $0xba8] sm:$0xff] }
  0x74   : > { %v552_v60 = vld [vmem:[%s3441_s30 + $0xbc0] sm:$0xff]  ;;  %549 = vst [vmem:[%s3449_s5 + $0x5d0] sm:$0xff] %v548_v58  ;;  %551 = vst [vmem:[%s3449_s5 + $0x5d8] sm:$0xff] %v550_v59  ;;  %v554_v61 = vld [vmem:[%s3441_s30 + $0xbc8] sm:$0xff] }
  0x75   : > { %553 = vst [vmem:[%s3449_s5 + $0x5e0] sm:$0xff] %v552_v60  ;;  %v556_v62 = vld [vmem:[%s3441_s30 + $0xbe0] sm:$0xff]  ;;  %v558_v63 = vld [vmem:[%s3441_s30 + $0xbe8] sm:$0xff]  ;;  %555 = vst [vmem:[%s3449_s5 + $0x5e8] sm:$0xff] %v554_v61 }
  0x76   : > { %557 = vst [vmem:[%s3449_s5 + $0x5f0] sm:$0xff] %v556_v62  ;;  %559 = vst [vmem:[%s3449_s5 + $0x5f8] sm:$0xff] %v558_v63  ;;  %v560_v0 = vld [vmem:[%s3441_s30 + $0xc00] sm:$0xff]  ;;  %v562_v1 = vld [vmem:[%s3441_s30 + $0xc08] sm:$0xff] }
  0x77   : > { %v564_v2 = vld [vmem:[%s3441_s30 + $0xc20] sm:$0xff]  ;;  %561 = vst [vmem:[%s3449_s5 + $0x600] sm:$0xff] %v560_v0  ;;  %563 = vst [vmem:[%s3449_s5 + $0x608] sm:$0xff] %v562_v1  ;;  %v566_v3 = vld [vmem:[%s3441_s30 + $0xc28] sm:$0xff] }
  0x78   : > { %565 = vst [vmem:[%s3449_s5 + $0x610] sm:$0xff] %v564_v2  ;;  %v568_v4 = vld [vmem:[%s3441_s30 + $0xc40] sm:$0xff]  ;;  %v570_v5 = vld [vmem:[%s3441_s30 + $0xc48] sm:$0xff]  ;;  %567 = vst [vmem:[%s3449_s5 + $0x618] sm:$0xff] %v566_v3 }
  0x79   : > { %569 = vst [vmem:[%s3449_s5 + $0x620] sm:$0xff] %v568_v4  ;;  %571 = vst [vmem:[%s3449_s5 + $0x628] sm:$0xff] %v570_v5  ;;  %v572_v6 = vld [vmem:[%s3441_s30 + $0xc60] sm:$0xff]  ;;  %v574_v7 = vld [vmem:[%s3441_s30 + $0xc68] sm:$0xff] }
  0x7a   : > { %v576_v8 = vld [vmem:[%s3441_s30 + $0xc80] sm:$0xff]  ;;  %573 = vst [vmem:[%s3449_s5 + $0x630] sm:$0xff] %v572_v6  ;;  %575 = vst [vmem:[%s3449_s5 + $0x638] sm:$0xff] %v574_v7  ;;  %v578_v9 = vld [vmem:[%s3441_s30 + $0xc88] sm:$0xff] }
  0x7b   : > { %577 = vst [vmem:[%s3449_s5 + $0x640] sm:$0xff] %v576_v8  ;;  %v580_v10 = vld [vmem:[%s3441_s30 + $0xca0] sm:$0xff]  ;;  %v582_v11 = vld [vmem:[%s3441_s30 + $0xca8] sm:$0xff]  ;;  %579 = vst [vmem:[%s3449_s5 + $0x648] sm:$0xff] %v578_v9 }
  0x7c   : > { %581 = vst [vmem:[%s3449_s5 + $0x650] sm:$0xff] %v580_v10  ;;  %583 = vst [vmem:[%s3449_s5 + $0x658] sm:$0xff] %v582_v11  ;;  %v584_v12 = vld [vmem:[%s3441_s30 + $0xcc0] sm:$0xff]  ;;  %v586_v13 = vld [vmem:[%s3441_s30 + $0xcc8] sm:$0xff] }
  0x7d   : > { %v588_v14 = vld [vmem:[%s3441_s30 + $0xce0] sm:$0xff]  ;;  %585 = vst [vmem:[%s3449_s5 + $0x660] sm:$0xff] %v584_v12  ;;  %587 = vst [vmem:[%s3449_s5 + $0x668] sm:$0xff] %v586_v13  ;;  %v590_v15 = vld [vmem:[%s3441_s30 + $0xce8] sm:$0xff] }
  0x7e   : > { %589 = vst [vmem:[%s3449_s5 + $0x670] sm:$0xff] %v588_v14  ;;  %v592_v16 = vld [vmem:[%s3441_s30 + $0xd00] sm:$0xff]  ;;  %v594_v17 = vld [vmem:[%s3441_s30 + $0xd08] sm:$0xff]  ;;  %591 = vst [vmem:[%s3449_s5 + $0x678] sm:$0xff] %v590_v15 }
  0x7f   : > { %593 = vst [vmem:[%s3449_s5 + $0x680] sm:$0xff] %v592_v16  ;;  %595 = vst [vmem:[%s3449_s5 + $0x688] sm:$0xff] %v594_v17  ;;  %v596_v18 = vld [vmem:[%s3441_s30 + $0xd20] sm:$0xff]  ;;  %v598_v19 = vld [vmem:[%s3441_s30 + $0xd28] sm:$0xff] }
  0x80   : > { %v600_v20 = vld [vmem:[%s3441_s30 + $0xd40] sm:$0xff]  ;;  %597 = vst [vmem:[%s3449_s5 + $0x690] sm:$0xff] %v596_v18  ;;  %599 = vst [vmem:[%s3449_s5 + $0x698] sm:$0xff] %v598_v19  ;;  %v602_v21 = vld [vmem:[%s3441_s30 + $0xd48] sm:$0xff] }
  0x81   : > { %601 = vst [vmem:[%s3449_s5 + $0x6a0] sm:$0xff] %v600_v20  ;;  %v604_v22 = vld [vmem:[%s3441_s30 + $0xd60] sm:$0xff]  ;;  %v606_v23 = vld [vmem:[%s3441_s30 + $0xd68] sm:$0xff]  ;;  %603 = vst [vmem:[%s3449_s5 + $0x6a8] sm:$0xff] %v602_v21 }
  0x82   : > { %605 = vst [vmem:[%s3449_s5 + $0x6b0] sm:$0xff] %v604_v22  ;;  %607 = vst [vmem:[%s3449_s5 + $0x6b8] sm:$0xff] %v606_v23 }
  0x83 PF: > { %p2668_p7 = scmp.ge.s32.totalorder %s3370_s19, 1  ;;  %p612_p8 = scmp.lt.s32.totalorder %s3370_s19, 3 }
  0x85   : > { %p613_p9 = pnand %p2668_p7, %p612_p8 }
  0x86   : > { %s619_s6 = sand.u32 (!%p613_p9), 1, %s3362_s17   ;;  %v3102_v24 = vld [vmem:[%s4232_s1 + $0x4] ss:$28 sps:$4 sm:$0xff] (!%p613_p9)   ;;  %vm2052_vm0 = vcmask (!%p613_p9), 785408  }
  0x87   : > { %616 = sbr.rel (%p613_p9) target bundleno = 596 (0x254), region = 55  ;;  %2091 = vmatprep.mubr.bf16.mxu0 (!%p613_p9), %v3102_v24  ;;  %2303 = vmatprep.mubr.bf16.mxu1 (!%p613_p9), %v3102_v24  ;;  %s2669_s8 = sshll.u32 (!%p613_p9), %s619_s6, 7 }
  0x88   : > { %s2976_s7 = smul.u32 (!%p613_p9), 1728, %s619_s6  ;;  %s4168_s17 = scalar_lea.vmem (!%p613_p9), [#allocation4], %s2669_s8 }
  0x8a   : > { %s3885_s10 = scalar_lea.vmem (!%p613_p9), [#allocation3], %s2976_s7 }
  0x8b   : > { %v3004_v25 = vld [vmem:[%s3885_s10 + $0x4] ss:$16 sps:$4 sm:$0xff] (!%p613_p9)   ;;  %v3006_v26 = vld [vmem:[%s3885_s10 + $0xc] ss:$16 sps:$4 sm:$0xff] (!%p613_p9)   ;;  %v3008_v27 = vld [vmem:[%s3885_s10] ss:$16 sps:$4 sm:$0xff] (!%p613_p9)  }
  0x8c   : > { %2059 = vmatprep.subr.bf16.mxu0 (!%p613_p9), %v3004_v25  ;;  %v3009_v28 = vld [vmem:[%s3885_s10 + $0x8] ss:$16 sps:$4 sm:$0xff] (!%p613_p9)   ;;  %2271 = vmatprep.subr.bf16.mxu1 (!%p613_p9), %v3006_v26  ;;  %v3010_v29 = vld [vmem:[%s3885_s10 + $0x24] ss:$16 sps:$4 sm:$0xff] (!%p613_p9)   ;;  %v3012_v30 = vld [vmem:[%s3885_s10 + $0x2c] ss:$16 sps:$4 sm:$0xff] (!%p613_p9)  }
  0x8d   : > { %2060 = vmatpush1.bf16.msra.mxu0 (!%p613_p9), %v3008_v27  ;;  %2272 = vmatpush1.bf16.msra.mxu1 (!%p613_p9), %v3009_v28  ;;  %v3014_v31 = vld [vmem:[%s3885_s10 + $0x20] ss:$16 sps:$4 sm:$0xff] (!%p613_p9)   ;;  %v3015_v32 = vld [vmem:[%s3885_s10 + $0x28] ss:$16 sps:$4 sm:$0xff] (!%p613_p9)   ;;  %v3016_v33 = vld [vmem:[%s3885_s10 + $0x44] ss:$16 sps:$4 sm:$0xff] (!%p613_p9)  }
  0x8e   : > { %2061 = vmatprep.subr.bf16.mxu0 %v3010_v29  ;;  %2273 = vmatprep.subr.bf16.mxu1 %v3012_v30  ;;  %v3018_v34 = vld [vmem:[%s3885_s10 + $0x4c] ss:$16 sps:$4 sm:$0xff]   ;;  %v3020_v35 = vld [vmem:[%s3885_s10 + $0x40] ss:$16 sps:$4 sm:$0xff]   ;;  %v3021_v36 = vld [vmem:[%s3885_s10 + $0x48] ss:$16 sps:$4 sm:$0xff]  }
  0x8f   : > { %v3022_v37 = vld [vmem:[%s3885_s10 + $0x64] ss:$16 sps:$4 sm:$0xff]   ;;  %v3024_v38 = vld [vmem:[%s3885_s10 + $0x6c] ss:$16 sps:$4 sm:$0xff]   ;;  %v3026_v39 = vld [vmem:[%s3885_s10 + $0x60] ss:$16 sps:$4 sm:$0xff]  }
  0x90   : > { %v3027_v40 = vld [vmem:[%s3885_s10 + $0x68] ss:$16 sps:$4 sm:$0xff]   ;;  %v3028_v41 = vld [vmem:[%s3885_s10 + $0x84] ss:$16 sps:$4 sm:$0xff]   ;;  %v3030_v42 = vld [vmem:[%s3885_s10 + $0x8c] ss:$16 sps:$4 sm:$0xff]  }
  0x91   : > { %2062 = vmatpush1.bf16.msra.mxu0 %v3014_v31  ;;  %2274 = vmatpush1.bf16.msra.mxu1 %v3015_v32  ;;  %v3032_v43 = vld [vmem:[%s3885_s10 + $0x80] ss:$16 sps:$4 sm:$0xff]   ;;  %v3033_v44 = vld [vmem:[%s3885_s10 + $0x88] ss:$16 sps:$4 sm:$0xff]   ;;  %v3034_v45 = vld [vmem:[%s3885_s10 + $0xa4] ss:$16 sps:$4 sm:$0xff]  }
  0x92   : > { %2063 = vmatprep.subr.bf16.mxu0 %v3016_v33  ;;  %2275 = vmatprep.subr.bf16.mxu1 %v3018_v34  ;;  %v3036_v46 = vld [vmem:[%s3885_s10 + $0xac] ss:$16 sps:$4 sm:$0xff]   ;;  %v3038_v47 = vld [vmem:[%s3885_s10 + $0xa0] ss:$16 sps:$4 sm:$0xff]   ;;  %v3039_v48 = vld [vmem:[%s3885_s10 + $0xa8] ss:$16 sps:$4 sm:$0xff]  }
  0x93   : > { %v3040_v49 = vld [vmem:[%s3885_s10 + $0xc4] ss:$16 sps:$4 sm:$0xff]   ;;  %v3042_v50 = vld [vmem:[%s3885_s10 + $0xcc] ss:$16 sps:$4 sm:$0xff]   ;;  %v3044_v51 = vld [vmem:[%s3885_s10 + $0xc0] ss:$16 sps:$4 sm:$0xff]  }
  0x94   : > { %v3045_v52 = vld [vmem:[%s3885_s10 + $0xc8] ss:$16 sps:$4 sm:$0xff]   ;;  %v3046_v53 = vld [vmem:[%s3885_s10 + $0xe4] ss:$16 sps:$4 sm:$0xff]   ;;  %v3048_v54 = vld [vmem:[%s3885_s10 + $0xec] ss:$16 sps:$4 sm:$0xff]  }
  0x95   : > { %2064 = vmatpush1.bf16.msra.mxu0 %v3020_v35  ;;  %2276 = vmatpush1.bf16.msra.mxu1 %v3021_v36  ;;  %v3050_v55 = vld [vmem:[%s3885_s10 + $0xe0] ss:$16 sps:$4 sm:$0xff]   ;;  %v3051_v56 = vld [vmem:[%s3885_s10 + $0xe8] ss:$16 sps:$4 sm:$0xff]   ;;  %v3052_v57 = vld [vmem:[%s3885_s10 + $0x104] ss:$16 sps:$4 sm:$0xff]  }
  0x96   : > { %2065 = vmatprep.subr.bf16.mxu0 %v3022_v37  ;;  %2277 = vmatprep.subr.bf16.mxu1 %v3024_v38  ;;  %v3054_v58 = vld [vmem:[%s3885_s10 + $0x10c] ss:$16 sps:$4 sm:$0xff]   ;;  %v3056_v59 = vld [vmem:[%s3885_s10 + $0x100] ss:$16 sps:$4 sm:$0xff]   ;;  %v3057_v60 = vld [vmem:[%s3885_s10 + $0x108] ss:$16 sps:$4 sm:$0xff]  }
  0x97   : > { %v3058_v61 = vld [vmem:[%s3885_s10 + $0x124] ss:$16 sps:$4 sm:$0xff]   ;;  %v3060_v62 = vld [vmem:[%s3885_s10 + $0x12c] ss:$16 sps:$4 sm:$0xff]   ;;  %v3062_v63 = vld [vmem:[%s3885_s10 + $0x120] ss:$16 sps:$4 sm:$0xff]  }
  0x98   : > { %v3063_v0 = vld [vmem:[%s3885_s10 + $0x128] ss:$16 sps:$4 sm:$0xff]   ;;  %v3064_v1 = vld [vmem:[%s3885_s10 + $0x144] ss:$16 sps:$4 sm:$0xff]   ;;  %v3066_v2 = vld [vmem:[%s3885_s10 + $0x14c] ss:$16 sps:$4 sm:$0xff]  }
  0x99   : > { %2066 = vmatpush1.bf16.msra.mxu0 %v3026_v39  ;;  %2278 = vmatpush1.bf16.msra.mxu1 %v3027_v40  ;;  %v3068_v3 = vld [vmem:[%s3885_s10 + $0x140] ss:$16 sps:$4 sm:$0xff]   ;;  %v3069_v4 = vld [vmem:[%s3885_s10 + $0x148] ss:$16 sps:$4 sm:$0xff]   ;;  %v3070_v5 = vld [vmem:[%s3885_s10 + $0x164] ss:$16 sps:$4 sm:$0xff]  }
  0x9a   : > { %2067 = vmatprep.subr.bf16.mxu0 %v3028_v41  ;;  %2279 = vmatprep.subr.bf16.mxu1 %v3030_v42  ;;  %v3072_v6 = vld [vmem:[%s3885_s10 + $0x16c] ss:$16 sps:$4 sm:$0xff]   ;;  %v3074_v7 = vld [vmem:[%s3885_s10 + $0x160] ss:$16 sps:$4 sm:$0xff]   ;;  %v3075_v8 = vld [vmem:[%s3885_s10 + $0x168] ss:$16 sps:$4 sm:$0xff]  }
  0x9b   : > { %v3076_v9 = vld [vmem:[%s3885_s10 + $0x184] ss:$16 sps:$4 sm:$0xff]   ;;  %v3078_v10 = vld [vmem:[%s3885_s10 + $0x18c] ss:$16 sps:$4 sm:$0xff]   ;;  %v3080_v11 = vld [vmem:[%s3885_s10 + $0x180] ss:$16 sps:$4 sm:$0xff]  }
  0x9c   : > { %v3081_v12 = vld [vmem:[%s3885_s10 + $0x188] ss:$16 sps:$4 sm:$0xff]   ;;  %v3082_v13 = vld [vmem:[%s3885_s10 + $0x1a4] ss:$16 sps:$4 sm:$0xff]   ;;  %v3084_v14 = vld [vmem:[%s3885_s10 + $0x1ac] ss:$16 sps:$4 sm:$0xff]  }
  0x9d   : > { %2068 = vmatpush1.bf16.msra.mxu0 %v3032_v43  ;;  %2280 = vmatpush1.bf16.msra.mxu1 %v3033_v44  ;;  %v3086_v15 = vld [vmem:[%s3885_s10 + $0x1a0] ss:$16 sps:$4 sm:$0xff]   ;;  %v3087_v16 = vld [vmem:[%s3885_s10 + $0x1a8] ss:$16 sps:$4 sm:$0xff]   ;;  %v3088_v17 = vld [vmem:[%s3885_s10 + $0x1c4] ss:$16 sps:$4 sm:$0xff]  }
  0x9e   : > { %2069 = vmatprep.subr.bf16.mxu0 %v3034_v45  ;;  %2281 = vmatprep.subr.bf16.mxu1 %v3036_v46  ;;  %v3090_v18 = vld [vmem:[%s3885_s10 + $0x1cc] ss:$16 sps:$4 sm:$0xff]   ;;  %v3092_v19 = vld [vmem:[%s3885_s10 + $0x1c0] ss:$16 sps:$4 sm:$0xff]   ;;  %v3093_v20 = vld [vmem:[%s3885_s10 + $0x1c8] ss:$16 sps:$4 sm:$0xff]  }
  0x9f   : > { %v3094_v21 = vld [vmem:[%s3885_s10 + $0x1e4] ss:$16 sps:$4 sm:$0xff]   ;;  %v3096_v22 = vld [vmem:[%s3885_s10 + $0x1ec] ss:$16 sps:$4 sm:$0xff]   ;;  %v3098_v23 = vld [vmem:[%s3885_s10 + $0x1e0] ss:$16 sps:$4 sm:$0xff]  }
  0xa0   : > { %v3099_v24 = vld [vmem:[%s3885_s10 + $0x1e8] ss:$16 sps:$4 sm:$0xff]   ;;  %v3105_v25 = vld [vmem:[%s3885_s10 + $0x204] ss:$16 sps:$4 sm:$0xff]   ;;  %v3108_v26 = vld [vmem:[%s3885_s10 + $0x20c] ss:$16 sps:$4 sm:$0xff]  }
  0xa1   : > { %2070 = vmatpush1.bf16.msra.mxu0 %v3038_v47  ;;  %2282 = vmatpush1.bf16.msra.mxu1 %v3039_v48  ;;  %v3100_v27 = vld [vmem:[%s4232_s1] ss:$28 sps:$4 sm:$0xff]   ;;  %v3106_v29 = vld [vmem:[%s3885_s10 + $0x208] ss:$16 sps:$4 sm:$0xff]   ;;  %v3111_v30 = vld [vmem:[%s3885_s10 + $0x224] ss:$16 sps:$4 sm:$0xff]  }
  0xa2   : > { %2071 = vmatprep.subr.bf16.mxu0 %v3040_v49  ;;  %2283 = vmatprep.subr.bf16.mxu1 %v3042_v50  ;;  %v3103_v28 = vld [vmem:[%s3885_s10 + $0x200] ss:$16 sps:$4 sm:$0xff]   ;;  %v3114_v31 = vld [vmem:[%s3885_s10 + $0x22c] ss:$16 sps:$4 sm:$0xff]   ;;  %v3112_v34 = vld [vmem:[%s3885_s10 + $0x228] ss:$16 sps:$4 sm:$0xff]  }
  0xa3   : > { %v3187_v32 = vld [vmem:[%s4232_s1 + $0x3c] ss:$28 sps:$4 sm:$0xff]   ;;  %v3109_v33 = vld [vmem:[%s3885_s10 + $0x220] ss:$16 sps:$4 sm:$0xff]   ;;  %v3117_v35 = vld [vmem:[%s3885_s10 + $0x244] ss:$16 sps:$4 sm:$0xff]  }
  0xa4   : > { %v3120_v36 = vld [vmem:[%s3885_s10 + $0x24c] ss:$16 sps:$4 sm:$0xff]   ;;  %v3195_v37 = vld [vmem:[%s4232_s1 + $0x38] ss:$28 sps:$4 sm:$0xff]   ;;  %v3115_v38 = vld [vmem:[%s3885_s10 + $0x240] ss:$16 sps:$4 sm:$0xff]  }
  0xa5   : > { %2072 = vmatpush1.bf16.msra.mxu0 %v3044_v51  ;;  %2284 = vmatpush1.bf16.msra.mxu1 %v3045_v52  ;;  %v3118_v39 = vld [vmem:[%s3885_s10 + $0x248] ss:$16 sps:$4 sm:$0xff]   ;;  %v3123_v40 = vld [vmem:[%s3885_s10 + $0x264] ss:$16 sps:$4 sm:$0xff]   ;;  %v3126_v41 = vld [vmem:[%s3885_s10 + $0x26c] ss:$16 sps:$4 sm:$0xff]  }
  0xa6   : > { %2073 = vmatprep.subr.bf16.mxu0 %v3046_v53  ;;  %2285 = vmatprep.subr.bf16.mxu1 %v3048_v54  ;;  %v3121_v42 = vld [vmem:[%s3885_s10 + $0x260] ss:$16 sps:$4 sm:$0xff]   ;;  %v3124_v43 = vld [vmem:[%s3885_s10 + $0x268] ss:$16 sps:$4 sm:$0xff]   ;;  %v3129_v44 = vld [vmem:[%s3885_s10 + $0x284] ss:$16 sps:$4 sm:$0xff]  }
  0xa7   : > { %v3132_v45 = vld [vmem:[%s3885_s10 + $0x28c] ss:$16 sps:$4 sm:$0xff]   ;;  %v3127_v46 = vld [vmem:[%s3885_s10 + $0x280] ss:$16 sps:$4 sm:$0xff]   ;;  %v3130_v47 = vld [vmem:[%s3885_s10 + $0x288] ss:$16 sps:$4 sm:$0xff]  }
  0xa8   : > { %v3135_v48 = vld [vmem:[%s3885_s10 + $0x2a4] ss:$16 sps:$4 sm:$0xff]   ;;  %v3138_v49 = vld [vmem:[%s3885_s10 + $0x2ac] ss:$16 sps:$4 sm:$0xff]   ;;  %v3133_v50 = vld [vmem:[%s3885_s10 + $0x2a0] ss:$16 sps:$4 sm:$0xff]  }
  0xa9   : > { %2074 = vmatpush1.bf16.msra.mxu0 %v3050_v55  ;;  %2286 = vmatpush1.bf16.msra.mxu1 %v3051_v56  ;;  %v3136_v51 = vld [vmem:[%s3885_s10 + $0x2a8] ss:$16 sps:$4 sm:$0xff]   ;;  %v3141_v52 = vld [vmem:[%s3885_s10 + $0x2c4] ss:$16 sps:$4 sm:$0xff]   ;;  %v3144_v53 = vld [vmem:[%s3885_s10 + $0x2cc] ss:$16 sps:$4 sm:$0xff]  }
  0xaa   : > { %2075 = vmatprep.subr.bf16.mxu0 %v3052_v57  ;;  %2287 = vmatprep.subr.bf16.mxu1 %v3054_v58  ;;  %v3204_v54 = vld [vmem:[%s4232_s1 + $0xc] ss:$28 sps:$4 sm:$0xff]   ;;  %v3139_v55 = vld [vmem:[%s3885_s10 + $0x2c0] ss:$16 sps:$4 sm:$0xff]   ;;  %v3147_v57 = vld [vmem:[%s3885_s10 + $0x2e4] ss:$16 sps:$4 sm:$0xff]  }
  0xab   : > { %v3142_v56 = vld [vmem:[%s3885_s10 + $0x2c8] ss:$16 sps:$4 sm:$0xff]   ;;  %v3150_v58 = vld [vmem:[%s3885_s10 + $0x2ec] ss:$16 sps:$4 sm:$0xff]   ;;  %s2910_s6 = sshll.u32 (%p3431_p5), %s2662_s0, 5 }
  0xac   : > { %s2558_s24 = scalar_lea.vmem (%p3431_p5), %s4235_s4, %s2910_s6 }
  0xad   : > { %2076 = vmatpush1.bf16.msra.mxu0 %v3056_v59  ;;  %2288 = vmatpush1.bf16.msra.mxu1 %v3057_v60  ;;  %v3372_v59 = vmov 0   ;;  %v3145_v60 = vld [vmem:[%s3885_s10 + $0x2e0] ss:$16 sps:$4 sm:$0xff]  }
  0xae   : > { %2077 = vmatprep.subr.bf16.mxu0 %v3058_v61  ;;  %2289 = vmatprep.subr.bf16.mxu1 %v3060_v62  ;;  %v3148_v61 = vld [vmem:[%s3885_s10 + $0x2e8] ss:$16 sps:$4 sm:$0xff]   ;;  %v3153_v62 = vld [vmem:[%s3885_s10 + $0x304] ss:$16 sps:$4 sm:$0xff]  }
  0xaf   : > { %3002 = vset.pattern.permute.xlu0 %v3372_v59  ;;  %3003 = vset.pattern.permute.xlu1 %v3372_v59 }
  0xb1   : > { %2078 = vmatpush1.bf16.msra.mxu0 %v3062_v63  ;;  %2290 = vmatpush1.bf16.msra.mxu1 %v3063_v0  ;;  %v3156_v63 = vld [vmem:[%s3885_s10 + $0x30c] ss:$16 sps:$4 sm:$0xff]   ;;  %v3151_v0 = vld [vmem:[%s3885_s10 + $0x300] ss:$16 sps:$4 sm:$0xff]  }
  0xb2   : > { %2079 = vmatprep.subr.bf16.mxu0 %v3064_v1  ;;  %2291 = vmatprep.subr.bf16.mxu1 %v3066_v2  ;;  %v3154_v1 = vld [vmem:[%s3885_s10 + $0x308] ss:$16 sps:$4 sm:$0xff]   ;;  %v3159_v2 = vld [vmem:[%s3885_s10 + $0x324] ss:$16 sps:$4 sm:$0xff]  }
  0xb5   : > { %2080 = vmatpush1.bf16.msra.mxu0 %v3068_v3  ;;  %2292 = vmatpush1.bf16.msra.mxu1 %v3069_v4  ;;  %v3162_v3 = vld [vmem:[%s3885_s10 + $0x32c] ss:$16 sps:$4 sm:$0xff]   ;;  %v3157_v4 = vld [vmem:[%s3885_s10 + $0x320] ss:$16 sps:$4 sm:$0xff]  }
  0xb6   : > { %2081 = vmatprep.subr.bf16.mxu0 %v3070_v5  ;;  %2293 = vmatprep.subr.bf16.mxu1 %v3072_v6  ;;  %v3160_v5 = vld [vmem:[%s3885_s10 + $0x328] ss:$16 sps:$4 sm:$0xff]   ;;  %v3165_v6 = vld [vmem:[%s3885_s10 + $0x344] ss:$16 sps:$4 sm:$0xff]  }
  0xb9   : > { %2082 = vmatpush1.bf16.msra.mxu0 %v3074_v7  ;;  %2294 = vmatpush1.bf16.msra.mxu1 %v3075_v8  ;;  %v3168_v7 = vld [vmem:[%s3885_s10 + $0x34c] ss:$16 sps:$4 sm:$0xff]   ;;  %v3163_v8 = vld [vmem:[%s3885_s10 + $0x340] ss:$16 sps:$4 sm:$0xff]  }
  0xba   : > { %2083 = vmatprep.subr.bf16.mxu0 %v3076_v9  ;;  %2295 = vmatprep.subr.bf16.mxu1 %v3078_v10  ;;  %v3166_v9 = vld [vmem:[%s3885_s10 + $0x348] ss:$16 sps:$4 sm:$0xff]   ;;  %v3171_v10 = vld [vmem:[%s3885_s10 + $0x364] ss:$16 sps:$4 sm:$0xff]  }
  0xbd   : > { %2084 = vmatpush1.bf16.msra.mxu0 %v3080_v11  ;;  %2296 = vmatpush1.bf16.msra.mxu1 %v3081_v12  ;;  %v3174_v11 = vld [vmem:[%s3885_s10 + $0x36c] ss:$16 sps:$4 sm:$0xff]   ;;  %v3169_v12 = vld [vmem:[%s3885_s10 + $0x360] ss:$16 sps:$4 sm:$0xff]  }
  0xbe   : > { %2085 = vmatprep.subr.bf16.mxu0 %v3082_v13  ;;  %2297 = vmatprep.subr.bf16.mxu1 %v3084_v14  ;;  %v3172_v13 = vld [vmem:[%s3885_s10 + $0x368] ss:$16 sps:$4 sm:$0xff]   ;;  %v3177_v14 = vld [vmem:[%s3885_s10 + $0x384] ss:$16 sps:$4 sm:$0xff]  }
  0xc1   : > { %2086 = vmatpush1.bf16.msra.mxu0 %v3086_v15  ;;  %2298 = vmatpush1.bf16.msra.mxu1 %v3087_v16  ;;  %v3180_v15 = vld [vmem:[%s3885_s10 + $0x38c] ss:$16 sps:$4 sm:$0xff]   ;;  %v3175_v16 = vld [vmem:[%s3885_s10 + $0x380] ss:$16 sps:$4 sm:$0xff]  }
  0xc2   : > { %2087 = vmatprep.subr.bf16.mxu0 %v3088_v17  ;;  %2299 = vmatprep.subr.bf16.mxu1 %v3090_v18  ;;  %v3178_v17 = vld [vmem:[%s3885_s10 + $0x388] ss:$16 sps:$4 sm:$0xff]   ;;  %v3183_v18 = vld [vmem:[%s3885_s10 + $0x3a4] ss:$16 sps:$4 sm:$0xff]  }
  0xc5   : > { %2088 = vmatpush1.bf16.msra.mxu0 %v3092_v19  ;;  %2300 = vmatpush1.bf16.msra.mxu1 %v3093_v20  ;;  %v3186_v19 = vld [vmem:[%s3885_s10 + $0x3ac] ss:$16 sps:$4 sm:$0xff]   ;;  %v3181_v20 = vld [vmem:[%s3885_s10 + $0x3a0] ss:$16 sps:$4 sm:$0xff]  }
  0xc6   : > { %2089 = vmatprep.subr.bf16.mxu0 %v3094_v21  ;;  %2301 = vmatprep.subr.bf16.mxu1 %v3096_v22  ;;  %v3184_v21 = vld [vmem:[%s3885_s10 + $0x3a8] ss:$16 sps:$4 sm:$0xff]   ;;  %v3191_v22 = vld [vmem:[%s3885_s10 + $0x3c4] ss:$16 sps:$4 sm:$0xff]  }
  0xc9   : > { %2090 = vmatpush1.bf16.msra.mxu0 %v3098_v23  ;;  %2302 = vmatpush1.bf16.msra.mxu1 %v3099_v24  ;;  %v3194_v23 = vld [vmem:[%s3885_s10 + $0x3cc] ss:$16 sps:$4 sm:$0xff]   ;;  %v3189_v24 = vld [vmem:[%s3885_s10 + $0x3c0] ss:$16 sps:$4 sm:$0xff]  }
  0xca   : > { %2112 = vmatprep.subr.bf16.mxu0 %v3105_v25  ;;  %2324 = vmatprep.subr.bf16.mxu1 %v3108_v26  ;;  %v3192_v25 = vld [vmem:[%s3885_s10 + $0x3c8] ss:$16 sps:$4 sm:$0xff]   ;;  %v3198_v26 = vld [vmem:[%s3885_s10 + $0x3e4] ss:$16 sps:$4 sm:$0xff]  }
  0xcc   : > { %2092 = vmatmul.mubr.bf16.vlgmr.msra.gmra.mrb[0].mxu0 %v3100_v27  ;;  %2304 = vmatmul.mubr.bf16.vlgmr.msra.gmra.mrb[0].mxu1 %v3100_v27  ;;  %v3201_v27 = vld [vmem:[%s3885_s10 + $0x3ec] ss:$16 sps:$4 sm:$0xff]  }
  0xcd   : > { %2113 = vmatpush1.bf16.msra.mxu0 %v3103_v28  ;;  %2325 = vmatpush1.bf16.msra.mxu1 %v3106_v29  ;;  %v3196_v28 = vld [vmem:[%s3885_s10 + $0x3e0] ss:$16 sps:$4 sm:$0xff]   ;;  %v3199_v29 = vld [vmem:[%s3885_s10 + $0x3e8] ss:$16 sps:$4 sm:$0xff]  }
  0xce   : > { %2114 = vmatprep.subr.bf16.mxu0 %v3111_v30  ;;  %2326 = vmatprep.subr.bf16.mxu1 %v3114_v31  ;;  %v3207_v30 = vld [vmem:[%s3885_s10 + $0x404] ss:$16 sps:$4 sm:$0xff]   ;;  %v3210_v31 = vld [vmem:[%s3885_s10 + $0x40c] ss:$16 sps:$4 sm:$0xff]  }
  0xcf   : > { %2101 = vmatprep.mubr.bf16.mxu0 %v3187_v32  ;;  %2313 = vmatprep.mubr.bf16.mxu1 %v3187_v32  ;;  %v3202_v32 = vld [vmem:[%s4232_s1 + $0x8] ss:$28 sps:$4 sm:$0xff]  }
  0xd1   : > { %2115 = vmatpush1.bf16.msra.mxu0 %v3109_v33  ;;  %2327 = vmatpush1.bf16.msra.mxu1 %v3112_v34  ;;  %v3205_v33 = vld [vmem:[%s3885_s10 + $0x400] ss:$16 sps:$4 sm:$0xff]   ;;  %v3208_v34 = vld [vmem:[%s3885_s10 + $0x408] ss:$16 sps:$4 sm:$0xff]  }
  0xd2   : > { %2116 = vmatprep.subr.bf16.mxu0 %v3117_v35  ;;  %2328 = vmatprep.subr.bf16.mxu1 %v3120_v36  ;;  %v3213_v35 = vld [vmem:[%s3885_s10 + $0x424] ss:$16 sps:$4 sm:$0xff]   ;;  %v3216_v36 = vld [vmem:[%s3885_s10 + $0x42c] ss:$16 sps:$4 sm:$0xff]  }
  0xd4   : > { %2102 = vmatmul.mubr.bf16.gmra.mrb[4].mxu0 %v3195_v37  ;;  %2314 = vmatmul.mubr.bf16.gmra.mrb[4].mxu1 %v3195_v37  ;;  %v3289_v37 = vld [vmem:[%s4232_s1 + $0x44] ss:$28 sps:$4 sm:$0xff]  }
  0xd5   : > { %2117 = vmatpush1.bf16.msra.mxu0 %v3115_v38  ;;  %2329 = vmatpush1.bf16.msra.mxu1 %v3118_v39  ;;  %v3211_v38 = vld [vmem:[%s3885_s10 + $0x420] ss:$16 sps:$4 sm:$0xff]   ;;  %v3214_v39 = vld [vmem:[%s3885_s10 + $0x428] ss:$16 sps:$4 sm:$0xff]  }
  0xd6   : > { %2118 = vmatprep.subr.bf16.mxu0 %v3123_v40  ;;  %2330 = vmatprep.subr.bf16.mxu1 %v3126_v41  ;;  %v3219_v40 = vld [vmem:[%s3885_s10 + $0x444] ss:$16 sps:$4 sm:$0xff]   ;;  %v3222_v41 = vld [vmem:[%s3885_s10 + $0x44c] ss:$16 sps:$4 sm:$0xff]  }
  0xd7   : > { %2144 = vmatprep.mubr.bf16.mxu0 %v3204_v54  ;;  %2356 = vmatprep.mubr.bf16.mxu1 %v3204_v54  ;;  %v3237_v54 = vld [vmem:[%s3885_s10 + $0x4a4] ss:$16 sps:$4 sm:$0xff]  }
  0xd9   : > { %2119 = vmatpush1.bf16.msra.mxu0 %v3121_v42  ;;  %2331 = vmatpush1.bf16.msra.mxu1 %v3124_v43  ;;  %v3217_v42 = vld [vmem:[%s3885_s10 + $0x440] ss:$16 sps:$4 sm:$0xff]   ;;  %v3220_v43 = vld [vmem:[%s3885_s10 + $0x448] ss:$16 sps:$4 sm:$0xff]  }
  0xda   : > { %2120 = vmatprep.subr.bf16.mxu0 %v3129_v44  ;;  %2332 = vmatprep.subr.bf16.mxu1 %v3132_v45  ;;  %v3297_v44 = vld [vmem:[%s4232_s1 + $0x40] ss:$28 sps:$4 sm:$0xff]   ;;  %v3225_v45 = vld [vmem:[%s3885_s10 + $0x464] ss:$16 sps:$4 sm:$0xff]  }
  0xdd   : > { %2121 = vmatpush1.bf16.msra.mxu0 %v3127_v46  ;;  %2333 = vmatpush1.bf16.msra.mxu1 %v3130_v47  ;;  %v3228_v46 = vld [vmem:[%s3885_s10 + $0x46c] ss:$16 sps:$4 sm:$0xff]   ;;  %v3306_v47 = vld [vmem:[%s4232_s1 + $0x14] ss:$28 sps:$4 sm:$0xff]  }
  0xde   : > { %2122 = vmatprep.subr.bf16.mxu0 %v3135_v48  ;;  %2334 = vmatprep.subr.bf16.mxu1 %v3138_v49  ;;  %v3223_v48 = vld [vmem:[%s3885_s10 + $0x460] ss:$16 sps:$4 sm:$0xff]   ;;  %v3226_v49 = vld [vmem:[%s3885_s10 + $0x468] ss:$16 sps:$4 sm:$0xff]  }
  0xe1   : > { %2123 = vmatpush1.bf16.msra.mxu0 %v3133_v50  ;;  %2335 = vmatpush1.bf16.msra.mxu1 %v3136_v51  ;;  %v3231_v50 = vld [vmem:[%s3885_s10 + $0x484] ss:$16 sps:$4 sm:$0xff]   ;;  %v3234_v51 = vld [vmem:[%s3885_s10 + $0x48c] ss:$16 sps:$4 sm:$0xff]  }
  0xe2   : > { %2124 = vmatprep.subr.bf16.mxu0 %v3141_v52  ;;  %2336 = vmatprep.subr.bf16.mxu1 %v3144_v53  ;;  %v3229_v52 = vld [vmem:[%s3885_s10 + $0x480] ss:$16 sps:$4 sm:$0xff]   ;;  %v3232_v53 = vld [vmem:[%s3885_s10 + $0x488] ss:$16 sps:$4 sm:$0xff]  }
  0xe5   : > { %2125 = vmatpush1.bf16.msra.mxu0 %v3139_v55  ;;  %2337 = vmatpush1.bf16.msra.mxu1 %v3142_v56  ;;  %v3240_v55 = vld [vmem:[%s3885_s10 + $0x4ac] ss:$16 sps:$4 sm:$0xff]   ;;  %v3235_v56 = vld [vmem:[%s3885_s10 + $0x4a0] ss:$16 sps:$4 sm:$0xff]  }
  0xe6   : > { %2126 = vmatprep.subr.bf16.mxu0 %v3147_v57  ;;  %2338 = vmatprep.subr.bf16.mxu1 %v3150_v58  ;;  %v3238_v57 = vld [vmem:[%s3885_s10 + $0x4a8] ss:$16 sps:$4 sm:$0xff]   ;;  %v3243_v58 = vld [vmem:[%s3885_s10 + $0x4c4] ss:$16 sps:$4 sm:$0xff]  }
  0xe9   : > { %2127 = vmatpush1.bf16.msra.mxu0 %v3145_v60  ;;  %2339 = vmatpush1.bf16.msra.mxu1 %v3148_v61  ;;  %v3246_v60 = vld [vmem:[%s3885_s10 + $0x4cc] ss:$16 sps:$4 sm:$0xff]   ;;  %v878_v61 = vld [vmem:[%s4234_s3] sm:$0xff] }
  0xea   : > { %2128 = vmatprep.subr.bf16.mxu0 %v3153_v62  ;;  %2340 = vmatprep.subr.bf16.mxu1 %v3156_v63  ;;  %v880_v62 = vld [vmem:[%s4234_s3 + $0x10] sm:$0xff] }
  0xeb   : > { %v3241_v63 = vld [vmem:[%s3885_s10 + $0x4c0] ss:$16 sps:$4 sm:$0xff]   ;;  %884 = vperm.xlu0 %3002, %v878_v61   ;;  %894 = vperm.xlu1 %3003, %v880_v62   ;;  %v3337_v62 = vld [vmem:[%s3885_s10 + $0x688] ss:$16 sps:$4 sm:$0xff]  }
  0xec   : > { %v3334_v61 = vld [vmem:[%s3885_s10 + $0x680] ss:$16 sps:$4 sm:$0xff]  }
  0xed   : > { %2129 = vmatpush1.bf16.msra.mxu0 %v3151_v0  ;;  %2341 = vmatpush1.bf16.msra.mxu1 %v3154_v1  ;;  %v3244_v0 = vld [vmem:[%s3885_s10 + $0x4c8] ss:$16 sps:$4 sm:$0xff]  }
  0xee   : > { %2130 = vmatprep.subr.bf16.mxu0 %v3159_v2  ;;  %2342 = vmatprep.subr.bf16.mxu1 %v3162_v3  ;;  %v879_v1 = vld [vmem:[%s4234_s3 + $0x8] sm:$0xff]  ;;  %v881_v2 = vld [vmem:[%s4234_s3 + $0x18] sm:$0xff]  ;;  %v3249_v3 = vld [vmem:[%s3885_s10 + $0x4e4] ss:$16 sps:$4 sm:$0xff]  }
  0xef   : > { %889 = vperm.xlu0 %3002, %v879_v1   ;;  %899 = vperm.xlu1 %3003, %v881_v2   ;;  %v3340_v1 = vld [vmem:[%s3885_s10 + $0x6a0] ss:$16 sps:$4 sm:$0xff]   ;;  %v3343_v2 = vld [vmem:[%s3885_s10 + $0x6a8] ss:$16 sps:$4 sm:$0xff]  }
  0xf1   : > { %2131 = vmatpush1.bf16.msra.mxu0 %v3157_v4  ;;  %2343 = vmatpush1.bf16.msra.mxu1 %v3160_v5  ;;  %v3252_v4 = vld [vmem:[%s3885_s10 + $0x4ec] ss:$16 sps:$4 sm:$0xff]   ;;  %v3247_v5 = vld [vmem:[%s3885_s10 + $0x4e0] ss:$16 sps:$4 sm:$0xff]  }
  0xf2   : > { %2132 = vmatprep.subr.bf16.mxu0 %v3165_v6  ;;  %2344 = vmatprep.subr.bf16.mxu1 %v3168_v7  ;;  %v3250_v6 = vld [vmem:[%s3885_s10 + $0x4e8] ss:$16 sps:$4 sm:$0xff]   ;;  %v3255_v7 = vld [vmem:[%s3885_s10 + $0x504] ss:$16 sps:$4 sm:$0xff]  }
  0xf5   : > { %2133 = vmatpush1.bf16.msra.mxu0 %v3163_v8  ;;  %2345 = vmatpush1.bf16.msra.mxu1 %v3166_v9  ;;  %v3258_v8 = vld [vmem:[%s3885_s10 + $0x50c] ss:$16 sps:$4 sm:$0xff]   ;;  %v3253_v9 = vld [vmem:[%s3885_s10 + $0x500] ss:$16 sps:$4 sm:$0xff]  }
  0xf6   : > { %2134 = vmatprep.subr.bf16.mxu0 %v3171_v10  ;;  %2346 = vmatprep.subr.bf16.mxu1 %v3174_v11  ;;  %v3256_v10 = vld [vmem:[%s3885_s10 + $0x508] ss:$16 sps:$4 sm:$0xff]   ;;  %v3261_v11 = vld [vmem:[%s3885_s10 + $0x524] ss:$16 sps:$4 sm:$0xff]  }
  0xf9   : > { %2135 = vmatpush1.bf16.msra.mxu0 %v3169_v12  ;;  %2347 = vmatpush1.bf16.msra.mxu1 %v3172_v13  ;;  %v3264_v12 = vld [vmem:[%s3885_s10 + $0x52c] ss:$16 sps:$4 sm:$0xff]   ;;  %v3259_v13 = vld [vmem:[%s3885_s10 + $0x520] ss:$16 sps:$4 sm:$0xff]  }
  0xfa   : > { %2136 = vmatprep.subr.bf16.mxu0 %v3177_v14  ;;  %2348 = vmatprep.subr.bf16.mxu1 %v3180_v15  ;;  %v3262_v14 = vld [vmem:[%s3885_s10 + $0x528] ss:$16 sps:$4 sm:$0xff]   ;;  %v3267_v15 = vld [vmem:[%s3885_s10 + $0x544] ss:$16 sps:$4 sm:$0xff]  }
  0xfd   : > { %2137 = vmatpush1.bf16.msra.mxu0 %v3175_v16  ;;  %2349 = vmatpush1.bf16.msra.mxu1 %v3178_v17  ;;  %v3270_v16 = vld [vmem:[%s3885_s10 + $0x54c] ss:$16 sps:$4 sm:$0xff]   ;;  %v3265_v17 = vld [vmem:[%s3885_s10 + $0x540] ss:$16 sps:$4 sm:$0xff]  }
  0xfe   : > { %2138 = vmatprep.subr.bf16.mxu0 %v3183_v18  ;;  %2350 = vmatprep.subr.bf16.mxu1 %v3186_v19  ;;  %v3268_v18 = vld [vmem:[%s3885_s10 + $0x548] ss:$16 sps:$4 sm:$0xff]   ;;  %v3273_v19 = vld [vmem:[%s3885_s10 + $0x564] ss:$16 sps:$4 sm:$0xff]  }
 0x101   : > { %2139 = vmatpush1.bf16.msra.mxu0 %v3181_v20  ;;  %2351 = vmatpush1.bf16.msra.mxu1 %v3184_v21  ;;  %v3276_v20 = vld [vmem:[%s3885_s10 + $0x56c] ss:$16 sps:$4 sm:$0xff]   ;;  %v3271_v21 = vld [vmem:[%s3885_s10 + $0x560] ss:$16 sps:$4 sm:$0xff]  }
 0x102   : > { %2140 = vmatprep.subr.bf16.mxu0 %v3191_v22  ;;  %2352 = vmatprep.subr.bf16.mxu1 %v3194_v23  ;;  %v3274_v22 = vld [vmem:[%s3885_s10 + $0x568] ss:$16 sps:$4 sm:$0xff]   ;;  %v3279_v23 = vld [vmem:[%s3885_s10 + $0x584] ss:$16 sps:$4 sm:$0xff]  }
 0x105   : > { %2141 = vmatpush1.bf16.msra.mxu0 %v3189_v24  ;;  %2353 = vmatpush1.bf16.msra.mxu1 %v3192_v25  ;;  %v3282_v24 = vld [vmem:[%s3885_s10 + $0x58c] ss:$16 sps:$4 sm:$0xff]   ;;  %v3277_v25 = vld [vmem:[%s3885_s10 + $0x580] ss:$16 sps:$4 sm:$0xff]  }
 0x106   : > { %2142 = vmatprep.subr.bf16.mxu0 %v3198_v26  ;;  %2354 = vmatprep.subr.bf16.mxu1 %v3201_v27  ;;  %v3280_v26 = vld [vmem:[%s3885_s10 + $0x588] ss:$16 sps:$4 sm:$0xff]   ;;  %v3285_v27 = vld [vmem:[%s3885_s10 + $0x5a4] ss:$16 sps:$4 sm:$0xff]  }
 0x109   : > { %2143 = vmatpush1.bf16.msra.mxu0 %v3196_v28  ;;  %2355 = vmatpush1.bf16.msra.mxu1 %v3199_v29  ;;  %v3288_v28 = vld [vmem:[%s3885_s10 + $0x5ac] ss:$16 sps:$4 sm:$0xff]   ;;  %v3283_v29 = vld [vmem:[%s3885_s10 + $0x5a0] ss:$16 sps:$4 sm:$0xff]  }
 0x10a   : > { %2165 = vmatprep.subr.bf16.mxu0 %v3207_v30  ;;  %2377 = vmatprep.subr.bf16.mxu1 %v3210_v31  ;;  %v3286_v30 = vld [vmem:[%s3885_s10 + $0x5a8] ss:$16 sps:$4 sm:$0xff]   ;;  %v3293_v31 = vld [vmem:[%s3885_s10 + $0x5c4] ss:$16 sps:$4 sm:$0xff]  }
 0x10c   : > { %2145 = vmatmul.mubr.bf16.vlgmr.msra.gmra.mrb[0].mxu0 %v3202_v32  ;;  %2357 = vmatmul.mubr.bf16.vlgmr.msra.gmra.mrb[0].mxu1 %v3202_v32  ;;  %v3296_v32 = vld [vmem:[%s3885_s10 + $0x5cc] ss:$16 sps:$4 sm:$0xff]  }
 0x10d   : > { %2166 = vmatpush1.bf16.msra.mxu0 %v3205_v33  ;;  %2378 = vmatpush1.bf16.msra.mxu1 %v3208_v34  ;;  %v3291_v33 = vld [vmem:[%s3885_s10 + $0x5c0] ss:$16 sps:$4 sm:$0xff]   ;;  %v3294_v34 = vld [vmem:[%s3885_s10 + $0x5c8] ss:$16 sps:$4 sm:$0xff]  }
 0x10e   : > { %2167 = vmatprep.subr.bf16.mxu0 %v3213_v35  ;;  %2379 = vmatprep.subr.bf16.mxu1 %v3216_v36  ;;  %v3300_v35 = vld [vmem:[%s3885_s10 + $0x5e4] ss:$16 sps:$4 sm:$0xff]   ;;  %v3303_v36 = vld [vmem:[%s3885_s10 + $0x5ec] ss:$16 sps:$4 sm:$0xff]  }
 0x10f   : > { %2154 = vmatprep.mubr.bf16.mxu0 %v3289_v37  ;;  %2366 = vmatprep.mubr.bf16.mxu1 %v3289_v37  ;;  %v3298_v37 = vld [vmem:[%s3885_s10 + $0x5e0] ss:$16 sps:$4 sm:$0xff]  }
 0x111   : > { %2168 = vmatpush1.bf16.msra.mxu0 %v3211_v38  ;;  %2380 = vmatpush1.bf16.msra.mxu1 %v3214_v39  ;;  %v3301_v38 = vld [vmem:[%s3885_s10 + $0x5e8] ss:$16 sps:$4 sm:$0xff]   ;;  %v3309_v39 = vld [vmem:[%s3885_s10 + $0x604] ss:$16 sps:$4 sm:$0xff]  }
 0x112   : > { %2169 = vmatprep.subr.bf16.mxu0 %v3219_v40  ;;  %2381 = vmatprep.subr.bf16.mxu1 %v3222_v41  ;;  %v3312_v40 = vld [vmem:[%s3885_s10 + $0x60c] ss:$16 sps:$4 sm:$0xff]  }
 0x113   : > { %v3304_v41 = vld [vmem:[%s4232_s1 + $0x10] ss:$28 sps:$4 sm:$0xff]  }
 0x114   : > { %2155 = vmatmul.mubr.bf16.gmra.mrb[4].mxu0 %v3297_v44  ;;  %2367 = vmatmul.mubr.bf16.gmra.mrb[4].mxu1 %v3297_v44  ;;  %v3315_v44 = vld [vmem:[%s3885_s10 + $0x624] ss:$16 sps:$4 sm:$0xff]  }
 0x115   : > { %2170 = vmatpush1.bf16.msra.mxu0 %v3217_v42  ;;  %2382 = vmatpush1.bf16.msra.mxu1 %v3220_v43  ;;  %v3307_v42 = vld [vmem:[%s3885_s10 + $0x600] ss:$16 sps:$4 sm:$0xff]   ;;  %v3310_v43 = vld [vmem:[%s3885_s10 + $0x608] ss:$16 sps:$4 sm:$0xff]  }
 0x116   : > { %2171 = vmatprep.subr.bf16.mxu0 %v3225_v45  ;;  %2383 = vmatprep.subr.bf16.mxu1 %v3228_v46  ;;  %v3318_v45 = vld [vmem:[%s3885_s10 + $0x62c] ss:$16 sps:$4 sm:$0xff]  }
 0x117   : > { %2197 = vmatprep.mubr.bf16.mxu0 %v3306_v47  ;;  %2409 = vmatprep.mubr.bf16.mxu1 %v3306_v47  ;;  %v3331_v46 = vld [vmem:[%s4232_s1 + $0x4c] ss:$28 sps:$4 sm:$0xff]   ;;  %v3313_v47 = vld [vmem:[%s3885_s10 + $0x620] ss:$16 sps:$4 sm:$0xff]  }
 0x119   : > { %2172 = vmatpush1.bf16.msra.mxu0 %v3223_v48  ;;  %2384 = vmatpush1.bf16.msra.mxu1 %v3226_v49  ;;  %v3316_v48 = vld [vmem:[%s3885_s10 + $0x628] ss:$16 sps:$4 sm:$0xff]   ;;  %v3321_v49 = vld [vmem:[%s3885_s10 + $0x644] ss:$16 sps:$4 sm:$0xff]  }
 0x11a   : > { %2173 = vmatprep.subr.bf16.mxu0 %v3231_v50  ;;  %2385 = vmatprep.subr.bf16.mxu1 %v3234_v51  ;;  %v3324_v50 = vld [vmem:[%s3885_s10 + $0x64c] ss:$16 sps:$4 sm:$0xff]   ;;  %v3333_v51 = vld [vmem:[%s4232_s1 + $0x48] ss:$28 sps:$4 sm:$0xff]  }
 0x11d   : > { %2174 = vmatpush1.bf16.msra.mxu0 %v3229_v52  ;;  %2386 = vmatpush1.bf16.msra.mxu1 %v3232_v53  ;;  %v3319_v52 = vld [vmem:[%s3885_s10 + $0x640] ss:$16 sps:$4 sm:$0xff]   ;;  %v3322_v53 = vld [vmem:[%s3885_s10 + $0x648] ss:$16 sps:$4 sm:$0xff]  }
 0x11e   : > { %2175 = vmatprep.subr.bf16.mxu0 %v3237_v54  ;;  %2387 = vmatprep.subr.bf16.mxu1 %v3240_v55  ;;  %v3327_v54 = vld [vmem:[%s3885_s10 + $0x664] ss:$16 sps:$4 sm:$0xff]   ;;  %v3330_v55 = vld [vmem:[%s3885_s10 + $0x66c] ss:$16 sps:$4 sm:$0xff]  }
 0x121   : > { %2176 = vmatpush1.bf16.msra.mxu0 %v3235_v56  ;;  %2388 = vmatpush1.bf16.msra.mxu1 %v3238_v57  ;;  %v3325_v56 = vld [vmem:[%s3885_s10 + $0x660] ss:$16 sps:$4 sm:$0xff]   ;;  %v3328_v57 = vld [vmem:[%s3885_s10 + $0x668] ss:$16 sps:$4 sm:$0xff]  }
 0x122   : > { %2177 = vmatprep.subr.bf16.mxu0 %v3243_v58  ;;  %2389 = vmatprep.subr.bf16.mxu1 %v3246_v60  ;;  %v3336_v58 = vld [vmem:[%s3885_s10 + $0x684] ss:$16 sps:$4 sm:$0xff]   ;;  %v3339_v60 = vld [vmem:[%s3885_s10 + $0x68c] ss:$16 sps:$4 sm:$0xff]  }
 0x125   : > { %2178 = vmatpush1.bf16.msra.mxu0 %v3241_v63  ;;  %2390 = vmatpush1.bf16.msra.mxu1 %v3244_v0  ;;  %v3342_v63 = vld [vmem:[%s3885_s10 + $0x6a4] ss:$16 sps:$4 sm:$0xff]   ;;  %v3345_v0 = vld [vmem:[%s3885_s10 + $0x6ac] ss:$16 sps:$4 sm:$0xff]   ;;  %s2483_s10 = sld [smem:[#allocation2]] }
 0x126   : > { %2179 = vmatprep.subr.bf16.mxu0 %v3249_v3  ;;  %2391 = vmatprep.subr.bf16.mxu1 %v3252_v4  ;;  %v3346_v3 = vld [vmem:[%s4232_s1 + $0x18] ss:$28 sps:$4 sm:$0xff]   ;;  %v3347_v4 = vld [vmem:[%s4232_s1 + $0x50] ss:$28 sps:$4 sm:$0xff]  }
 0x129   : > { %2180 = vmatpush1.bf16.msra.mxu0 %v3247_v5  ;;  %2392 = vmatpush1.bf16.msra.mxu1 %v3250_v6 }
 0x12a   : > { %2181 = vmatprep.subr.bf16.mxu0 %v3255_v7  ;;  %2393 = vmatprep.subr.bf16.mxu1 %v3258_v8 }
 0x12b   : > { %v4162_v8 = vstv %s2483_s10 }
 0x12d   : > { %2182 = vmatpush1.bf16.msra.mxu0 %v3253_v9  ;;  %2394 = vmatpush1.bf16.msra.mxu1 %v3256_v10 }
 0x12e   : > { %2183 = vmatprep.subr.bf16.mxu0 %v3261_v11  ;;  %2395 = vmatprep.subr.bf16.mxu1 %v3264_v12 }
 0x131   : > { %2184 = vmatpush1.bf16.msra.mxu0 %v3259_v13  ;;  %2396 = vmatpush1.bf16.msra.mxu1 %v3262_v14 }
 0x132   : > { %2185 = vmatprep.subr.bf16.mxu0 %v3267_v15  ;;  %2397 = vmatprep.subr.bf16.mxu1 %v3270_v16 }
 0x135   : > { %2186 = vmatpush1.bf16.msra.mxu0 %v3265_v17  ;;  %2398 = vmatpush1.bf16.msra.mxu1 %v3268_v18 }
 0x136   : > { %2187 = vmatprep.subr.bf16.mxu0 %v3273_v19  ;;  %2399 = vmatprep.subr.bf16.mxu1 %v3276_v20 }
 0x139   : > { %2188 = vmatpush1.bf16.msra.mxu0 %v3271_v21  ;;  %2400 = vmatpush1.bf16.msra.mxu1 %v3274_v22 }
 0x13a   : > { %2189 = vmatprep.subr.bf16.mxu0 %v3279_v23  ;;  %2401 = vmatprep.subr.bf16.mxu1 %v3282_v24 }
 0x13d   : > { %2190 = vmatpush1.bf16.msra.mxu0 %v3277_v25  ;;  %2402 = vmatpush1.bf16.msra.mxu1 %v3280_v26 }
 0x13e   : > { %2191 = vmatprep.subr.bf16.mxu0 %v3285_v27  ;;  %2403 = vmatprep.subr.bf16.mxu1 %v3288_v28 }
 0x141   : > { %2192 = vmatpush1.bf16.msra.mxu0 %v3283_v29  ;;  %2404 = vmatpush1.bf16.msra.mxu1 %v3286_v30 }
 0x142   : > { %2193 = vmatprep.subr.bf16.mxu0 %v3293_v31  ;;  %2405 = vmatprep.subr.bf16.mxu1 %v3296_v32 }
 0x145   : > { %2194 = vmatpush1.bf16.msra.mxu0 %v3291_v33  ;;  %2406 = vmatpush1.bf16.msra.mxu1 %v3294_v34 }
 0x146   : > { %2195 = vmatprep.subr.bf16.mxu0 %v3300_v35  ;;  %2407 = vmatprep.subr.bf16.mxu1 %v3303_v36 }
 0x149   : > { %2196 = vmatpush1.bf16.msra.mxu0 %v3298_v37  ;;  %2408 = vmatpush1.bf16.msra.mxu1 %v3301_v38 }
 0x14a   : > { %2218 = vmatprep.subr.bf16.mxu0 %v3309_v39  ;;  %2430 = vmatprep.subr.bf16.mxu1 %v3312_v40 }
 0x14c   : > { %2198 = vmatmul.mubr.bf16.vlgmr.msra.gmra.mrb[0].mxu0 %v3304_v41  ;;  %2410 = vmatmul.mubr.bf16.vlgmr.msra.gmra.mrb[0].mxu1 %v3304_v41 }
 0x14d   : > { %2219 = vmatpush1.bf16.msra.mxu0 %v3307_v42  ;;  %2431 = vmatpush1.bf16.msra.mxu1 %v3310_v43 }
 0x14e   : > { %2220 = vmatprep.subr.bf16.mxu0 %v3315_v44  ;;  %2432 = vmatprep.subr.bf16.mxu1 %v3318_v45 }
 0x14f   : > { %2207 = vmatprep.mubr.bf16.mxu0 %v3331_v46  ;;  %2419 = vmatprep.mubr.bf16.mxu1 %v3331_v46 }
 0x151   : > { %2221 = vmatpush1.bf16.msra.mxu0 %v3313_v47  ;;  %2433 = vmatpush1.bf16.msra.mxu1 %v3316_v48 }
 0x152   : > { %2222 = vmatprep.subr.bf16.mxu0 %v3321_v49  ;;  %2434 = vmatprep.subr.bf16.mxu1 %v3324_v50 }
 0x154   : > { %2208 = vmatmul.mubr.bf16.gmra.mrb[4].mxu0 %v3333_v51  ;;  %2420 = vmatmul.mubr.bf16.gmra.mrb[4].mxu1 %v3333_v51 }
 0x155   : > { %2223 = vmatpush1.bf16.msra.mxu0 %v3319_v52  ;;  %2435 = vmatpush1.bf16.msra.mxu1 %v3322_v53 }
 0x156   : > { %2224 = vmatprep.subr.bf16.mxu0 %v3327_v54  ;;  %2436 = vmatprep.subr.bf16.mxu1 %v3330_v55 }
 0x157   : > { %2250 = vmatprep.mubr.bf16.mxu0 %v3372_v59  ;;  %2462 = vmatprep.mubr.bf16.mxu1 %v3372_v59 }
 0x159   : > { %2225 = vmatpush1.bf16.msra.mxu0 %v3325_v56  ;;  %2437 = vmatpush1.bf16.msra.mxu1 %v3328_v57 }
 0x15a   : > { %2226 = vmatprep.subr.bf16.mxu0 %v3336_v58  ;;  %2438 = vmatprep.subr.bf16.mxu1 %v3339_v60 }
 0x15d   : > { %2227 = vmatpush1.bf16.msra.mxu0 %v3334_v61  ;;  %2439 = vmatpush1.bf16.msra.mxu1 %v3337_v62 }
 0x15e   : > { %2228 = vmatprep.subr.bf16.mxu0 %v3342_v63  ;;  %2440 = vmatprep.subr.bf16.mxu1 %v3345_v0 }
 0x161   : > { %2229 = vmatpush1.bf16.msra.mxu0 %v3340_v1  ;;  %2441 = vmatpush1.bf16.msra.mxu1 %v3343_v2 }
 0x164   : > { %2900 = vmatmul.mubr.msk.bf16.vlgmr.msra.gmra.mrb[0].mxu0 %vm2052_vm0, %v3346_v3  ;;  %2902 = vmatmul.mubr.msk.bf16.vlgmr.msra.gmra.mrb[0].mxu1 %vm2052_vm0, %v3346_v3 }
 0x165   : > { %2260 = vmatprep.mubr.bf16.mxu0 %v3372_v59  ;;  %2472 = vmatprep.mubr.bf16.mxu1 %v3372_v59 }
 0x16a   : > { %v885_v5 = vpop.permute.xlu0 %884  ;;  %v895_v29 = vpop.permute.xlu1 %894 }
 0x16c   : > { %2901 = vmatmul.mubr.msk.bf16.gmra.mrb[4].mxu0 %vm2052_vm0, %v3347_v4  ;;  %2903 = vmatmul.mubr.msk.bf16.gmra.mrb[4].mxu1 %vm2052_vm0, %v3347_v4 }
 0x16e   : > { %v890_v6 = vpop.permute.xlu0 %889  ;;  %v900_v54 = vpop.permute.xlu1 %899 }
 0x237   : > { %v2252_v7 = vpop.f32.mrb[0].mxu0  ;;  %v2464_v9 = vpop.f32.mrb[0].mxu1 }
 0x238   : > { %v2911_v10 = vadd.f32 %v2252_v7, %v885_v5  ;;  %v2919_v11 = vadd.f32 %v2464_v9, %v885_v5  ;;  %v2254_v12 = vpop.f32.mrb[1].mxu0  ;;  %v2466_v13 = vpop.f32.mrb[1].mxu1 }
 0x239   : > { %v2912_v59 = vadd.f32 %v2254_v12, %v885_v5  ;;  %v2920_v14 = vadd.f32 %v2466_v13, %v885_v5  ;;  %v2256_v15 = vpop.f32.mrb[2].mxu0  ;;  %v2468_v16 = vpop.f32.mrb[2].mxu1 }
 0x23a   : > { %vm2484_vm1 = vcmp.ge.f32.partialorder %v2911_v10, 0.0  ;;  %v2501_v17 = vmul.f32 %v2911_v10, %v4162_v8  ;;  %vm2486_vm2 = vcmp.ge.f32.partialorder %v2919_v11, 0.0  ;;  %v2503_v18 = vmul.f32 %v2919_v11, %v4162_v8  ;;  %v2258_v19 = vpop.f32.mrb[3].mxu0  ;;  %v2470_v20 = vpop.f32.mrb[3].mxu1 }
 0x23b   : > { %vm2485_vm3 = vcmp.ge.f32.partialorder %v2912_v59, 0.0  ;;  %v2502_v21 = vmul.f32 %v2912_v59, %v4162_v8  ;;  %vm2487_vm4 = vcmp.ge.f32.partialorder %v2920_v14, 0.0  ;;  %v2504_v22 = vmul.f32 %v2920_v14, %v4162_v8 }
 0x23c   : > { %v2517_v23 = vsel %vm2484_vm1, %v2911_v10, %v2501_v17  ;;  %v2519_v24 = vsel %vm2486_vm2, %v2919_v11, %v2503_v18  ;;  %v2913_v25 = vadd.f32 %v2256_v15, %v890_v6  ;;  %v2921_v26 = vadd.f32 %v2468_v16, %v890_v6 }
 0x23d   : > { %2533 = vst [vmem:[%s4168_s17] sm:$0xff] %v2517_v23  ;;  %2535 = vst [vmem:[%s4168_s17 + $0x10] sm:$0xff] %v2519_v24  ;;  %v2518_v27 = vsel %vm2485_vm3, %v2912_v59, %v2502_v21  ;;  %v2520_v28 = vsel %vm2487_vm4, %v2920_v14, %v2504_v22  ;;  %v2914_v30 = vadd.f32 %v2258_v19, %v890_v6 }
 0x23e   : > { %v2922_v31 = vadd.f32 %v2470_v20, %v890_v6  ;;  %2534 = vst [vmem:[%s4168_s17 + $0x8] sm:$0xff] %v2518_v27  ;;  %2536 = vst [vmem:[%s4168_s17 + $0x18] sm:$0xff] %v2520_v28  ;;  %vm2488_vm5 = vcmp.ge.f32.partialorder %v2913_v25, 0.0  ;;  %v2505_v32 = vmul.f32 %v2913_v25, %v4162_v8  ;;  %vm2490_vm6 = vcmp.ge.f32.partialorder %v2921_v26, 0.0 }
 0x23f   : > { %v2507_v33 = vmul.f32 %v2921_v26, %v4162_v8  ;;  %vm2489_vm7 = vcmp.ge.f32.partialorder %v2914_v30, 0.0  ;;  %v2506_v34 = vmul.f32 %v2914_v30, %v4162_v8  ;;  %v2262_v36 = vpop.f32.mrb[4].mxu0  ;;  %v2474_v37 = vpop.f32.mrb[4].mxu1 }
 0x240   : > { %vm2491_vm8 = vcmp.ge.f32.partialorder %v2922_v31, 0.0  ;;  %v2508_v35 = vmul.f32 %v2922_v31, %v4162_v8  ;;  %v2521_v38 = vsel %vm2488_vm5, %v2913_v25, %v2505_v32  ;;  %v2915_v40 = vadd.f32 %v2262_v36, %v895_v29  ;;  %v2264_v42 = vpop.f32.mrb[5].mxu0  ;;  %v2476_v43 = vpop.f32.mrb[5].mxu1 }
 0x241   : > { %v2523_v39 = vsel %vm2490_vm6, %v2921_v26, %v2507_v33  ;;  %v2923_v41 = vadd.f32 %v2474_v37, %v895_v29  ;;  %2537 = vst [vmem:[%s4168_s17 + $0x20] sm:$0xff] %v2521_v38  ;;  %v2522_v44 = vsel %vm2489_vm7, %v2914_v30, %v2506_v34  ;;  %v2916_v46 = vadd.f32 %v2264_v42, %v895_v29  ;;  %v2266_v48 = vpop.f32.mrb[6].mxu0  ;;  %v2478_v49 = vpop.f32.mrb[6].mxu1 }
 0x242   : > { %2539 = vst [vmem:[%s4168_s17 + $0x30] sm:$0xff] %v2523_v39  ;;  %v2524_v45 = vsel %vm2491_vm8, %v2922_v31, %v2508_v35  ;;  %v2924_v47 = vadd.f32 %v2476_v43, %v895_v29  ;;  %2538 = vst [vmem:[%s4168_s17 + $0x28] sm:$0xff] %v2522_v44  ;;  %vm2492_vm9 = vcmp.ge.f32.partialorder %v2915_v40, 0.0  ;;  %v2509_v50 = vmul.f32 %v2915_v40, %v4162_v8  ;;  %v2268_v52 = vpop.f32.mrb[7].mxu0  ;;  %v2480_v53 = vpop.f32.mrb[7].mxu1 }
 0x243   : > { %2540 = vst [vmem:[%s4168_s17 + $0x38] sm:$0xff] %v2524_v45  ;;  %vm2494_vm10 = vcmp.ge.f32.partialorder %v2923_v41, 0.0  ;;  %v2511_v51 = vmul.f32 %v2923_v41, %v4162_v8  ;;  %vm2493_vm11 = vcmp.ge.f32.partialorder %v2916_v46, 0.0  ;;  %v2510_v55 = vmul.f32 %v2916_v46, %v4162_v8 }
 0x244   : > { %vm2495_vm12 = vcmp.ge.f32.partialorder %v2924_v47, 0.0  ;;  %v2512_v56 = vmul.f32 %v2924_v47, %v4162_v8  ;;  %v2525_v57 = vsel %vm2492_vm9, %v2915_v40, %v2509_v50  ;;  %v2917_v60 = vadd.f32 %v2266_v48, %v900_v54  ;;  %v2575_v12 = vld [vmem:[%s4168_s17 + $0x10] sm:$0xff] (%p3431_p5) }
 0x245   : > { %v2527_v58 = vsel %vm2494_vm10, %v2923_v41, %v2511_v51  ;;  %v2925_v61 = vadd.f32 %v2478_v49, %v900_v54  ;;  %2541 = vst [vmem:[%s4168_s17 + $0x40] sm:$0xff] %v2525_v57  ;;  %v2526_v62 = vsel %vm2493_vm11, %v2916_v46, %v2510_v55  ;;  %v2918_v0 = vadd.f32 %v2268_v52, %v900_v54  ;;  %2555 = sbr.rel (!%p3431_p5) target bundleno = 596 (0x254), region = 63  ;;  %v2573_v11 = vld [vmem:[%s4168_s17 + $0x8] sm:$0xff] (%p3431_p5)  ;;  %v2577_v13 = vld [vmem:[%s4168_s17 + $0x18] sm:$0xff] (%p3431_p5) }
 0x246   : > { %2543 = vst [vmem:[%s4168_s17 + $0x50] sm:$0xff] %v2527_v58  ;;  %v2528_v63 = vsel %vm2495_vm12, %v2924_v47, %v2512_v56  ;;  %v2926_v1 = vadd.f32 %v2480_v53, %v900_v54  ;;  %2542 = vst [vmem:[%s4168_s17 + $0x48] sm:$0xff] %v2526_v62  ;;  %vm2496_vm13 = vcmp.ge.f32.partialorder %v2917_v60, 0.0  ;;  %v2513_v2 = vmul.f32 %v2917_v60, %v4162_v8 }
 0x247   : > { %2544 = vst [vmem:[%s4168_s17 + $0x58] sm:$0xff] %v2528_v63  ;;  %vm2498_vm14 = vcmp.ge.f32.partialorder %v2925_v61, 0.0  ;;  %v2515_v3 = vmul.f32 %v2925_v61, %v4162_v8  ;;  %vm2497_vm15 = vcmp.ge.f32.partialorder %v2918_v0, 0.0  ;;  %v2514_v4 = vmul.f32 %v2918_v0, %v4162_v8  ;;  %2574 = vst [vmem:[%s2558_s24 + $0x8] sm:$0xff] (%p3431_p5), %v2573_v11 }
 0x248   : > { %vm2499_vm0 = vcmp.ge.f32.partialorder %v2926_v1, 0.0  ;;  %v2516_v5 = vmul.f32 %v2926_v1, %v4162_v8  ;;  %v2529_v6 = vsel %vm2496_vm13, %v2917_v60, %v2513_v2  ;;  %v2571_v8 = vld [vmem:[%s4168_s17] sm:$0xff] (%p3431_p5)  ;;  %2576 = vst [vmem:[%s2558_s24 + $0x10] sm:$0xff] (%p3431_p5), %v2575_v12  ;;  %2578 = vst [vmem:[%s2558_s24 + $0x18] sm:$0xff] (%p3431_p5), %v2577_v13 }
 0x249   : > { %v2531_v7 = vsel %vm2498_vm14, %v2925_v61, %v2515_v3  ;;  %2545 = vst [vmem:[%s4168_s17 + $0x60] sm:$0xff] %v2529_v6  ;;  %v2530_v9 = vsel %vm2497_vm15, %v2918_v0, %v2514_v4  ;;  %v2579_v59 = vld [vmem:[%s4168_s17 + $0x20] sm:$0xff] (%p3431_p5)  ;;  %v2581_v14 = vld [vmem:[%s4168_s17 + $0x28] sm:$0xff] (%p3431_p5)  ;;  %2572 = vst [vmem:[%s2558_s24] sm:$0xff] (%p3431_p5), %v2571_v8 }
 0x24a   : > { %2547 = vst [vmem:[%s4168_s17 + $0x70] sm:$0xff] %v2531_v7  ;;  %v2532_v10 = vsel %vm2499_vm0, %v2926_v1, %v2516_v5  ;;  %2546 = vst [vmem:[%s4168_s17 + $0x68] sm:$0xff] %v2530_v9  ;;  %v2583_v15 = vld [vmem:[%s4168_s17 + $0x30] sm:$0xff] (%p3431_p5)  ;;  %v2585_v16 = vld [vmem:[%s4168_s17 + $0x38] sm:$0xff] (%p3431_p5) }
 0x24b   : > { %2548 = vst [vmem:[%s4168_s17 + $0x78] sm:$0xff] %v2532_v10  ;;  %2580 = vst [vmem:[%s2558_s24 + $0x40] sm:$0xff] (%p3431_p5), %v2579_v59 }
 0x24c   : > { %2582 = vst [vmem:[%s2558_s24 + $0x48] sm:$0xff] %v2581_v14  ;;  %v2587_v17 = vld [vmem:[%s4168_s17 + $0x40] sm:$0xff]  ;;  %2584 = vst [vmem:[%s2558_s24 + $0x50] sm:$0xff] %v2583_v15 }
 0x24d   : > { %2586 = vst [vmem:[%s2558_s24 + $0x58] sm:$0xff] %v2585_v16  ;;  %2588 = vst [vmem:[%s2558_s24 + $0x80] sm:$0xff] %v2587_v17  ;;  %v2589_v18 = vld [vmem:[%s4168_s17 + $0x48] sm:$0xff]  ;;  %v2591_v19 = vld [vmem:[%s4168_s17 + $0x50] sm:$0xff] }
 0x24e   : > { %v2593_v20 = vld [vmem:[%s4168_s17 + $0x58] sm:$0xff]  ;;  %2590 = vst [vmem:[%s2558_s24 + $0x88] sm:$0xff] %v2589_v18  ;;  %2592 = vst [vmem:[%s2558_s24 + $0x90] sm:$0xff] %v2591_v19 }
 0x24f   : > { %2594 = vst [vmem:[%s2558_s24 + $0x98] sm:$0xff] %v2593_v20 }
 0x250   : > { %v2595_v21 = vld [vmem:[%s4168_s17 + $0x60] sm:$0xff] }
 0x251   : > { %v2597_v22 = vld [vmem:[%s4168_s17 + $0x68] sm:$0xff]  ;;  %v2599_v23 = vld [vmem:[%s4168_s17 + $0x70] sm:$0xff]  ;;  %2596 = vst [vmem:[%s2558_s24 + $0xc0] sm:$0xff] %v2595_v21 }
 0x252   : > { %2598 = vst [vmem:[%s2558_s24 + $0xc8] sm:$0xff] %v2597_v22  ;;  %2600 = vst [vmem:[%s2558_s24 + $0xd0] sm:$0xff] %v2599_v23  ;;  %v2601_v24 = vld [vmem:[%s4168_s17 + $0x78] sm:$0xff] }
 0x253   : > { %2602 = vst [vmem:[%s2558_s24 + $0xd8] sm:$0xff] %v2601_v24 }
 0x254 PF: > { %p12_p10 = scmp.ge.s32.totalorder %s3418_s20, 4   ;;  %s4237_s17 = smov %s3366_s18 }
 0x255   : > { %s4238_s18 = smov %s3429_s23  ;;  %s4239_s19 = smov %s3418_s20 }
 0x256   :  { %14 = sbr.rel (!%p12_p10) target bundleno = 4 (0x4), region = 117 }

// kernel: _lambda_.7
= control target key start
LH: loop header
LB: loop body
LE: loop exit
PB: predicated region body
PF: predicated region fallthrough
CT: control target
= control target key end

     0   :  { %14 = vsyncpa [#allocation3], 0  ;;  %s1990_s0 = inlined_call_operand.vmem [shape: f32[2], index: 0, kind: input, shape index: {}, may-alias: {0,1}]   ;;  %s1991_s1 = inlined_call_operand.vmem [shape: f32[2], index: 1, kind: input, shape index: {}, may-alias: {0,1}]   ;;  %s1992_s2 = inlined_call_operand.vmem [shape: f32[2,8,864], index: 2, kind: input, shape index: {}]   ;;  %s1993_s3 = inlined_call_operand.vmem [shape: f32[2,864,128], index: 3, kind: input, shape index: {}]   ;;  %s1994_s4 = inlined_call_operand.vmem [shape: f32[2,1,128], index: 4, kind: input, shape index: {}]   ;;  %s1995_s5 = inlined_call_operand.vmem [shape: f32[2,128,64], index: 5, kind: input, shape index: {}]   ;;  %s1996_s6 = inlined_call_operand.vmem [shape: f32[2,1,64], index: 6, kind: input, shape index: {}]   ;;  %s1997_s7 = inlined_call_operand.vmem [shape: f32[2,64,6], index: 7, kind: input, shape index: {}]   ;;  %s1998_s8 = inlined_call_operand.vmem [shape: f32[2,1,6], index: 8, kind: input, shape index: {}]   ;;  %s1999_s9 = inlined_call_operand.vmem [shape: f32[2,8,6], index: 9, kind: output, shape index: {}]  }
   0x1   :  { %15 = vsyncpa [#allocation5], 0  ;;  %s1733_s30 = smov 0  }
   0x2 LB: > { %s1739_s10 = sadd.s32 4294967295, %s1676_s30   ;;  %p1200_p0 = scmp.ge.s32.totalorder %s1676_s30, 1  ;;  %s1676_s30 = sphi %s1733_s30, %s21_s30  }
   0x3   : > { %p276_p1 = scmp.lt.s32.totalorder %s1676_s30, 3  ;;  %s289_s13 = sshll.u32 %s1990_s0, 4  ;;  %s290_s13 = int_to_ptr.vmem [resolvable:$true] %s289_s13 }
   0x4   : > { %p2000_p3 = scmp.eq.s32.totalorder %s1739_s10, 0  ;;  %s300_s17 = sshll.u32 %s1991_s1, 4  ;;  %s301_s17 = int_to_ptr.vmem [resolvable:$true] %s300_s17 }
   0x5   : > { %p1746_p2 = pnand %p1200_p0, %p276_p1  ;;  %s1632_s19 = scalar_lea.vmem %s290_s13, 16 }
   0x6   : > { %p1633_p6 = scmp.ne.s32.totalorder %s290_s13, %s1632_s19  ;;  %p1640_p10 = scmp.lt.s32.totalorder %s290_s13, %s290_s13 }
   0x7   : > { %s2002_s14 = scalar_select %p1746_p2, 1, 0 }
   0x8   : > { %p1608_p4 = pneg %p1746_p2  ;;  %p1641_p11 = scmp.lt.s32.totalorder %s1632_s19, %s1632_s19 }
   0xa   : > { %p1758_p5 = pnand %p2000_p3, %p1608_p4  ;;  %p1642_p12 = por %p1641_p11, %p1640_p10 }
   0xc   : > { %p1634_p7 = pneg %p1758_p5 }
   0xe   : > { %p1635_p8 = pnand %p1634_p7, %p1633_p6 }
  0x10   : > { %p1636_p9 = pneg %p1635_p8 }
  0x12   : > { %p1643_p13 = pnand %p1642_p12, %p1636_p9 }
  0x14   : > { %1646 = shalt.err (!%p1643_p13)
}
  0x15   : > { %s1678_s20 = smov [#allocation2]   ;;  %s1647_s21 = scalar_lea.vmem %s301_s17, 16 }
  0x16   : > { %1611 = dma.vmem_to_smem (!%p1758_p5), %s290_s13, 16, %s1678_s20, [#allocation3]  }
  0x17   : > { %p1648_p0 = scmp.ne.s32.totalorder %s301_s17, %s1647_s21  ;;  %p1655_p3 = scmp.lt.s32.totalorder %s301_s17, %s301_s17 }
  0x18   : > { %p1656_p2 = scmp.lt.s32.totalorder %s1647_s21, %s1647_s21 }
  0x19   : > { %p1650_p1 = pnand %p1648_p0, %p1634_p7 }
  0x1a   : > { %p1657_p6 = por %p1656_p2, %p1655_p3 }
  0x1b   : > { %p1651_p4 = pneg %p1650_p1 }
  0x1d   : > { %p1658_p8 = pnand %p1657_p6, %p1651_p4 }
  0x1f   : > { %1661 = shalt.err (!%p1658_p8)
}
  0x20   : > { %s1679_s22 = smov [#allocation4]   ;;  %p2004_p9 = scmp.ne.s32.totalorder %s2002_s14, 0 }
  0x21   : > { %1614 = dma.vmem_to_smem (!%p1758_p5), %s301_s17, 16, %s1679_s22, [#allocation5]  }
  0x22   : > { %363 = sbr.rel (%p2004_p9) target bundleno = 776 (0x308), region = 56  ;;  %p2005_p10 = scmp.eq.s32.totalorder (!%p2004_p9), %s1739_s10, 0 }
  0x29   : > { %1667 = dma.done.wait (%p2005_p10), [#allocation3], 16   ;;  %p2006_p11 = pmov %p2005_p10 }
  0x2a   : > { %p2007_p7 = pmov %p2005_p10 }
  0x2b   : > { %1669 = vsyncadd (%p2006_p11), [#allocation3], 4294967280 }
  0x2c   : > { %1671 = dma.done.wait (%p2007_p7), [#allocation5], 16   ;;  %p2008_p2 = pmov %p2007_p7 }
  0x2e   : > { %1673 = vsyncadd (%p2008_p2), [#allocation5], 4294967280 }
  0x2f   : > { %373 = sfence }
  0x30   : > { %p427_p3 = scmp.lt.s32.totalorder %s1739_s10, 1  ;;  %vm1681_vm0 = vmmov 0   ;;  %vm582_vm1 = vcmask 785408   ;;  %s866_s25 = sld [smem:[#allocation2 + %s1739_s10]]  ;;  %vm984_vm4 = vcmask 523264   ;;  %vm1058_vm5 = vcmask 48128  }
  0x31   : > { %s964_s26 = sld [smem:[#allocation4 + %s1739_s10]] }
  0x32   : > { %s1780_s23 = scalar_select %p427_p3, %s1739_s10, 1 }
  0x34   : > { %s1599_s24 = smul.u32 864, %s1780_s23  ;;  %s1221_s13 = sshll.u32 %s1780_s23, 7 }
  0x35   : > { %s1598_s28 = smul.u32 56, %s1780_s23  ;;  %s1927_s16 = scalar_lea.vmem %s1995_s5, %s1221_s13 }
  0x36   : > { %s1786_s27 = scalar_lea.vmem %s1993_s3, %s1599_s24  ;;  %s1222_s17 = sshll.u32 %s1780_s23, 6 }
  0x37   : > { %v483_v0 = vld [vmem:[%s1786_s27 + $0x80] sm:$0xff]  ;;  %v484_v1 = vld [vmem:[%s1786_s27 + $0x88] sm:$0xff]  ;;  %v485_v11 = vld [vmem:[%s1786_s27 + $0x90] sm:$0xff]  ;;  %s1839_s12 = scalar_lea.vmem %s1992_s2, %s1598_s28  ;;  %s1956_s20 = scalar_lea.vmem %s1997_s7, %s1222_s17 }
  0x38   : > { %v467_v2 = vld [vmem:[%s1786_s27] sm:$0xff]  ;;  %v1448_v3 = vpack.c.bf16 %v484_v1, %v483_v0  ;;  %v468_v4 = vld [vmem:[%s1786_s27 + $0x8] sm:$0xff]  ;;  %v486_v13 = vld [vmem:[%s1786_s27 + $0x98] sm:$0xff]  ;;  %s439_s24 = scalar_lea.vmem %s1994_s4, %s1780_s23  ;;  %s447_s29 = scalar_lea.vmem %s1996_s6, %s1780_s23 }
  0x39   : > { %v515_v5 = vld [vmem:[%s1786_s27 + $0x180] sm:$0xff]  ;;  %v516_v6 = vld [vmem:[%s1786_s27 + $0x188] sm:$0xff]  ;;  %v1450_v7 = vpack.c.bf16 %v468_v4, %v467_v2  ;;  %v469_v14 = vld [vmem:[%s1786_s27 + $0x10] sm:$0xff]  ;;  %v1452_v16 = vpack.c.bf16 %v486_v13, %v485_v11  ;;  %s455_s13 = scalar_lea.vmem %s1998_s8, %s1780_s23  ;;  %s1213_s14 = sshll.u32 %s1780_s23, 3 }
  0x3a   : > { %v1480_v8 = vpack.c.bf16 %v516_v6, %v515_v5  ;;  %v499_v9 = vld [vmem:[%s1786_s27 + $0x100] sm:$0xff]  ;;  %v500_v10 = vld [vmem:[%s1786_s27 + $0x108] sm:$0xff]  ;;  %1449 = vmatprep.subr.bf16.mxu0 %v1448_v3  ;;  %v470_v15 = vld [vmem:[%s1786_s27 + $0x18] sm:$0xff] }
  0x3b   : > { %v1482_v12 = vpack.c.bf16 %v500_v10, %v499_v9  ;;  %1451 = vmatpush3.bf16.msra.mxu0 %v1450_v7  ;;  %v1454_v17 = vpack.c.bf16 %v470_v15, %v469_v14  ;;  %v517_v18 = vld [vmem:[%s1786_s27 + $0x190] sm:$0xff]  ;;  %v518_v19 = vld [vmem:[%s1786_s27 + $0x198] sm:$0xff]  ;;  %v487_v23 = vld [vmem:[%s1786_s27 + $0xa0] sm:$0xff] }
  0x3c   : > { %1481 = vmatprep.subr.bf16.mxu1 %v1480_v8  ;;  %v501_v20 = vld [vmem:[%s1786_s27 + $0x110] sm:$0xff]  ;;  %v1484_v21 = vpack.c.bf16 %v518_v19, %v517_v18  ;;  %v502_v22 = vld [vmem:[%s1786_s27 + $0x118] sm:$0xff]  ;;  %v488_v24 = vld [vmem:[%s1786_s27 + $0xa8] sm:$0xff]  ;;  %1453 = vmatprep.subr.bf16.mxu0 %v1452_v16 }
  0x3d   : > { %1483 = vmatpush3.bf16.msra.mxu1 %v1482_v12  ;;  %v1486_v25 = vpack.c.bf16 %v502_v22, %v501_v20  ;;  %v1456_v26 = vpack.c.bf16 %v488_v24, %v487_v23  ;;  %v471_v27 = vld [vmem:[%s1786_s27 + $0x20] sm:$0xff]  ;;  %v472_v28 = vld [vmem:[%s1786_s27 + $0x28] sm:$0xff]  ;;  %v489_v35 = vld [vmem:[%s1786_s27 + $0xb0] sm:$0xff] }
  0x3e   : > { %v519_v29 = vld [vmem:[%s1786_s27 + $0x1a0] sm:$0xff]  ;;  %1485 = vmatprep.subr.bf16.mxu1 %v1484_v21  ;;  %v520_v30 = vld [vmem:[%s1786_s27 + $0x1a8] sm:$0xff]  ;;  %v1458_v33 = vpack.c.bf16 %v472_v28, %v471_v27  ;;  %v490_v36 = vld [vmem:[%s1786_s27 + $0xb8] sm:$0xff] }
  0x3f   : > { %v503_v31 = vld [vmem:[%s1786_s27 + $0x120] sm:$0xff]  ;;  %v504_v32 = vld [vmem:[%s1786_s27 + $0x128] sm:$0xff]  ;;  %1455 = vmatpush3.bf16.msra.mxu0 %v1454_v17  ;;  %v1488_v34 = vpack.c.bf16 %v520_v30, %v519_v29  ;;  %v473_v37 = vld [vmem:[%s1786_s27 + $0x30] sm:$0xff]  ;;  %v1460_v39 = vpack.c.bf16 %v490_v36, %v489_v35 }
  0x40   : > { %1457 = vmatprep.subr.bf16.mxu0 %v1456_v26  ;;  %v1490_v38 = vpack.c.bf16 %v504_v32, %v503_v31  ;;  %v474_v40 = vld [vmem:[%s1786_s27 + $0x38] sm:$0xff]  ;;  %v521_v41 = vld [vmem:[%s1786_s27 + $0x1b0] sm:$0xff]  ;;  %v491_v46 = vld [vmem:[%s1786_s27 + $0xc0] sm:$0xff] }
  0x41   : > { %1487 = vmatpush3.bf16.msra.mxu1 %v1486_v25  ;;  %v522_v42 = vld [vmem:[%s1786_s27 + $0x1b8] sm:$0xff]  ;;  %v505_v44 = vld [vmem:[%s1786_s27 + $0x130] sm:$0xff]  ;;  %v492_v47 = vld [vmem:[%s1786_s27 + $0xc8] sm:$0xff]  ;;  %v1462_v48 = vpack.c.bf16 %v474_v40, %v473_v37 }
  0x42   : > { %1489 = vmatprep.subr.bf16.mxu1 %v1488_v34  ;;  %v1492_v43 = vpack.c.bf16 %v522_v42, %v521_v41  ;;  %v506_v45 = vld [vmem:[%s1786_s27 + $0x138] sm:$0xff]  ;;  %v523_v49 = vld [vmem:[%s1786_s27 + $0x1c0] sm:$0xff]  ;;  %v524_v50 = vld [vmem:[%s1786_s27 + $0x1c8] sm:$0xff]  ;;  %v1464_v52 = vpack.c.bf16 %v492_v47, %v491_v46 }
  0x43   : > { %1459 = vmatpush3.bf16.msra.mxu0 %v1458_v33  ;;  %v1494_v51 = vpack.c.bf16 %v506_v45, %v505_v44  ;;  %v475_v53 = vld [vmem:[%s1786_s27 + $0x40] sm:$0xff]  ;;  %v476_v54 = vld [vmem:[%s1786_s27 + $0x48] sm:$0xff]  ;;  %v1496_v56 = vpack.c.bf16 %v524_v50, %v523_v49  ;;  %v493_v58 = vld [vmem:[%s1786_s27 + $0xd0] sm:$0xff] }
  0x44   : > { %1461 = vmatprep.subr.bf16.mxu0 %v1460_v39  ;;  %v507_v55 = vld [vmem:[%s1786_s27 + $0x140] sm:$0xff]  ;;  %v508_v57 = vld [vmem:[%s1786_s27 + $0x148] sm:$0xff]  ;;  %v494_v59 = vld [vmem:[%s1786_s27 + $0xd8] sm:$0xff]  ;;  %v1466_v62 = vpack.c.bf16 %v476_v54, %v475_v53 }
  0x45   : > { %1491 = vmatpush3.bf16.msra.mxu1 %v1490_v38  ;;  %v525_v60 = vld [vmem:[%s1786_s27 + $0x1d0] sm:$0xff]  ;;  %v526_v61 = vld [vmem:[%s1786_s27 + $0x1d8] sm:$0xff]  ;;  %v1498_v63 = vpack.c.bf16 %v508_v57, %v507_v55  ;;  %v1468_v0 = vpack.c.bf16 %v494_v59, %v493_v58  ;;  %v495_v6 = vld [vmem:[%s1786_s27 + $0xe0] sm:$0xff] }
  0x46   : > { %1493 = vmatprep.subr.bf16.mxu1 %v1492_v43  ;;  %v477_v1 = vld [vmem:[%s1786_s27 + $0x50] sm:$0xff]  ;;  %v478_v2 = vld [vmem:[%s1786_s27 + $0x58] sm:$0xff]  ;;  %v1500_v4 = vpack.c.bf16 %v526_v61, %v525_v60  ;;  %v496_v7 = vld [vmem:[%s1786_s27 + $0xe8] sm:$0xff] }
  0x47   : > { %1463 = vmatpush3.bf16.msra.mxu0 %v1462_v48  ;;  %v509_v3 = vld [vmem:[%s1786_s27 + $0x150] sm:$0xff]  ;;  %v510_v5 = vld [vmem:[%s1786_s27 + $0x158] sm:$0xff]  ;;  %v527_v8 = vld [vmem:[%s1786_s27 + $0x1e0] sm:$0xff]  ;;  %v1470_v10 = vpack.c.bf16 %v478_v2, %v477_v1  ;;  %v1472_v14 = vpack.c.bf16 %v496_v7, %v495_v6  ;;  %v1682_v1 = vmov 0.0  }
  0x48   : > { %1465 = vmatprep.subr.bf16.mxu0 %v1464_v52  ;;  %v528_v9 = vld [vmem:[%s1786_s27 + $0x1e8] sm:$0xff]  ;;  %v479_v11 = vld [vmem:[%s1786_s27 + $0x60] sm:$0xff]  ;;  %v1502_v13 = vpack.c.bf16 %v510_v5, %v509_v3  ;;  %v497_v19 = vld [vmem:[%s1786_s27 + $0xf0] sm:$0xff]  ;;  %v1680_v52 = vmov 0.0|0.0  }
  0x49   : > { %1495 = vmatpush3.bf16.msra.mxu1 %v1494_v51  ;;  %v461_v12 = vld [vmem:[%s1839_s12 + $0x8] sm:$0xff]  ;;  %v511_v16 = vld [vmem:[%s1786_s27 + $0x160] sm:$0xff]  ;;  %v1504_v18 = vpack.c.bf16 %v528_v9, %v527_v8  ;;  %v498_v20 = vld [vmem:[%s1786_s27 + $0xf8] sm:$0xff] }
  0x4a   : > { %1497 = vmatprep.subr.bf16.mxu1 %v1496_v56  ;;  %v480_v15 = vld [vmem:[%s1786_s27 + $0x68] sm:$0xff]  ;;  %650 = vmatprep.mubr.f32.mxu0 %v461_v12  ;;  %v463_v21 = vld [vmem:[%s1839_s12 + $0x18] sm:$0xff]  ;;  %v529_v22 = vld [vmem:[%s1786_s27 + $0x1f0] sm:$0xff]  ;;  %v1476_v26 = vpack.c.bf16 %v498_v20, %v497_v19 }
  0x4b   : > { %1467 = vmatpush3.bf16.msra.mxu0 %v1466_v62  ;;  %v512_v17 = vld [vmem:[%s1786_s27 + $0x168] sm:$0xff]  ;;  %v530_v23 = vld [vmem:[%s1786_s27 + $0x1f8] sm:$0xff]  ;;  %720 = vmatprep.mubr.f32.mxu1 %v463_v21  ;;  %v1474_v24 = vpack.c.bf16 %v480_v15, %v479_v11  ;;  %v481_v27 = vld [vmem:[%s1786_s27 + $0x70] sm:$0xff] }
  0x4c   : > { %1469 = vmatprep.subr.bf16.mxu0 %v1468_v0  ;;  %v1506_v25 = vpack.c.bf16 %v512_v17, %v511_v16  ;;  %v482_v28 = vld [vmem:[%s1786_s27 + $0x78] sm:$0xff]  ;;  %v513_v29 = vld [vmem:[%s1786_s27 + $0x170] sm:$0xff]  ;;  %v1508_v30 = vpack.c.bf16 %v530_v23, %v529_v22  ;;  %v547_v32 = vld [vmem:[%s1786_s27 + $0x280] sm:$0xff] }
  0x4d   : > { %1499 = vmatpush3.bf16.msra.mxu1 %v1498_v63  ;;  %v514_v31 = vld [vmem:[%s1786_s27 + $0x178] sm:$0xff]  ;;  %v548_v33 = vld [vmem:[%s1786_s27 + $0x288] sm:$0xff]  ;;  %v1478_v34 = vpack.c.bf16 %v482_v28, %v481_v27  ;;  %v531_v37 = vld [vmem:[%s1786_s27 + $0x200] sm:$0xff] }
  0x4e   : > { %1501 = vmatprep.subr.bf16.mxu1 %v1500_v4  ;;  %v1510_v35 = vpack.c.bf16 %v514_v31, %v513_v29  ;;  %v1512_v36 = vpack.c.bf16 %v548_v33, %v547_v32  ;;  %v532_v38 = vld [vmem:[%s1786_s27 + $0x208] sm:$0xff]  ;;  %v549_v39 = vld [vmem:[%s1786_s27 + $0x290] sm:$0xff]  ;;  %v550_v40 = vld [vmem:[%s1786_s27 + $0x298] sm:$0xff] }
  0x4f   : > { %1471 = vmatpush3.bf16.msra.mxu0 %v1470_v10  ;;  %v563_v41 = vld [vmem:[%s1786_s27 + $0x300] sm:$0xff]  ;;  %v564_v42 = vld [vmem:[%s1786_s27 + $0x308] sm:$0xff]  ;;  %v1514_v44 = vpack.c.bf16 %v532_v38, %v531_v37  ;;  %v462_v45 = vld [vmem:[%s1839_s12 + $0x10] sm:$0xff]  ;;  %v1516_v46 = vpack.c.bf16 %v550_v40, %v549_v39 }
  0x50   : > { %1473 = vmatprep.subr.bf16.mxu0 %v1472_v14  ;;  %v460_v43 = vld [vmem:[%s1839_s12] sm:$0xff]  ;;  %v533_v47 = vld [vmem:[%s1786_s27 + $0x210] sm:$0xff]  ;;  %v534_v48 = vld [vmem:[%s1786_s27 + $0x218] sm:$0xff]  ;;  %v1545_v50 = vpack.c.bf16 %v564_v42, %v563_v41 }
  0x51   : > { %1503 = vmatpush3.bf16.msra.mxu1 %v1502_v13  ;;  %v551_v49 = vld [vmem:[%s1786_s27 + $0x2a0] sm:$0xff]  ;;  %v552_v51 = vld [vmem:[%s1786_s27 + $0x2a8] sm:$0xff]  ;;  %v565_v53 = vld [vmem:[%s1786_s27 + $0x310] sm:$0xff]  ;;  %v1518_v55 = vpack.c.bf16 %v534_v48, %v533_v47 }
  0x52   : > { %1505 = vmatprep.subr.bf16.mxu1 %v1504_v18  ;;  %v566_v54 = vld [vmem:[%s1786_s27 + $0x318] sm:$0xff]  ;;  %v465_v56 = vld [vmem:[%s1839_s12 + $0x28] sm:$0xff]  ;;  %v1520_v57 = vpack.c.bf16 %v552_v51, %v551_v49  ;;  %v535_v58 = vld [vmem:[%s1786_s27 + $0x220] sm:$0xff] }
  0x53   : > { %1475 = vmatpush3.bf16.msra.mxu0 %v1474_v24  ;;  %v536_v59 = vld [vmem:[%s1786_s27 + $0x228] sm:$0xff]  ;;  %v553_v60 = vld [vmem:[%s1786_s27 + $0x2b0] sm:$0xff]  ;;  %v1548_v61 = vpack.c.bf16 %v566_v54, %v565_v53  ;;  %v554_v62 = vld [vmem:[%s1786_s27 + $0x2b8] sm:$0xff] }
  0x54   : > { %1477 = vmatprep.subr.bf16.mxu0 %v1476_v26  ;;  %v567_v63 = vld [vmem:[%s1786_s27 + $0x320] sm:$0xff]  ;;  %v568_v0 = vld [vmem:[%s1786_s27 + $0x328] sm:$0xff]  ;;  %v1522_v2 = vpack.c.bf16 %v536_v59, %v535_v58  ;;  %v1524_v3 = vpack.c.bf16 %v554_v62, %v553_v60  ;;  %v537_v4 = vld [vmem:[%s1786_s27 + $0x230] sm:$0xff] }
  0x55   : > { %1507 = vmatpush3.bf16.msra.mxu1 %v1506_v25  ;;  %v538_v5 = vld [vmem:[%s1786_s27 + $0x238] sm:$0xff]  ;;  %v555_v6 = vld [vmem:[%s1786_s27 + $0x2c0] sm:$0xff]  ;;  %v1551_v7 = vpack.c.bf16 %v568_v0, %v567_v63  ;;  %v556_v8 = vld [vmem:[%s1786_s27 + $0x2c8] sm:$0xff] }
  0x56   : > { %1509 = vmatprep.subr.bf16.mxu1 %v1508_v30  ;;  %v569_v9 = vld [vmem:[%s1786_s27 + $0x330] sm:$0xff]  ;;  %v570_v10 = vld [vmem:[%s1786_s27 + $0x338] sm:$0xff]  ;;  %v1526_v11 = vpack.c.bf16 %v538_v5, %v537_v4  ;;  %v1528_v12 = vpack.c.bf16 %v556_v8, %v555_v6  ;;  %v539_v13 = vld [vmem:[%s1786_s27 + $0x240] sm:$0xff] }
  0x57   : > { %1479 = vmatpush3.bf16.msra.mxu0 %v1478_v34  ;;  %v540_v14 = vld [vmem:[%s1786_s27 + $0x248] sm:$0xff]  ;;  %v557_v15 = vld [vmem:[%s1786_s27 + $0x2d0] sm:$0xff]  ;;  %v1554_v16 = vpack.c.bf16 %v570_v10, %v569_v9  ;;  %v558_v17 = vld [vmem:[%s1786_s27 + $0x2d8] sm:$0xff] }
  0x58   : > { %1513 = vmatprep.subr.bf16.mxu0 %v1512_v36  ;;  %v571_v18 = vld [vmem:[%s1786_s27 + $0x340] sm:$0xff]  ;;  %v572_v19 = vld [vmem:[%s1786_s27 + $0x348] sm:$0xff]  ;;  %v1530_v20 = vpack.c.bf16 %v540_v14, %v539_v13  ;;  %v1532_v21 = vpack.c.bf16 %v558_v17, %v557_v15  ;;  %v541_v22 = vld [vmem:[%s1786_s27 + $0x250] sm:$0xff] }
  0x59   : > { %1511 = vmatpush3.bf16.msra.mxu1 %v1510_v35  ;;  %v542_v23 = vld [vmem:[%s1786_s27 + $0x258] sm:$0xff]  ;;  %v559_v24 = vld [vmem:[%s1786_s27 + $0x2e0] sm:$0xff]  ;;  %v1557_v25 = vpack.c.bf16 %v572_v19, %v571_v18  ;;  %v560_v26 = vld [vmem:[%s1786_s27 + $0x2e8] sm:$0xff] }
  0x5a   : > { %1544 = vmatprep.subr.bf16.mxu1 %v1680_v52  ;;  %651 = vmatmul.mubr.f32.vlgmr.msra.gmra.mrb[0].mxu0 %v460_v43  ;;  %v573_v27 = vld [vmem:[%s1786_s27 + $0x350] sm:$0xff]  ;;  %v574_v28 = vld [vmem:[%s1786_s27 + $0x358] sm:$0xff]  ;;  %v1534_v29 = vpack.c.bf16 %v542_v23, %v541_v22  ;;  %v1536_v30 = vpack.c.bf16 %v560_v26, %v559_v24  ;;  %v543_v31 = vld [vmem:[%s1786_s27 + $0x260] sm:$0xff] }
  0x5b   : > { %1515 = vmatpush3.bf16.msra.mxu0 %v1514_v44  ;;  %790 = vmatprep.mubr.f32.mxu0 %v465_v56  ;;  %v544_v32 = vld [vmem:[%s1786_s27 + $0x268] sm:$0xff]  ;;  %v1560_v33 = vpack.c.bf16 %v574_v28, %v573_v27  ;;  %v561_v34 = vld [vmem:[%s1786_s27 + $0x2f0] sm:$0xff]  ;;  %v562_v35 = vld [vmem:[%s1786_s27 + $0x2f8] sm:$0xff]  ;;  %v868_v27 = vstv %s866_s25 }
  0x5c   : > { %721 = vmatmul.mubr.f32.vlgmr.msra.gmra.mrb[0].mxu1 %v462_v45  ;;  %1517 = vmatprep.subr.bf16.mxu0 %v1516_v46  ;;  %v1538_v36 = vpack.c.bf16 %v544_v32, %v543_v31  ;;  %v1540_v37 = vpack.c.bf16 %v562_v35, %v561_v34  ;;  %v545_v38 = vld [vmem:[%s1786_s27 + $0x270] sm:$0xff]  ;;  %v546_v39 = vld [vmem:[%s1786_s27 + $0x278] sm:$0xff]  ;;  %v464_v42 = vld [vmem:[%s1839_s12 + $0x20] sm:$0xff] }
  0x5d   : > { %1546 = vmatpush3.bf16.msra.mxu1 %v1545_v50  ;;  %1391 = vmatprep.mubr.msk.f32.mxu1 %vm1681_vm0, %v1682_v1  ;;  %v466_v40 = vld [vmem:[%s1839_s12 + $0x30] sm:$0xff]  ;;  %v1542_v41 = vpack.c.bf16 %v546_v39, %v545_v38  ;;  %v871_v43 = vld [vmem:[%s1927_s16] sm:$0xff]  ;;  %v872_v44 = vld [vmem:[%s1927_s16 + $0x8] sm:$0xff] }
  0x5e   : > { %1547 = vmatprep.subr.bf16.mxu1 %v1680_v52  ;;  %v873_v45 = vld [vmem:[%s1927_s16 + $0x10] sm:$0xff]  ;;  %v1563_v46 = vpack.c.bf16 %v872_v44, %v871_v43  ;;  %v874_v47 = vld [vmem:[%s1927_s16 + $0x18] sm:$0xff]  ;;  %v875_v49 = vld [vmem:[%s1927_s16 + $0x20] sm:$0xff] }
  0x5f   : > { %1519 = vmatpush3.bf16.msra.mxu0 %v1518_v55  ;;  %v1566_v48 = vpack.c.bf16 %v874_v47, %v873_v45  ;;  %v876_v50 = vld [vmem:[%s1927_s16 + $0x28] sm:$0xff]  ;;  %v877_v53 = vld [vmem:[%s1927_s16 + $0x30] sm:$0xff]  ;;  %v878_v54 = vld [vmem:[%s1927_s16 + $0x38] sm:$0xff] }
  0x60   : > { %1521 = vmatprep.subr.bf16.mxu0 %v1520_v57  ;;  %v1569_v51 = vpack.c.bf16 %v876_v50, %v875_v49  ;;  %v1572_v55 = vpack.c.bf16 %v878_v54, %v877_v53  ;;  %v879_v56 = vld [vmem:[%s1927_s16 + $0x40] sm:$0xff]  ;;  %v880_v57 = vld [vmem:[%s1927_s16 + $0x48] sm:$0xff]  ;;  %v881_v59 = vld [vmem:[%s1927_s16 + $0x50] sm:$0xff] }
  0x61   : > { %1549 = vmatpush3.bf16.msra.mxu1 %v1548_v61  ;;  %v1575_v58 = vpack.c.bf16 %v880_v57, %v879_v56  ;;  %v882_v60 = vld [vmem:[%s1927_s16 + $0x58] sm:$0xff]  ;;  %v883_v62 = vld [vmem:[%s1927_s16 + $0x60] sm:$0xff]  ;;  %v884_v63 = vld [vmem:[%s1927_s16 + $0x68] sm:$0xff] }
  0x62   : > { %1550 = vmatprep.subr.bf16.mxu1 %v1680_v52  ;;  %v1578_v61 = vpack.c.bf16 %v882_v60, %v881_v59  ;;  %v1581_v0 = vpack.c.bf16 %v884_v63, %v883_v62  ;;  %v969_v4 = vld [vmem:[%s1956_s20] sm:$0xff]  ;;  %v970_v5 = vld [vmem:[%s1956_s20 + $0x8] sm:$0xff]  ;;  %v971_v6 = vld [vmem:[%s1956_s20 + $0x10] sm:$0xff] }
  0x63   : > { %1523 = vmatpush3.bf16.msra.mxu0 %v1522_v2  ;;  %v886_v2 = vld [vmem:[%s1927_s16 + $0x78] sm:$0xff]  ;;  %v973_v10 = vld [vmem:[%s1956_s20 + $0x20] sm:$0xff]  ;;  %v975_v31 = vld [vmem:[%s1956_s20 + $0x30] sm:$0xff] }
  0x64   : > { %1525 = vmatprep.subr.bf16.mxu0 %v1524_v3  ;;  %v972_v8 = vld [vmem:[%s1956_s20 + $0x18] sm:$0xff]  ;;  %v1214_v14 = vld [vmem:[%s439_s24] ss:$0 sm:$0xff] }
  0x65   : > { %1552 = vmatpush3.bf16.msra.mxu1 %v1551_v7  ;;  %v1587_v7 = vpack.c.bf16 %v970_v5, %v969_v4  ;;  %v1590_v9 = vpack.c.bf16 %v972_v8, %v971_v6  ;;  %v976_v32 = vld [vmem:[%s1956_s20 + $0x38] sm:$0xff]  ;;  %v1216_v34 = vld [vmem:[%s447_s29] ss:$0 sm:$0xff] }
  0x66   : > { %1553 = vmatprep.subr.bf16.mxu1 %v1680_v52 }
  0x67   : > { %1527 = vmatpush3.bf16.msra.mxu0 %v1526_v11  ;;  %v974_v11 = vld [vmem:[%s1956_s20 + $0x28] sm:$0xff] }
  0x68   : > { %1529 = vmatprep.subr.bf16.mxu0 %v1528_v12  ;;  %v1593_v12 = vpack.c.bf16 %v974_v11, %v973_v10 }
  0x69   : > { %1555 = vmatpush3.bf16.msra.mxu1 %v1554_v16 }
  0x6a   : > { %1556 = vmatprep.subr.bf16.mxu1 %v1680_v52 }
  0x6b   : > { %1531 = vmatpush3.bf16.msra.mxu0 %v1530_v20 }
  0x6c   : > { %1533 = vmatprep.subr.bf16.mxu0 %v1532_v21 }
  0x6d   : > { %1558 = vmatpush3.bf16.msra.mxu1 %v1557_v25 }
  0x6e   : > { %1559 = vmatprep.subr.bf16.mxu1 %v1680_v52 }
  0x6f   : > { %1535 = vmatpush3.bf16.msra.mxu0 %v1534_v29 }
  0x70   : > { %1537 = vmatprep.subr.bf16.mxu0 %v1536_v30 }
  0x71   : > { %1561 = vmatpush3.bf16.msra.mxu1 %v1560_v33  ;;  %v1596_v33 = vpack.c.bf16 %v976_v32, %v975_v31 }
  0x72   : > { %1562 = vmatprep.subr.bf16.mxu1 %v1680_v52 }
  0x73   : > { %1539 = vmatpush3.bf16.msra.mxu0 %v1538_v36  ;;  %v966_v36 = vstv %s964_s26 }
  0x74   : > { %1392 = vmatmul.mubr.msk.f32.vlgmr.msra.gmra.mrb[2].mxu1 %vm582_vm1, %v466_v40  ;;  %1541 = vmatprep.subr.bf16.mxu0 %v1540_v37 }
  0x75   : > { %1426 = vmatprep.mubr.msk.f32.mxu1 %vm1681_vm0, %v1682_v1  ;;  %1564 = vmatpush3.bf16.msra.mxu1 %v1563_v46 }
  0x76   : > { %1565 = vmatprep.subr.bf16.mxu1 %v1680_v52 }
  0x77   : > { %1543 = vmatpush3.bf16.msra.mxu0 %v1542_v41  ;;  %v1217_v41 = vld [vmem:[%s455_s13] ss:$0 sm:$0xff] }
  0x78   : > { %1586 = vmatprep.subr.bf16.mxu0 %v1680_v52 }
  0x79   : > { %1567 = vmatpush3.bf16.msra.mxu1 %v1566_v48 }
  0x7a   : > { %791 = vmatmul.mubr.f32.vlgmr.msra.gmra.mrb[2].mxu0 %v464_v42  ;;  %1568 = vmatprep.subr.bf16.mxu1 %v1680_v52 }
  0x7b   : > { %1445 = vmatprep.mubr.msk.f32.mxu0 %vm1681_vm0, %v1682_v1  ;;  %v885_v1 = vld [vmem:[%s1927_s16 + $0x70] sm:$0xff]  ;;  %1588 = vmatpush3.bf16.msra.mxu0 %v1587_v7  ;;  %s459_s16 = scalar_lea.vmem %s1999_s9, %s1213_s14 }
  0x7c   : > { %v1584_v3 = vpack.c.bf16 %v886_v2, %v885_v1  ;;  %1589 = vmatprep.subr.bf16.mxu0 %v1680_v52 }
  0x7d   : > { %1570 = vmatpush3.bf16.msra.mxu1 %v1569_v51 }
  0x7e   : > { %1571 = vmatprep.subr.bf16.mxu1 %v1680_v52 }
  0x7f   : > { %1591 = vmatpush3.bf16.msra.mxu0 %v1590_v9 }
  0x80   : > { %1592 = vmatprep.subr.bf16.mxu0 %v1680_v52 }
  0x81   : > { %1573 = vmatpush3.bf16.msra.mxu1 %v1572_v55 }
  0x82   : > { %1574 = vmatprep.subr.bf16.mxu1 %v1680_v52 }
  0x83   : > { %1594 = vmatpush3.bf16.msra.mxu0 %v1593_v12 }
  0x84   : > { %1595 = vmatprep.subr.bf16.mxu0 %v1680_v52 }
  0x85   : > { %1576 = vmatpush3.bf16.msra.mxu1 %v1575_v58 }
  0x86   : > { %1577 = vmatprep.subr.bf16.mxu1 %v1680_v52 }
  0x87   : > { %1597 = vmatpush3.bf16.msra.mxu0 %v1596_v33 }
  0x89   : > { %1579 = vmatpush3.bf16.msra.mxu1 %v1578_v61 }
  0x8a   : > { %1580 = vmatprep.subr.bf16.mxu1 %v1680_v52 }
  0x8d   : > { %1582 = vmatpush3.bf16.msra.mxu1 %v1581_v0 }
  0x8e   : > { %1583 = vmatprep.subr.bf16.mxu1 %v1680_v52 }
  0x91   : > { %1585 = vmatpush3.bf16.msra.mxu1 %v1584_v3 }
 0x12d   : > { %v1255_v13 = vpop.f32.mrb[0].mxu0 }
 0x12e   : > { %v1256_v15 = vpop.f32.mrb[1].mxu0 }
 0x12f   : > { %v1290_v16 = vpop.f32.mrb[0].mxu1  ;;  %v1257_v17 = vadd.f32 %v1256_v15, %v1255_v13 }
 0x130   : > { %v1291_v18 = vpop.f32.mrb[1].mxu1 }
 0x131   : > { %v1292_v19 = vadd.f32 %v1291_v18, %v1290_v16  ;;  %v653_v20 = vadd.f32 %v1257_v17, %v1214_v14 }
 0x133   : > { %v723_v21 = vadd.f32 %v1292_v19, %v653_v20 }
 0x147   : > { %v862_v22 = vpop.f32.mrb[2].mxu1 }
 0x148   : > { %v1393_v23 = vpop.f32.mrb[3].mxu1 }
 0x14d   : > { %v1325_v52 = vpop.f32.mrb[2].mxu0 }
 0x14e   : > { %v1326_v24 = vpop.f32.mrb[3].mxu0 }
 0x14f   : > { %v1327_v25 = vadd.f32 %v1326_v24, %v1325_v52 }
 0x151   : > { %v793_v26 = vadd.f32 %v1327_v25, %v723_v21 }
 0x153   : > { %v863_v28 = vadd.f32 %v862_v22, %v793_v26 }
 0x155   : > { %vm867_vm2 = vcmp.ge.f32.partialorder %v863_v28, 0.0  ;;  %v869_v29 = vmul.f32 %v868_v27, %v863_v28 }
 0x157   : > { %v870_v30 = vsel %vm867_vm2, %v863_v28, %v869_v29 }
 0x158   : > { %1427 = vmatmul.mubr.f32.vlgmr.msra.gmra.mrb[4].mxu1 %v870_v30 }
 0x22b   : > { %v960_v35 = vpop.f32.mrb[4].mxu1 }
 0x22c   : > { %v961_v37 = vadd.f32 %v1216_v34, %v960_v35  ;;  %v1428_v38 = vpop.f32.mrb[5].mxu1 }
 0x22e   : > { %vm965_vm3 = vcmp.ge.f32.partialorder %v961_v37, 0.0  ;;  %v967_v39 = vmul.f32 %v966_v36, %v961_v37 }
 0x230   : > { %v968_v40 = vsel %vm965_vm3, %v961_v37, %v967_v39 }
 0x231   : > { %1446 = vmatmul.mubr.msk.f32.vlgmr.msra.gmra.mrb[4].mxu0 %vm984_vm4, %v968_v40 }
 0x304   : > { %v1054_v42 = vpop.f32.mrb[4].mxu0 }
 0x305   : > { %v1055_v43 = vadd.f32 %v1217_v41, %v1054_v42  ;;  %v1447_v44 = vpop.f32.mrb[5].mxu0 }
 0x307   : > { %1059 = vst.msk [vmem:[%s459_s16] sm:$0xff] %vm1058_vm5, %v1055_v43 }
 0x308 PF: > { %s21_s30 = sadd.s32 1, %s1676_s30  }
 0x309   : > { %p18_p5 = scmp.ge.s32.totalorder %s21_s30, 4  }
 0x30b   :  { %20 = sbr.rel (!%p18_p5) target bundleno = 2 (0x2), region = 113 }
 0x312   :  { %1079 = vsyncpa [#allocation3], 1 }
 0x313   :  { %1081 = vsyncpa [#allocation3 + $0x1], 1 }
 0x314   :  { %1082 = vsyncpa [#allocation5], 1 }

</bundles_post_ra>
